<compile_context>
chip_gen: v7x
topology: tpu7x:2x2x1
jax: 0.10.0
libtpu: 0.0.40
codegen_flags: <defaults>
</compile_context>

<pallas_src>
import functools

import jax
import jax.numpy as jnp
from jax import lax
from jax.experimental import pallas as pl
from jax.experimental.pallas import tpu as pltpu


def _pick_unroll(steps: int, live_gate_elems: int) -> int:
    """Unroll factor for the recurrence, capped by vreg pressure.

    live_gate_elems = B_tile * 4 * H_pad f32 elements live per step; the 256 KiB
    vreg file (64 x 4 KiB, same on v5e/v6e/v7x) bounds how many steps can be in
    flight before gates/h/c spill to VMEM on the serial critical path.
    """
    if live_gate_elems <= 2048:
        cap = 8
    elif live_gate_elems <= 8192:
        cap = 4
    else:
        cap = 2
    for u in (8, 4, 2):
        if u <= cap and steps % u == 0:
            return u
    return 1


def _make_kernel(num_layers: int):
    def kernel(x_ref, *refs):
        # refs layout:
        #   [wih_T_0, whh_T_0, b_0, ..., wih_T_{L-1}, whh_T_{L-1}, b_{L-1},
        #    wfc_T, bfc, out_ref, proj_scr, (seq_scr if num_layers > 1)]
        n_w = 3 * num_layers
        w_refs = refs[:n_w]
        wfc_ref = refs[n_w]
        bfc_ref = refs[n_w + 1]
        out_ref = refs[n_w + 2]
        proj_scr = refs[n_w + 3]                                  # (Tc, Bt, 4Hp)
        seq_scr = refs[n_w + 4] if num_layers > 1 else None       # (T,  Bt, Hp)

        T, Bt, D_in = x_ref.shape          # time-major input block
        Hp = w_refs[1].shape[0]            # padded hidden size (multiple of 128)
        G = 4 * Hp
        Tc = proj_scr.shape[0]             # time-chunk size

        h = jnp.zeros((Bt, Hp), jnp.float32)

        for l in range(num_layers):
            wih_ref = w_refs[3 * l]        # (D_l, 4Hp), gate cols (i, f, o, g)
            whh_ref = w_refs[3 * l + 1]    # (Hp, 4Hp)
            b_val = w_refs[3 * l + 2][...]  # (1, 4Hp) = b_ih + b_hh, reordered
            wdt = wih_ref.dtype
            is_last = l == num_layers - 1

            h = jnp.zeros((Bt, Hp), jnp.float32)
            c = jnp.zeros((Bt, Hp), jnp.float32)

            for c0 in range(0, T, Tc):
                c_len = min(Tc, T - c0)

                # ---- chunked input projection: one MXU matmul per chunk ----
                if l == 0:
                    xin = x_ref[c0:c0 + c_len].reshape(c_len * Bt, D_in)
                else:
                    # Reads the previous layer's outputs for this chunk before the
                    # recurrence below overwrites the same rows (program order).
                    xin = seq_scr[c0:c0 + c_len].reshape(c_len * Bt, Hp)
                proj = jnp.dot(xin.astype(wdt), wih_ref[...],
                               preferred_element_type=jnp.float32) + b_val
                proj_scr[0:c_len] = proj.reshape(c_len, Bt, G).astype(proj_scr.dtype)

                # ---- serial recurrence: only h @ W_hh + elementwise gates ----
                def step(t, carry, _c0=c0, _is_last=is_last,
                         _whh_ref=whh_ref, _wdt=wdt):
                    h_prev, c_prev = carry
                    gates = proj_scr[t].astype(jnp.float32) + jnp.dot(
                        h_prev.astype(_wdt), _whh_ref[...],
                        preferred_element_type=jnp.float32)
                    # Gate cols (i, f, o, g), each a whole number of 128-lane vregs.
                    sig = jax.nn.sigmoid(gates[:, : 3 * Hp])
                    i_g = sig[:, 0 * Hp:1 * Hp]
                    f_g = sig[:, 1 * Hp:2 * Hp]
                    o_g = sig[:, 2 * Hp:3 * Hp]
                    g_g = jnp.tanh(gates[:, 3 * Hp:])
                    c_new = f_g * c_prev + i_g * g_g
                    h_new = o_g * jnp.tanh(c_new)
                    if not _is_last:
                        seq_scr[_c0 + t] = h_new.astype(seq_scr.dtype)
                    return (h_new, c_new)

                h, c = lax.fori_loop(0, c_len, step, (h, c),
                                     unroll=_pick_unroll(c_len, Bt * G))

        # fc(out[:, -1, :]) == last layer's final h @ W_fc^T + b_fc
        out_ref[...] = (
            jnp.dot(h.astype(wfc_ref.dtype), wfc_ref[...],
                    preferred_element_type=jnp.float32)
            + bfc_ref[...]
        ).astype(out_ref.dtype)

    return kernel


def init_params(key, input_size, hidden_size, num_layers, num_classes):
    """Deterministic uniform(-1/sqrt(H), 1/sqrt(H)) init, mirroring PyTorch shapes."""
    H = hidden_size
    bound = 1.0 / (H ** 0.5)
    params = {"layers": [], "fc": None}
    for l in range(num_layers):
        d_in = input_size if l == 0 else H
        key, k1, k2, k3, k4 = jax.random.split(key, 5)
        w_ih = jax.random.uniform(k1, (4 * H, d_in), jnp.float32, -bound, bound)
        w_hh = jax.random.uniform(k2, (4 * H, H), jnp.float32, -bound, bound)
        b_ih = jax.random.uniform(k3, (4 * H,), jnp.float32, -bound, bound)
        b_hh = jax.random.uniform(k4, (4 * H,), jnp.float32, -bound, bound)
        params["layers"].append((w_ih, w_hh, b_ih, b_hh))
    key, k1, k2 = jax.random.split(key, 3)
    w_fc = jax.random.uniform(k1, (num_classes, H), jnp.float32, -bound, bound)
    b_fc = jax.random.uniform(k2, (num_classes,), jnp.float32, -bound, bound)
    params["fc"] = (w_fc, b_fc)
    return params


def flatten_params(params, dtype=jnp.float32, lane=128):
    """Pre-transpose for x@W, fuse biases, reorder gates to (i,f,o,g), pad hidden.

    The hidden size is zero-padded to a multiple of `lane` (128) so every gate
    slice is whole 128-lane vregs inside the kernel.  Zero padding is exact:
    padded hidden units stay identically 0 through the LSTM recurrence and the fc.

    dtype=jnp.bfloat16 is supported (and recommended) on v5e, v6e and v7x — the
    MXU is natively bf16 on every generation; gate/c/h math stays f32 in-kernel.
    """
    H = params["layers"][0][1].shape[1]
    Hp = ((H + lane - 1) // lane) * lane

    def gate_blocks(a):  # PyTorch gate row blocks (i, f, g, o) -> (i, f, o, g)
        return [a[k * H:(k + 1) * H] for k in (0, 1, 3, 2)]

    def prep_w(w, pad_in):  # w: (4H, D) -> (D[_pad], 4Hp)
        blocks = [jnp.pad(b, ((0, Hp - H), (0, 0))) for b in gate_blocks(w)]
        wcat = jnp.concatenate(blocks, axis=0)            # (4Hp, D)
        if pad_in:
            wcat = jnp.pad(wcat, ((0, 0), (0, Hp - wcat.shape[1])))
        return jnp.transpose(wcat).astype(dtype)

    def prep_b(b):  # (4H,) -> (1, 4Hp)
        blocks = [jnp.pad(x, (0, Hp - H)) for x in gate_blocks(b)]
        return jnp.concatenate(blocks).reshape(1, -1).astype(jnp.float32)

    flat = []
    for l, (w_ih, w_hh, b_ih, b_hh) in enumerate(params["layers"]):
        flat.append(prep_w(w_ih, pad_in=(l > 0)))         # (D_in or Hp, 4Hp)
        flat.append(prep_w(w_hh, pad_in=True))            # (Hp, 4Hp)
        flat.append(prep_b(b_ih + b_hh))                  # (1, 4Hp)
    w_fc, b_fc = params["fc"]
    flat.append(jnp.transpose(jnp.pad(w_fc, ((0, 0), (0, Hp - H)))).astype(dtype))  # (Hp, C)
    flat.append(b_fc.reshape(1, -1).astype(jnp.float32))                            # (1, C)
    return tuple(flat)


@functools.partial(jax.jit, static_argnames=("chunk_t", "batch_tiles"))
def lancet_bc_forward(x, flat_params, *, chunk_t=128, batch_tiles=None):
    """x: (B, T, input_size) batch_first, exactly like the PyTorch module."""
    B, T, D = x.shape
    num_layers = (len(flat_params) - 2) // 3
    Hp = flat_params[1].shape[0]           # padded hidden size
    C = flat_params[-2].shape[1]
    assert flat_params[0].shape[0] == D, "input_size mismatch with flattened params"

    # Batch-tile grid axis ("parallel") for 2-TensorCore chips (v7x).  Default off
    # elsewhere: on 1-TC chips it would just serialize the latency-bound recurrence.
    if batch_tiles is None:
        try:
            two_tc = "v7" in jax.devices()[0].device_kind.lower()
        except Exception:
            two_tc = False
        nbt = 2 if (two_tc and B % 16 == 0) else 1
    else:
        nbt = int(batch_tiles)
    assert B % nbt == 0, "batch must divide evenly into batch tiles"
    Bt = B // nbt
    assert nbt == 1 or Bt % 8 == 0, "per-core batch tile must be a sublane multiple"

    Tc = max(1, min(T, int(chunk_t)))      # time-chunk for the input projection
    sdt = flat_params[0].dtype             # scratch dtype follows weight dtype

    # Time-major input (cheap XLA transpose outside the kernel).
    x_tm = jnp.transpose(x, (1, 0, 2))     # (T, B, D)

    scratch_shapes = [pltpu.VMEM((Tc, Bt, 4 * Hp), sdt)]      # chunked input projection
    if num_layers > 1:
        scratch_shapes.append(pltpu.VMEM((T, Bt, Hp), sdt))   # inter-layer sequence

    in_specs = [pl.BlockSpec((T, Bt, D), lambda b: (0, b, 0))]
    for w in flat_params:
        in_specs.append(pl.BlockSpec(w.shape, lambda b: (0, 0)))
    out_specs = pl.BlockSpec((Bt, C), lambda b: (b, 0))

    # Cost estimate (whole problem) for XLA scheduling around the recurrent kernel.
    flops = 0
    wbytes = 0
    d_in = D
    for _ in range(num_layers):
        flops += 2 * B * T * (d_in + Hp) * 4 * Hp
        d_in = Hp
    flops += 2 * B * Hp * C
    for w in flat_params:
        wbytes += int(w.size) * jnp.dtype(w.dtype).itemsize
    cost = pl.CostEstimate(
        flops=int(flops),
        transcendentals=int(5 * B * T * Hp * num_layers),
        bytes_accessed=int(x.size * jnp.dtype(x.dtype).itemsize + wbytes + B * C * 4),
    )

    # Per-generation VMEM budget from the actual chip (v5e/v6e 128 MiB, v7x 64 MiB).
    sitm = jnp.dtype(sdt).itemsize
    need = (2 * T * Bt * D * jnp.dtype(x.dtype).itemsize   # x block (double-buffered)
            + wbytes
            + Tc * Bt * 4 * Hp * sitm
            + (T * Bt * Hp * sitm if num_layers > 1 else 0)
            + 2 * Bt * C * 4)
    try:
        cap = int(pltpu.get_tpu_info().vmem_capacity_bytes)
    except Exception:
        cap = 64 << 20
    vmem_limit = int(min(max(int(need * 1.5) + (2 << 20), 4 << 20), int(cap * 0.85)))

    kernel = _make_kernel(num_layers)
    out = pl.pallas_call(
        kernel,
        out_shape=jax.ShapeDtypeStruct((B, C), jnp.float32),
        grid_spec=pltpu.PrefetchScalarGridSpec(
            num_scalar_prefetch=0,
            grid=(nbt,),
            in_specs=in_specs,
            out_specs=out_specs,
            scratch_shapes=scratch_shapes,
        ),
        compiler_params=pltpu.CompilerParams(
            dimension_semantics=("parallel",),
            vmem_limit_bytes=vmem_limit,
        ),
        cost_estimate=cost,
    )(x_tm, *flat_params)
    return out


def _reference_forward(x, params, hidden_size, num_layers):
    """Pure-JAX reference of the PyTorch LSTM+fc semantics (original (i,f,g,o) layout)."""
    B = x.shape[0]
    H = hidden_size
    inp = x
    for l in range(num_layers):
        w_ih, w_hh, b_ih, b_hh = params["layers"][l]
        h = jnp.zeros((B, H), jnp.float32)
        c = jnp.zeros((B, H), jnp.float32)
        outs = []
        for t in range(x.shape[1]):
            gates = inp[:, t, :] @ w_ih.T + b_ih + h @ w_hh.T + b_hh
            i = jax.nn.sigmoid(gates[:, :H])
            f = jax.nn.sigmoid(gates[:, H:2 * H])
            g = jnp.tanh(gates[:, 2 * H:3 * H])
            o = jax.nn.sigmoid(gates[:, 3 * H:])
            c = f * c + i * g
            h = o * jnp.tanh(c)
            outs.append(h)
        inp = jnp.stack(outs, axis=1)
    w_fc, b_fc = params["fc"]
    return inp[:, -1, :] @ w_fc.T + b_fc


if __name__ == "__main__":
    input_size, hidden_size, num_classes = 16, 32, 2
    key = jax.random.PRNGKey(0)
    key, pk2, pk3, xk1, xk2 = jax.random.split(key, 5)

    ref_fn = jax.jit(_reference_forward, static_argnums=(2, 3))

    # 1) Small shapes (batch=2, seq=8, hidden=32, 2 layers): single chunk, single
    #    batch tile, f32 — bit-tight check against the pure-JAX reference.
    params2 = init_params(pk2, input_size, hidden_size, 2, num_classes)
    flat2_f32 = flatten_params(params2)
    x1 = jax.random.normal(xk1, (2, 8, input_size), jnp.float32)
    out1 = jax.block_until_ready(lancet_bc_forward(x1, flat2_f32))
    ref1 = ref_fn(x1, params2, hidden_size, 2)
    assert out1.shape == (2, num_classes)
    assert jnp.allclose(out1, ref1, atol=2e-5, rtol=2e-5)

    # 2) Exercise T-chunking (ragged last chunk), the 2-way "parallel" batch grid,
    #    and middle-layer sequence-scratch reuse (3 layers).
    params3 = init_params(pk3, input_size, hidden_size, 3, num_classes)
    flat3_f32 = flatten_params(params3)
    x2 = jax.random.normal(xk2, (16, 40, input_size), jnp.float32)
    out2 = jax.block_until_ready(
        lancet_bc_forward(x2, flat3_f32, chunk_t=16, batch_tiles=2))
    ref2 = ref_fn(x2, params3, hidden_size, 3)
    assert out2.shape == (16, num_classes)
    assert jnp.allclose(out2, ref2, atol=2e-5, rtol=2e-5)

    # 3) bf16 weights + bf16 proj/seq scratches (bf16 MXU path on all generations);
    #    gate/c/h math stays f32, so only a loosened tolerance is needed.
    flat2_bf16 = flatten_params(params2, dtype=jnp.bfloat16)
    out3 = jax.block_until_ready(lancet_bc_forward(x1, flat2_bf16))
    assert out3.shape == (2, num_classes)
    assert jnp.allclose(out3, ref1, atol=1e-1, rtol=1e-1)

    print("KERNEL_OK")
</pallas_src>

<mosaic_0001>
module attributes {stable_mosaic.version = 11 : i64} {
  func.func @kernel(%arg0: i32, %arg1: memref<8x2x16xf32, #tpu.memory_space<vmem>>, %arg2: memref<16x512xf32, #tpu.memory_space<vmem>>, %arg3: memref<128x512xf32, #tpu.memory_space<vmem>>, %arg4: memref<1x512xf32, #tpu.memory_space<vmem>>, %arg5: memref<128x512xf32, #tpu.memory_space<vmem>>, %arg6: memref<128x512xf32, #tpu.memory_space<vmem>>, %arg7: memref<1x512xf32, #tpu.memory_space<vmem>>, %arg8: memref<128x2xf32, #tpu.memory_space<vmem>>, %arg9: memref<1x2xf32, #tpu.memory_space<vmem>>, %arg10: memref<2x2xf32, #tpu.memory_space<vmem>>, %arg11: memref<8x2x512xf32, #tpu.memory_space<vmem>>, %arg12: memref<8x2x128xf32, #tpu.memory_space<vmem>>) attributes {dimension_semantics = [#tpu.dimension_semantics<parallel>], iteration_bounds = array<i64: 1>, scalar_prefetch = 0 : i64, scratch_operands = 2 : i64, tpu.core_type = #tpu.core_type<tc>, window_params = [{transform_indices = @transform_0, window_bounds = array<i64: 8, 2, 16>}, {pipeline_mode = #tpu.pipeline_mode<synchronous>, transform_indices = @transform_1, window_bounds = array<i64: 16, 512>}, {pipeline_mode = #tpu.pipeline_mode<synchronous>, transform_indices = @transform_2, window_bounds = array<i64: 128, 512>}, {pipeline_mode = #tpu.pipeline_mode<synchronous>, transform_indices = @transform_3, window_bounds = array<i64: 1, 512>}, {pipeline_mode = #tpu.pipeline_mode<synchronous>, transform_indices = @transform_4, window_bounds = array<i64: 128, 512>}, {pipeline_mode = #tpu.pipeline_mode<synchronous>, transform_indices = @transform_5, window_bounds = array<i64: 128, 512>}, {pipeline_mode = #tpu.pipeline_mode<synchronous>, transform_indices = @transform_6, window_bounds = array<i64: 1, 512>}, {pipeline_mode = #tpu.pipeline_mode<synchronous>, transform_indices = @transform_7, window_bounds = array<i64: 128, 2>}, {pipeline_mode = #tpu.pipeline_mode<synchronous>, transform_indices = @transform_8, window_bounds = array<i64: 1, 2>}, {transform_indices = @transform_9, window_bounds = array<i64: 2, 2>}]} {
    %c0 = arith.constant 0 : index
    %c0_0 = arith.constant 0 : index
    %0 = vector.load %arg4[%c0, %c0_0] : memref<1x512xf32, #tpu.memory_space<vmem>>, vector<1x512xf32>
    %cst = arith.constant 0.000000e+00 : f32
    %1 = vector.broadcast %cst : f32 to vector<2x128xf32>
    %cst_1 = arith.constant 0.000000e+00 : f32
    %2 = vector.broadcast %cst_1 : f32 to vector<2x128xf32>
    %c0_2 = arith.constant 0 : index
    %c0_3 = arith.constant 0 : index
    %c0_4 = arith.constant 0 : index
    %3 = vector.load %arg1[%c0_2, %c0_3, %c0_4] : memref<8x2x16xf32, #tpu.memory_space<vmem>>, vector<8x2x16xf32>
    %4 = vector.shape_cast %3 : vector<8x2x16xf32> to vector<16x16xf32>
    %c0_5 = arith.constant 0 : index
    %c0_6 = arith.constant 0 : index
    %5 = vector.load %arg2[%c0_5, %c0_6] : memref<16x512xf32, #tpu.memory_space<vmem>>, vector<16x512xf32>
    %cst_7 = arith.constant dense<0.000000e+00> : vector<16x512xf32>
    %6 = tpu.matmul %4, %5, %cst_7 {dimension_numbers = #tpu.dot_dimension_numbers<[1], [0], [0], [1], [0, 0, 1, 1], [], []>} : vector<16x16xf32>, vector<16x512xf32>, vector<16x512xf32> -> vector<16x512xf32>
    %7 = vector.broadcast %0 : vector<1x512xf32> to vector<16x512xf32>
    %8 = arith.addf %6, %7 : vector<16x512xf32>
    %9 = vector.shape_cast %8 : vector<16x512xf32> to vector<8x2x512xf32>
    %c0_8 = arith.constant 0 : index
    %c0_9 = arith.constant 0 : index
    %c0_10 = arith.constant 0 : index
    %10 = vector.load %arg11[%c0_8, %c0_9, %c0_10] : memref<8x2x512xf32, #tpu.memory_space<vmem>>, vector<8x2x512xf32>
    tpu.vector_store %arg11[%c0_8, %c0_9, %c0_10], %9 {strides = array<i32>} : memref<8x2x512xf32, #tpu.memory_space<vmem>>, vector<8x2x512xf32>,
    %c0_i32 = arith.constant 0 : i32
    %11 = arith.index_cast %c0_i32 : i32 to index
    %c0_11 = arith.constant 0 : index
    %c0_12 = arith.constant 0 : index
    %12 = vector.load %arg11[%11, %c0_11, %c0_12] : memref<8x2x512xf32, #tpu.memory_space<vmem>>, vector<1x2x512xf32>
    %13 = vector.shape_cast %12 : vector<1x2x512xf32> to vector<2x512xf32>
    %c0_13 = arith.constant 0 : index
    %c0_14 = arith.constant 0 : index
    %14 = vector.load %arg3[%c0_13, %c0_14] : memref<128x512xf32, #tpu.memory_space<vmem>>, vector<128x512xf32>
    %cst_15 = arith.constant dense<0.000000e+00> : vector<2x512xf32>
    %15 = tpu.matmul %1, %14, %cst_15 {dimension_numbers = #tpu.dot_dimension_numbers<[1], [0], [0], [1], [0, 0, 1, 1], [], []>} : vector<2x128xf32>, vector<128x512xf32>, vector<2x512xf32> -> vector<2x512xf32>
    %16 = arith.addf %13, %15 : vector<2x512xf32>
    %17 = vector.extract_strided_slice %16 {offsets = [0, 0], sizes = [2, 384], strides = [1, 1]} : vector<2x512xf32> to vector<2x384xf32>
    %18 = arith.negf %17 : vector<2x384xf32>
    %19 = math.exp %18 : vector<2x384xf32>
    %cst_16 = arith.constant 1.000000e+00 : f32
    %20 = vector.broadcast %cst_16 : f32 to vector<2x384xf32>
    %21 = arith.addf %20, %19 : vector<2x384xf32>
    %22 = arith.divf %20, %21 : vector<2x384xf32>
    %23 = vector.extract_strided_slice %22 {offsets = [0, 0], sizes = [2, 128], strides = [1, 1]} : vector<2x384xf32> to vector<2x128xf32>
    %24 = vector.extract_strided_slice %22 {offsets = [0, 128], sizes = [2, 128], strides = [1, 1]} : vector<2x384xf32> to vector<2x128xf32>
    %25 = vector.extract_strided_slice %22 {offsets = [0, 256], sizes = [2, 128], strides = [1, 1]} : vector<2x384xf32> to vector<2x128xf32>
    %26 = vector.extract_strided_slice %16 {offsets = [0, 384], sizes = [2, 128], strides = [1, 1]} : vector<2x512xf32> to vector<2x128xf32>
    %27 = math.tanh %26 : vector<2x128xf32>
    %28 = arith.mulf %24, %2 : vector<2x128xf32>
    %29 = arith.mulf %23, %27 : vector<2x128xf32>
    %30 = arith.addf %28, %29 : vector<2x128xf32>
    %31 = math.tanh %30 : vector<2x128xf32>
    %32 = arith.mulf %25, %31 : vector<2x128xf32>
    %c0_i32_17 = arith.constant 0 : i32
    %33 = arith.addi %c0_i32_17, %c0_i32 : i32
    %34 = arith.index_cast %33 : i32 to index
    %c0_18 = arith.constant 0 : index
    %c0_19 = arith.constant 0 : index
    %35 = vector.load %arg12[%34, %c0_18, %c0_19] : memref<8x2x128xf32, #tpu.memory_space<vmem>>, vector<1x2x128xf32>
    %36 = vector.shape_cast %35 : vector<1x2x128xf32> to vector<2x128xf32>
    %37 = vector.shape_cast %32 : vector<2x128xf32> to vector<1x2x128xf32>
    tpu.vector_store %arg12[%34, %c0_18, %c0_19], %37 {strides = array<i32>} : memref<8x2x128xf32, #tpu.memory_space<vmem>>, vector<1x2x128xf32>,
    %c1_i32 = arith.constant 1 : i32
    %38 = arith.index_cast %c1_i32 : i32 to index
    %c0_20 = arith.constant 0 : index
    %c0_21 = arith.constant 0 : index
    %39 = vector.load %arg11[%38, %c0_20, %c0_21] : memref<8x2x512xf32, #tpu.memory_space<vmem>>, vector<1x2x512xf32>
    %40 = vector.shape_cast %39 : vector<1x2x512xf32> to vector<2x512xf32>
    %c0_22 = arith.constant 0 : index
    %c0_23 = arith.constant 0 : index
    %41 = vector.load %arg3[%c0_22, %c0_23] : memref<128x512xf32, #tpu.memory_space<vmem>>, vector<128x512xf32>
    %cst_24 = arith.constant dense<0.000000e+00> : vector<2x512xf32>
    %42 = tpu.matmul %32, %41, %cst_24 {dimension_numbers = #tpu.dot_dimension_numbers<[1], [0], [0], [1], [0, 0, 1, 1], [], []>} : vector<2x128xf32>, vector<128x512xf32>, vector<2x512xf32> -> vector<2x512xf32>
    %43 = arith.addf %40, %42 : vector<2x512xf32>
    %44 = vector.extract_strided_slice %43 {offsets = [0, 0], sizes = [2, 384], strides = [1, 1]} : vector<2x512xf32> to vector<2x384xf32>
    %45 = arith.negf %44 : vector<2x384xf32>
    %46 = math.exp %45 : vector<2x384xf32>
    %cst_25 = arith.constant 1.000000e+00 : f32
    %47 = vector.broadcast %cst_25 : f32 to vector<2x384xf32>
    %48 = arith.addf %47, %46 : vector<2x384xf32>
    %49 = arith.divf %47, %48 : vector<2x384xf32>
    %50 = vector.extract_strided_slice %49 {offsets = [0, 0], sizes = [2, 128], strides = [1, 1]} : vector<2x384xf32> to vector<2x128xf32>
    %51 = vector.extract_strided_slice %49 {offsets = [0, 128], sizes = [2, 128], strides = [1, 1]} : vector<2x384xf32> to vector<2x128xf32>
    %52 = vector.extract_strided_slice %49 {offsets = [0, 256], sizes = [2, 128], strides = [1, 1]} : vector<2x384xf32> to vector<2x128xf32>
    %53 = vector.extract_strided_slice %43 {offsets = [0, 384], sizes = [2, 128], strides = [1, 1]} : vector<2x512xf32> to vector<2x128xf32>
    %54 = math.tanh %53 : vector<2x128xf32>
    %55 = arith.mulf %51, %30 : vector<2x128xf32>
    %56 = arith.mulf %50, %54 : vector<2x128xf32>
    %57 = arith.addf %55, %56 : vector<2x128xf32>
    %58 = math.tanh %57 : vector<2x128xf32>
    %59 = arith.mulf %52, %58 : vector<2x128xf32>
    %c0_i32_26 = arith.constant 0 : i32
    %60 = arith.addi %c0_i32_26, %c1_i32 : i32
    %61 = arith.index_cast %60 : i32 to index
    %c0_27 = arith.constant 0 : index
    %c0_28 = arith.constant 0 : index
    %62 = vector.load %arg12[%61, %c0_27, %c0_28] : memref<8x2x128xf32, #tpu.memory_space<vmem>>, vector<1x2x128xf32>
    %63 = vector.shape_cast %62 : vector<1x2x128xf32> to vector<2x128xf32>
    %64 = vector.shape_cast %59 : vector<2x128xf32> to vector<1x2x128xf32>
    tpu.vector_store %arg12[%61, %c0_27, %c0_28], %64 {strides = array<i32>} : memref<8x2x128xf32, #tpu.memory_space<vmem>>, vector<1x2x128xf32>,
    %c2_i32 = arith.constant 2 : i32
    %65 = arith.index_cast %c2_i32 : i32 to index
    %c0_29 = arith.constant 0 : index
    %c0_30 = arith.constant 0 : index
    %66 = vector.load %arg11[%65, %c0_29, %c0_30] : memref<8x2x512xf32, #tpu.memory_space<vmem>>, vector<1x2x512xf32>
    %67 = vector.shape_cast %66 : vector<1x2x512xf32> to vector<2x512xf32>
    %c0_31 = arith.constant 0 : index
    %c0_32 = arith.constant 0 : index
    %68 = vector.load %arg3[%c0_31, %c0_32] : memref<128x512xf32, #tpu.memory_space<vmem>>, vector<128x512xf32>
    %cst_33 = arith.constant dense<0.000000e+00> : vector<2x512xf32>
    %69 = tpu.matmul %59, %68, %cst_33 {dimension_numbers = #tpu.dot_dimension_numbers<[1], [0], [0], [1], [0, 0, 1, 1], [], []>} : vector<2x128xf32>, vector<128x512xf32>, vector<2x512xf32> -> vector<2x512xf32>
    %70 = arith.addf %67, %69 : vector<2x512xf32>
    %71 = vector.extract_strided_slice %70 {offsets = [0, 0], sizes = [2, 384], strides = [1, 1]} : vector<2x512xf32> to vector<2x384xf32>
    %72 = arith.negf %71 : vector<2x384xf32>
    %73 = math.exp %72 : vector<2x384xf32>
    %cst_34 = arith.constant 1.000000e+00 : f32
    %74 = vector.broadcast %cst_34 : f32 to vector<2x384xf32>
    %75 = arith.addf %74, %73 : vector<2x384xf32>
    %76 = arith.divf %74, %75 : vector<2x384xf32>
    %77 = vector.extract_strided_slice %76 {offsets = [0, 0], sizes = [2, 128], strides = [1, 1]} : vector<2x384xf32> to vector<2x128xf32>
    %78 = vector.extract_strided_slice %76 {offsets = [0, 128], sizes = [2, 128], strides = [1, 1]} : vector<2x384xf32> to vector<2x128xf32>
    %79 = vector.extract_strided_slice %76 {offsets = [0, 256], sizes = [2, 128], strides = [1, 1]} : vector<2x384xf32> to vector<2x128xf32>
    %80 = vector.extract_strided_slice %70 {offsets = [0, 384], sizes = [2, 128], strides = [1, 1]} : vector<2x512xf32> to vector<2x128xf32>
    %81 = math.tanh %80 : vector<2x128xf32>
    %82 = arith.mulf %78, %57 : vector<2x128xf32>
    %83 = arith.mulf %77, %81 : vector<2x128xf32>
    %84 = arith.addf %82, %83 : vector<2x128xf32>
    %85 = math.tanh %84 : vector<2x128xf32>
    %86 = arith.mulf %79, %85 : vector<2x128xf32>
    %c0_i32_35 = arith.constant 0 : i32
    %87 = arith.addi %c0_i32_35, %c2_i32 : i32
    %88 = arith.index_cast %87 : i32 to index
    %c0_36 = arith.constant 0 : index
    %c0_37 = arith.constant 0 : index
    %89 = vector.load %arg12[%88, %c0_36, %c0_37] : memref<8x2x128xf32, #tpu.memory_space<vmem>>, vector<1x2x128xf32>
    %90 = vector.shape_cast %89 : vector<1x2x128xf32> to vector<2x128xf32>
    %91 = vector.shape_cast %86 : vector<2x128xf32> to vector<1x2x128xf32>
    tpu.vector_store %arg12[%88, %c0_36, %c0_37], %91 {strides = array<i32>} : memref<8x2x128xf32, #tpu.memory_space<vmem>>, vector<1x2x128xf32>,
    %c3_i32 = arith.constant 3 : i32
    %92 = arith.index_cast %c3_i32 : i32 to index
    %c0_38 = arith.constant 0 : index
    %c0_39 = arith.constant 0 : index
    %93 = vector.load %arg11[%92, %c0_38, %c0_39] : memref<8x2x512xf32, #tpu.memory_space<vmem>>, vector<1x2x512xf32>
    %94 = vector.shape_cast %93 : vector<1x2x512xf32> to vector<2x512xf32>
    %c0_40 = arith.constant 0 : index
    %c0_41 = arith.constant 0 : index
    %95 = vector.load %arg3[%c0_40, %c0_41] : memref<128x512xf32, #tpu.memory_space<vmem>>, vector<128x512xf32>
    %cst_42 = arith.constant dense<0.000000e+00> : vector<2x512xf32>
    %96 = tpu.matmul %86, %95, %cst_42 {dimension_numbers = #tpu.dot_dimension_numbers<[1], [0], [0], [1], [0, 0, 1, 1], [], []>} : vector<2x128xf32>, vector<128x512xf32>, vector<2x512xf32> -> vector<2x512xf32>
    %97 = arith.addf %94, %96 : vector<2x512xf32>
    %98 = vector.extract_strided_slice %97 {offsets = [0, 0], sizes = [2, 384], strides = [1, 1]} : vector<2x512xf32> to vector<2x384xf32>
    %99 = arith.negf %98 : vector<2x384xf32>
    %100 = math.exp %99 : vector<2x384xf32>
    %cst_43 = arith.constant 1.000000e+00 : f32
    %101 = vector.broadcast %cst_43 : f32 to vector<2x384xf32>
    %102 = arith.addf %101, %100 : vector<2x384xf32>
    %103 = arith.divf %101, %102 : vector<2x384xf32>
    %104 = vector.extract_strided_slice %103 {offsets = [0, 0], sizes = [2, 128], strides = [1, 1]} : vector<2x384xf32> to vector<2x128xf32>
    %105 = vector.extract_strided_slice %103 {offsets = [0, 128], sizes = [2, 128], strides = [1, 1]} : vector<2x384xf32> to vector<2x128xf32>
    %106 = vector.extract_strided_slice %103 {offsets = [0, 256], sizes = [2, 128], strides = [1, 1]} : vector<2x384xf32> to vector<2x128xf32>
    %107 = vector.extract_strided_slice %97 {offsets = [0, 384], sizes = [2, 128], strides = [1, 1]} : vector<2x512xf32> to vector<2x128xf32>
    %108 = math.tanh %107 : vector<2x128xf32>
    %109 = arith.mulf %105, %84 : vector<2x128xf32>
    %110 = arith.mulf %104, %108 : vector<2x128xf32>
    %111 = arith.addf %109, %110 : vector<2x128xf32>
    %112 = math.tanh %111 : vector<2x128xf32>
    %113 = arith.mulf %106, %112 : vector<2x128xf32>
    %c0_i32_44 = arith.constant 0 : i32
    %114 = arith.addi %c0_i32_44, %c3_i32 : i32
    %115 = arith.index_cast %114 : i32 to index
    %c0_45 = arith.constant 0 : index
    %c0_46 = arith.constant 0 : index
    %116 = vector.load %arg12[%115, %c0_45, %c0_46] : memref<8x2x128xf32, #tpu.memory_space<vmem>>, vector<1x2x128xf32>
    %117 = vector.shape_cast %116 : vector<1x2x128xf32> to vector<2x128xf32>
    %118 = vector.shape_cast %113 : vector<2x128xf32> to vector<1x2x128xf32>
    tpu.vector_store %arg12[%115, %c0_45, %c0_46], %118 {strides = array<i32>} : memref<8x2x128xf32, #tpu.memory_space<vmem>>, vector<1x2x128xf32>,
    %c4_i32 = arith.constant 4 : i32
    %119 = arith.index_cast %c4_i32 : i32 to index
    %c0_47 = arith.constant 0 : index
    %c0_48 = arith.constant 0 : index
    %120 = vector.load %arg11[%119, %c0_47, %c0_48] : memref<8x2x512xf32, #tpu.memory_space<vmem>>, vector<1x2x512xf32>
    %121 = vector.shape_cast %120 : vector<1x2x512xf32> to vector<2x512xf32>
    %c0_49 = arith.constant 0 : index
    %c0_50 = arith.constant 0 : index
    %122 = vector.load %arg3[%c0_49, %c0_50] : memref<128x512xf32, #tpu.memory_space<vmem>>, vector<128x512xf32>
    %cst_51 = arith.constant dense<0.000000e+00> : vector<2x512xf32>
    %123 = tpu.matmul %113, %122, %cst_51 {dimension_numbers = #tpu.dot_dimension_numbers<[1], [0], [0], [1], [0, 0, 1, 1], [], []>} : vector<2x128xf32>, vector<128x512xf32>, vector<2x512xf32> -> vector<2x512xf32>
    %124 = arith.addf %121, %123 : vector<2x512xf32>
    %125 = vector.extract_strided_slice %124 {offsets = [0, 0], sizes = [2, 384], strides = [1, 1]} : vector<2x512xf32> to vector<2x384xf32>
    %126 = arith.negf %125 : vector<2x384xf32>
    %127 = math.exp %126 : vector<2x384xf32>
    %cst_52 = arith.constant 1.000000e+00 : f32
    %128 = vector.broadcast %cst_52 : f32 to vector<2x384xf32>
    %129 = arith.addf %128, %127 : vector<2x384xf32>
    %130 = arith.divf %128, %129 : vector<2x384xf32>
    %131 = vector.extract_strided_slice %130 {offsets = [0, 0], sizes = [2, 128], strides = [1, 1]} : vector<2x384xf32> to vector<2x128xf32>
    %132 = vector.extract_strided_slice %130 {offsets = [0, 128], sizes = [2, 128], strides = [1, 1]} : vector<2x384xf32> to vector<2x128xf32>
    %133 = vector.extract_strided_slice %130 {offsets = [0, 256], sizes = [2, 128], strides = [1, 1]} : vector<2x384xf32> to vector<2x128xf32>
    %134 = vector.extract_strided_slice %124 {offsets = [0, 384], sizes = [2, 128], strides = [1, 1]} : vector<2x512xf32> to vector<2x128xf32>
    %135 = math.tanh %134 : vector<2x128xf32>
    %136 = arith.mulf %132, %111 : vector<2x128xf32>
    %137 = arith.mulf %131, %135 : vector<2x128xf32>
    %138 = arith.addf %136, %137 : vector<2x128xf32>
    %139 = math.tanh %138 : vector<2x128xf32>
    %140 = arith.mulf %133, %139 : vector<2x128xf32>
    %c0_i32_53 = arith.constant 0 : i32
    %141 = arith.addi %c0_i32_53, %c4_i32 : i32
    %142 = arith.index_cast %141 : i32 to index
    %c0_54 = arith.constant 0 : index
    %c0_55 = arith.constant 0 : index
    %143 = vector.load %arg12[%142, %c0_54, %c0_55] : memref<8x2x128xf32, #tpu.memory_space<vmem>>, vector<1x2x128xf32>
    %144 = vector.shape_cast %143 : vector<1x2x128xf32> to vector<2x128xf32>
    %145 = vector.shape_cast %140 : vector<2x128xf32> to vector<1x2x128xf32>
    tpu.vector_store %arg12[%142, %c0_54, %c0_55], %145 {strides = array<i32>} : memref<8x2x128xf32, #tpu.memory_space<vmem>>, vector<1x2x128xf32>,
    %c5_i32 = arith.constant 5 : i32
    %146 = arith.index_cast %c5_i32 : i32 to index
    %c0_56 = arith.constant 0 : index
    %c0_57 = arith.constant 0 : index
    %147 = vector.load %arg11[%146, %c0_56, %c0_57] : memref<8x2x512xf32, #tpu.memory_space<vmem>>, vector<1x2x512xf32>
    %148 = vector.shape_cast %147 : vector<1x2x512xf32> to vector<2x512xf32>
    %c0_58 = arith.constant 0 : index
    %c0_59 = arith.constant 0 : index
    %149 = vector.load %arg3[%c0_58, %c0_59] : memref<128x512xf32, #tpu.memory_space<vmem>>, vector<128x512xf32>
    %cst_60 = arith.constant dense<0.000000e+00> : vector<2x512xf32>
    %150 = tpu.matmul %140, %149, %cst_60 {dimension_numbers = #tpu.dot_dimension_numbers<[1], [0], [0], [1], [0, 0, 1, 1], [], []>} : vector<2x128xf32>, vector<128x512xf32>, vector<2x512xf32> -> vector<2x512xf32>
    %151 = arith.addf %148, %150 : vector<2x512xf32>
    %152 = vector.extract_strided_slice %151 {offsets = [0, 0], sizes = [2, 384], strides = [1, 1]} : vector<2x512xf32> to vector<2x384xf32>
    %153 = arith.negf %152 : vector<2x384xf32>
    %154 = math.exp %153 : vector<2x384xf32>
    %cst_61 = arith.constant 1.000000e+00 : f32
    %155 = vector.broadcast %cst_61 : f32 to vector<2x384xf32>
    %156 = arith.addf %155, %154 : vector<2x384xf32>
    %157 = arith.divf %155, %156 : vector<2x384xf32>
    %158 = vector.extract_strided_slice %157 {offsets = [0, 0], sizes = [2, 128], strides = [1, 1]} : vector<2x384xf32> to vector<2x128xf32>
    %159 = vector.extract_strided_slice %157 {offsets = [0, 128], sizes = [2, 128], strides = [1, 1]} : vector<2x384xf32> to vector<2x128xf32>
    %160 = vector.extract_strided_slice %157 {offsets = [0, 256], sizes = [2, 128], strides = [1, 1]} : vector<2x384xf32> to vector<2x128xf32>
    %161 = vector.extract_strided_slice %151 {offsets = [0, 384], sizes = [2, 128], strides = [1, 1]} : vector<2x512xf32> to vector<2x128xf32>
    %162 = math.tanh %161 : vector<2x128xf32>
    %163 = arith.mulf %159, %138 : vector<2x128xf32>
    %164 = arith.mulf %158, %162 : vector<2x128xf32>
    %165 = arith.addf %163, %164 : vector<2x128xf32>
    %166 = math.tanh %165 : vector<2x128xf32>
    %167 = arith.mulf %160, %166 : vector<2x128xf32>
    %c0_i32_62 = arith.constant 0 : i32
    %168 = arith.addi %c0_i32_62, %c5_i32 : i32
    %169 = arith.index_cast %168 : i32 to index
    %c0_63 = arith.constant 0 : index
    %c0_64 = arith.constant 0 : index
    %170 = vector.load %arg12[%169, %c0_63, %c0_64] : memref<8x2x128xf32, #tpu.memory_space<vmem>>, vector<1x2x128xf32>
    %171 = vector.shape_cast %170 : vector<1x2x128xf32> to vector<2x128xf32>
    %172 = vector.shape_cast %167 : vector<2x128xf32> to vector<1x2x128xf32>
    tpu.vector_store %arg12[%169, %c0_63, %c0_64], %172 {strides = array<i32>} : memref<8x2x128xf32, #tpu.memory_space<vmem>>, vector<1x2x128xf32>,
    %c6_i32 = arith.constant 6 : i32
    %173 = arith.index_cast %c6_i32 : i32 to index
    %c0_65 = arith.constant 0 : index
    %c0_66 = arith.constant 0 : index
    %174 = vector.load %arg11[%173, %c0_65, %c0_66] : memref<8x2x512xf32, #tpu.memory_space<vmem>>, vector<1x2x512xf32>
    %175 = vector.shape_cast %174 : vector<1x2x512xf32> to vector<2x512xf32>
    %c0_67 = arith.constant 0 : index
    %c0_68 = arith.constant 0 : index
    %176 = vector.load %arg3[%c0_67, %c0_68] : memref<128x512xf32, #tpu.memory_space<vmem>>, vector<128x512xf32>
    %cst_69 = arith.constant dense<0.000000e+00> : vector<2x512xf32>
    %177 = tpu.matmul %167, %176, %cst_69 {dimension_numbers = #tpu.dot_dimension_numbers<[1], [0], [0], [1], [0, 0, 1, 1], [], []>} : vector<2x128xf32>, vector<128x512xf32>, vector<2x512xf32> -> vector<2x512xf32>
    %178 = arith.addf %175, %177 : vector<2x512xf32>
    %179 = vector.extract_strided_slice %178 {offsets = [0, 0], sizes = [2, 384], strides = [1, 1]} : vector<2x512xf32> to vector<2x384xf32>
    %180 = arith.negf %179 : vector<2x384xf32>
    %181 = math.exp %180 : vector<2x384xf32>
    %cst_70 = arith.constant 1.000000e+00 : f32
    %182 = vector.broadcast %cst_70 : f32 to vector<2x384xf32>
    %183 = arith.addf %182, %181 : vector<2x384xf32>
    %184 = arith.divf %182, %183 : vector<2x384xf32>
    %185 = vector.extract_strided_slice %184 {offsets = [0, 0], sizes = [2, 128], strides = [1, 1]} : vector<2x384xf32> to vector<2x128xf32>
    %186 = vector.extract_strided_slice %184 {offsets = [0, 128], sizes = [2, 128], strides = [1, 1]} : vector<2x384xf32> to vector<2x128xf32>
    %187 = vector.extract_strided_slice %184 {offsets = [0, 256], sizes = [2, 128], strides = [1, 1]} : vector<2x384xf32> to vector<2x128xf32>
    %188 = vector.extract_strided_slice %178 {offsets = [0, 384], sizes = [2, 128], strides = [1, 1]} : vector<2x512xf32> to vector<2x128xf32>
    %189 = math.tanh %188 : vector<2x128xf32>
    %190 = arith.mulf %186, %165 : vector<2x128xf32>
    %191 = arith.mulf %185, %189 : vector<2x128xf32>
    %192 = arith.addf %190, %191 : vector<2x128xf32>
    %193 = math.tanh %192 : vector<2x128xf32>
    %194 = arith.mulf %187, %193 : vector<2x128xf32>
    %c0_i32_71 = arith.constant 0 : i32
    %195 = arith.addi %c0_i32_71, %c6_i32 : i32
    %196 = arith.index_cast %195 : i32 to index
    %c0_72 = arith.constant 0 : index
    %c0_73 = arith.constant 0 : index
    %197 = vector.load %arg12[%196, %c0_72, %c0_73] : memref<8x2x128xf32, #tpu.memory_space<vmem>>, vector<1x2x128xf32>
    %198 = vector.shape_cast %197 : vector<1x2x128xf32> to vector<2x128xf32>
    %199 = vector.shape_cast %194 : vector<2x128xf32> to vector<1x2x128xf32>
    tpu.vector_store %arg12[%196, %c0_72, %c0_73], %199 {strides = array<i32>} : memref<8x2x128xf32, #tpu.memory_space<vmem>>, vector<1x2x128xf32>,
    %c7_i32 = arith.constant 7 : i32
    %200 = arith.index_cast %c7_i32 : i32 to index
    %c0_74 = arith.constant 0 : index
    %c0_75 = arith.constant 0 : index
    %201 = vector.load %arg11[%200, %c0_74, %c0_75] : memref<8x2x512xf32, #tpu.memory_space<vmem>>, vector<1x2x512xf32>
    %202 = vector.shape_cast %201 : vector<1x2x512xf32> to vector<2x512xf32>
    %c0_76 = arith.constant 0 : index
    %c0_77 = arith.constant 0 : index
    %203 = vector.load %arg3[%c0_76, %c0_77] : memref<128x512xf32, #tpu.memory_space<vmem>>, vector<128x512xf32>
    %cst_78 = arith.constant dense<0.000000e+00> : vector<2x512xf32>
    %204 = tpu.matmul %194, %203, %cst_78 {dimension_numbers = #tpu.dot_dimension_numbers<[1], [0], [0], [1], [0, 0, 1, 1], [], []>} : vector<2x128xf32>, vector<128x512xf32>, vector<2x512xf32> -> vector<2x512xf32>
    %205 = arith.addf %202, %204 : vector<2x512xf32>
    %206 = vector.extract_strided_slice %205 {offsets = [0, 0], sizes = [2, 384], strides = [1, 1]} : vector<2x512xf32> to vector<2x384xf32>
    %207 = arith.negf %206 : vector<2x384xf32>
    %208 = math.exp %207 : vector<2x384xf32>
    %cst_79 = arith.constant 1.000000e+00 : f32
    %209 = vector.broadcast %cst_79 : f32 to vector<2x384xf32>
    %210 = arith.addf %209, %208 : vector<2x384xf32>
    %211 = arith.divf %209, %210 : vector<2x384xf32>
    %212 = vector.extract_strided_slice %211 {offsets = [0, 0], sizes = [2, 128], strides = [1, 1]} : vector<2x384xf32> to vector<2x128xf32>
    %213 = vector.extract_strided_slice %211 {offsets = [0, 128], sizes = [2, 128], strides = [1, 1]} : vector<2x384xf32> to vector<2x128xf32>
    %214 = vector.extract_strided_slice %211 {offsets = [0, 256], sizes = [2, 128], strides = [1, 1]} : vector<2x384xf32> to vector<2x128xf32>
    %215 = vector.extract_strided_slice %205 {offsets = [0, 384], sizes = [2, 128], strides = [1, 1]} : vector<2x512xf32> to vector<2x128xf32>
    %216 = math.tanh %215 : vector<2x128xf32>
    %217 = arith.mulf %213, %192 : vector<2x128xf32>
    %218 = arith.mulf %212, %216 : vector<2x128xf32>
    %219 = arith.addf %217, %218 : vector<2x128xf32>
    %220 = math.tanh %219 : vector<2x128xf32>
    %221 = arith.mulf %214, %220 : vector<2x128xf32>
    %c0_i32_80 = arith.constant 0 : i32
    %222 = arith.addi %c0_i32_80, %c7_i32 : i32
    %223 = arith.index_cast %222 : i32 to index
    %c0_81 = arith.constant 0 : index
    %c0_82 = arith.constant 0 : index
    %224 = vector.load %arg12[%223, %c0_81, %c0_82] : memref<8x2x128xf32, #tpu.memory_space<vmem>>, vector<1x2x128xf32>
    %225 = vector.shape_cast %224 : vector<1x2x128xf32> to vector<2x128xf32>
    %226 = vector.shape_cast %221 : vector<2x128xf32> to vector<1x2x128xf32>
    tpu.vector_store %arg12[%223, %c0_81, %c0_82], %226 {strides = array<i32>} : memref<8x2x128xf32, #tpu.memory_space<vmem>>, vector<1x2x128xf32>,
    %c8_i32 = arith.constant 8 : i32
    %c0_83 = arith.constant 0 : index
    %c0_84 = arith.constant 0 : index
    %227 = vector.load %arg7[%c0_83, %c0_84] : memref<1x512xf32, #tpu.memory_space<vmem>>, vector<1x512xf32>
    %cst_85 = arith.constant 0.000000e+00 : f32
    %228 = vector.broadcast %cst_85 : f32 to vector<2x128xf32>
    %cst_86 = arith.constant 0.000000e+00 : f32
    %229 = vector.broadcast %cst_86 : f32 to vector<2x128xf32>
    %c0_87 = arith.constant 0 : index
    %c0_88 = arith.constant 0 : index
    %c0_89 = arith.constant 0 : index
    %230 = vector.load %arg12[%c0_87, %c0_88, %c0_89] : memref<8x2x128xf32, #tpu.memory_space<vmem>>, vector<8x2x128xf32>
    %231 = vector.shape_cast %230 : vector<8x2x128xf32> to vector<16x128xf32>
    %c0_90 = arith.constant 0 : index
    %c0_91 = arith.constant 0 : index
    %232 = vector.load %arg5[%c0_90, %c0_91] : memref<128x512xf32, #tpu.memory_space<vmem>>, vector<128x512xf32>
    %cst_92 = arith.constant dense<0.000000e+00> : vector<16x512xf32>
    %233 = tpu.matmul %231, %232, %cst_92 {dimension_numbers = #tpu.dot_dimension_numbers<[1], [0], [0], [1], [0, 0, 1, 1], [], []>} : vector<16x128xf32>, vector<128x512xf32>, vector<16x512xf32> -> vector<16x512xf32>
    %234 = vector.broadcast %227 : vector<1x512xf32> to vector<16x512xf32>
    %235 = arith.addf %233, %234 : vector<16x512xf32>
    %236 = vector.shape_cast %235 : vector<16x512xf32> to vector<8x2x512xf32>
    %c0_93 = arith.constant 0 : index
    %c0_94 = arith.constant 0 : index
    %c0_95 = arith.constant 0 : index
    %237 = vector.load %arg11[%c0_93, %c0_94, %c0_95] : memref<8x2x512xf32, #tpu.memory_space<vmem>>, vector<8x2x512xf32>
    tpu.vector_store %arg11[%c0_93, %c0_94, %c0_95], %236 {strides = array<i32>} : memref<8x2x512xf32, #tpu.memory_space<vmem>>, vector<8x2x512xf32>,
    %c0_i32_96 = arith.constant 0 : i32
    %238 = arith.index_cast %c0_i32_96 : i32 to index
    %c0_97 = arith.constant 0 : index
    %c0_98 = arith.constant 0 : index
    %239 = vector.load %arg11[%238, %c0_97, %c0_98] : memref<8x2x512xf32, #tpu.memory_space<vmem>>, vector<1x2x512xf32>
    %240 = vector.shape_cast %239 : vector<1x2x512xf32> to vector<2x512xf32>
    %c0_99 = arith.constant 0 : index
    %c0_100 = arith.constant 0 : index
    %241 = vector.load %arg6[%c0_99, %c0_100] : memref<128x512xf32, #tpu.memory_space<vmem>>, vector<128x512xf32>
    %cst_101 = arith.constant dense<0.000000e+00> : vector<2x512xf32>
    %242 = tpu.matmul %228, %241, %cst_101 {dimension_numbers = #tpu.dot_dimension_numbers<[1], [0], [0], [1], [0, 0, 1, 1], [], []>} : vector<2x128xf32>, vector<128x512xf32>, vector<2x512xf32> -> vector<2x512xf32>
    %243 = arith.addf %240, %242 : vector<2x512xf32>
    %244 = vector.extract_strided_slice %243 {offsets = [0, 0], sizes = [2, 384], strides = [1, 1]} : vector<2x512xf32> to vector<2x384xf32>
    %245 = arith.negf %244 : vector<2x384xf32>
    %246 = math.exp %245 : vector<2x384xf32>
    %cst_102 = arith.constant 1.000000e+00 : f32
    %247 = vector.broadcast %cst_102 : f32 to vector<2x384xf32>
    %248 = arith.addf %247, %246 : vector<2x384xf32>
    %249 = arith.divf %247, %248 : vector<2x384xf32>
    %250 = vector.extract_strided_slice %249 {offsets = [0, 0], sizes = [2, 128], strides = [1, 1]} : vector<2x384xf32> to vector<2x128xf32>
    %251 = vector.extract_strided_slice %249 {offsets = [0, 128], sizes = [2, 128], strides = [1, 1]} : vector<2x384xf32> to vector<2x128xf32>
    %252 = vector.extract_strided_slice %249 {offsets = [0, 256], sizes = [2, 128], strides = [1, 1]} : vector<2x384xf32> to vector<2x128xf32>
    %253 = vector.extract_strided_slice %243 {offsets = [0, 384], sizes = [2, 128], strides = [1, 1]} : vector<2x512xf32> to vector<2x128xf32>
    %254 = math.tanh %253 : vector<2x128xf32>
    %255 = arith.mulf %251, %229 : vector<2x128xf32>
    %256 = arith.mulf %250, %254 : vector<2x128xf32>
    %257 = arith.addf %255, %256 : vector<2x128xf32>
    %258 = math.tanh %257 : vector<2x128xf32>
    %259 = arith.mulf %252, %258 : vector<2x128xf32>
    %c1_i32_103 = arith.constant 1 : i32
    %260 = arith.index_cast %c1_i32_103 : i32 to index
    %c0_104 = arith.constant 0 : index
    %c0_105 = arith.constant 0 : index
    %261 = vector.load %arg11[%260, %c0_104, %c0_105] : memref<8x2x512xf32, #tpu.memory_space<vmem>>, vector<1x2x512xf32>
    %262 = vector.shape_cast %261 : vector<1x2x512xf32> to vector<2x512xf32>
    %c0_106 = arith.constant 0 : index
    %c0_107 = arith.constant 0 : index
    %263 = vector.load %arg6[%c0_106, %c0_107] : memref<128x512xf32, #tpu.memory_space<vmem>>, vector<128x512xf32>
    %cst_108 = arith.constant dense<0.000000e+00> : vector<2x512xf32>
    %264 = tpu.matmul %259, %263, %cst_108 {dimension_numbers = #tpu.dot_dimension_numbers<[1], [0], [0], [1], [0, 0, 1, 1], [], []>} : vector<2x128xf32>, vector<128x512xf32>, vector<2x512xf32> -> vector<2x512xf32>
    %265 = arith.addf %262, %264 : vector<2x512xf32>
    %266 = vector.extract_strided_slice %265 {offsets = [0, 0], sizes = [2, 384], strides = [1, 1]} : vector<2x512xf32> to vector<2x384xf32>
    %267 = arith.negf %266 : vector<2x384xf32>
    %268 = math.exp %267 : vector<2x384xf32>
    %cst_109 = arith.constant 1.000000e+00 : f32
    %269 = vector.broadcast %cst_109 : f32 to vector<2x384xf32>
    %270 = arith.addf %269, %268 : vector<2x384xf32>
    %271 = arith.divf %269, %270 : vector<2x384xf32>
    %272 = vector.extract_strided_slice %271 {offsets = [0, 0], sizes = [2, 128], strides = [1, 1]} : vector<2x384xf32> to vector<2x128xf32>
    %273 = vector.extract_strided_slice %271 {offsets = [0, 128], sizes = [2, 128], strides = [1, 1]} : vector<2x384xf32> to vector<2x128xf32>
    %274 = vector.extract_strided_slice %271 {offsets = [0, 256], sizes = [2, 128], strides = [1, 1]} : vector<2x384xf32> to vector<2x128xf32>
    %275 = vector.extract_strided_slice %265 {offsets = [0, 384], sizes = [2, 128], strides = [1, 1]} : vector<2x512xf32> to vector<2x128xf32>
    %276 = math.tanh %275 : vector<2x128xf32>
    %277 = arith.mulf %273, %257 : vector<2x128xf32>
    %278 = arith.mulf %272, %276 : vector<2x128xf32>
    %279 = arith.addf %277, %278 : vector<2x128xf32>
    %280 = math.tanh %279 : vector<2x128xf32>
    %281 = arith.mulf %274, %280 : vector<2x128xf32>
    %c2_i32_110 = arith.constant 2 : i32
    %282 = arith.index_cast %c2_i32_110 : i32 to index
    %c0_111 = arith.constant 0 : index
    %c0_112 = arith.constant 0 : index
    %283 = vector.load %arg11[%282, %c0_111, %c0_112] : memref<8x2x512xf32, #tpu.memory_space<vmem>>, vector<1x2x512xf32>
    %284 = vector.shape_cast %283 : vector<1x2x512xf32> to vector<2x512xf32>
    %c0_113 = arith.constant 0 : index
    %c0_114 = arith.constant 0 : index
    %285 = vector.load %arg6[%c0_113, %c0_114] : memref<128x512xf32, #tpu.memory_space<vmem>>, vector<128x512xf32>
    %cst_115 = arith.constant dense<0.000000e+00> : vector<2x512xf32>
    %286 = tpu.matmul %281, %285, %cst_115 {dimension_numbers = #tpu.dot_dimension_numbers<[1], [0], [0], [1], [0, 0, 1, 1], [], []>} : vector<2x128xf32>, vector<128x512xf32>, vector<2x512xf32> -> vector<2x512xf32>
    %287 = arith.addf %284, %286 : vector<2x512xf32>
    %288 = vector.extract_strided_slice %287 {offsets = [0, 0], sizes = [2, 384], strides = [1, 1]} : vector<2x512xf32> to vector<2x384xf32>
    %289 = arith.negf %288 : vector<2x384xf32>
    %290 = math.exp %289 : vector<2x384xf32>
    %cst_116 = arith.constant 1.000000e+00 : f32
    %291 = vector.broadcast %cst_116 : f32 to vector<2x384xf32>
    %292 = arith.addf %291, %290 : vector<2x384xf32>
    %293 = arith.divf %291, %292 : vector<2x384xf32>
    %294 = vector.extract_strided_slice %293 {offsets = [0, 0], sizes = [2, 128], strides = [1, 1]} : vector<2x384xf32> to vector<2x128xf32>
    %295 = vector.extract_strided_slice %293 {offsets = [0, 128], sizes = [2, 128], strides = [1, 1]} : vector<2x384xf32> to vector<2x128xf32>
    %296 = vector.extract_strided_slice %293 {offsets = [0, 256], sizes = [2, 128], strides = [1, 1]} : vector<2x384xf32> to vector<2x128xf32>
    %297 = vector.extract_strided_slice %287 {offsets = [0, 384], sizes = [2, 128], strides = [1, 1]} : vector<2x512xf32> to vector<2x128xf32>
    %298 = math.tanh %297 : vector<2x128xf32>
    %299 = arith.mulf %295, %279 : vector<2x128xf32>
    %300 = arith.mulf %294, %298 : vector<2x128xf32>
    %301 = arith.addf %299, %300 : vector<2x128xf32>
    %302 = math.tanh %301 : vector<2x128xf32>
    %303 = arith.mulf %296, %302 : vector<2x128xf32>
    %c3_i32_117 = arith.constant 3 : i32
    %304 = arith.index_cast %c3_i32_117 : i32 to index
    %c0_118 = arith.constant 0 : index
    %c0_119 = arith.constant 0 : index
    %305 = vector.load %arg11[%304, %c0_118, %c0_119] : memref<8x2x512xf32, #tpu.memory_space<vmem>>, vector<1x2x512xf32>
    %306 = vector.shape_cast %305 : vector<1x2x512xf32> to vector<2x512xf32>
    %c0_120 = arith.constant 0 : index
    %c0_121 = arith.constant 0 : index
    %307 = vector.load %arg6[%c0_120, %c0_121] : memref<128x512xf32, #tpu.memory_space<vmem>>, vector<128x512xf32>
    %cst_122 = arith.constant dense<0.000000e+00> : vector<2x512xf32>
    %308 = tpu.matmul %303, %307, %cst_122 {dimension_numbers = #tpu.dot_dimension_numbers<[1], [0], [0], [1], [0, 0, 1, 1], [], []>} : vector<2x128xf32>, vector<128x512xf32>, vector<2x512xf32> -> vector<2x512xf32>
    %309 = arith.addf %306, %308 : vector<2x512xf32>
    %310 = vector.extract_strided_slice %309 {offsets = [0, 0], sizes = [2, 384], strides = [1, 1]} : vector<2x512xf32> to vector<2x384xf32>
    %311 = arith.negf %310 : vector<2x384xf32>
    %312 = math.exp %311 : vector<2x384xf32>
    %cst_123 = arith.constant 1.000000e+00 : f32
    %313 = vector.broadcast %cst_123 : f32 to vector<2x384xf32>
    %314 = arith.addf %313, %312 : vector<2x384xf32>
    %315 = arith.divf %313, %314 : vector<2x384xf32>
    %316 = vector.extract_strided_slice %315 {offsets = [0, 0], sizes = [2, 128], strides = [1, 1]} : vector<2x384xf32> to vector<2x128xf32>
    %317 = vector.extract_strided_slice %315 {offsets = [0, 128], sizes = [2, 128], strides = [1, 1]} : vector<2x384xf32> to vector<2x128xf32>
    %318 = vector.extract_strided_slice %315 {offsets = [0, 256], sizes = [2, 128], strides = [1, 1]} : vector<2x384xf32> to vector<2x128xf32>
    %319 = vector.extract_strided_slice %309 {offsets = [0, 384], sizes = [2, 128], strides = [1, 1]} : vector<2x512xf32> to vector<2x128xf32>
    %320 = math.tanh %319 : vector<2x128xf32>
    %321 = arith.mulf %317, %301 : vector<2x128xf32>
    %322 = arith.mulf %316, %320 : vector<2x128xf32>
    %323 = arith.addf %321, %322 : vector<2x128xf32>
    %324 = math.tanh %323 : vector<2x128xf32>
    %325 = arith.mulf %318, %324 : vector<2x128xf32>
    %c4_i32_124 = arith.constant 4 : i32
    %326 = arith.index_cast %c4_i32_124 : i32 to index
    %c0_125 = arith.constant 0 : index
    %c0_126 = arith.constant 0 : index
    %327 = vector.load %arg11[%326, %c0_125, %c0_126] : memref<8x2x512xf32, #tpu.memory_space<vmem>>, vector<1x2x512xf32>
    %328 = vector.shape_cast %327 : vector<1x2x512xf32> to vector<2x512xf32>
    %c0_127 = arith.constant 0 : index
    %c0_128 = arith.constant 0 : index
    %329 = vector.load %arg6[%c0_127, %c0_128] : memref<128x512xf32, #tpu.memory_space<vmem>>, vector<128x512xf32>
    %cst_129 = arith.constant dense<0.000000e+00> : vector<2x512xf32>
    %330 = tpu.matmul %325, %329, %cst_129 {dimension_numbers = #tpu.dot_dimension_numbers<[1], [0], [0], [1], [0, 0, 1, 1], [], []>} : vector<2x128xf32>, vector<128x512xf32>, vector<2x512xf32> -> vector<2x512xf32>
    %331 = arith.addf %328, %330 : vector<2x512xf32>
    %332 = vector.extract_strided_slice %331 {offsets = [0, 0], sizes = [2, 384], strides = [1, 1]} : vector<2x512xf32> to vector<2x384xf32>
    %333 = arith.negf %332 : vector<2x384xf32>
    %334 = math.exp %333 : vector<2x384xf32>
    %cst_130 = arith.constant 1.000000e+00 : f32
    %335 = vector.broadcast %cst_130 : f32 to vector<2x384xf32>
    %336 = arith.addf %335, %334 : vector<2x384xf32>
    %337 = arith.divf %335, %336 : vector<2x384xf32>
    %338 = vector.extract_strided_slice %337 {offsets = [0, 0], sizes = [2, 128], strides = [1, 1]} : vector<2x384xf32> to vector<2x128xf32>
    %339 = vector.extract_strided_slice %337 {offsets = [0, 128], sizes = [2, 128], strides = [1, 1]} : vector<2x384xf32> to vector<2x128xf32>
    %340 = vector.extract_strided_slice %337 {offsets = [0, 256], sizes = [2, 128], strides = [1, 1]} : vector<2x384xf32> to vector<2x128xf32>
    %341 = vector.extract_strided_slice %331 {offsets = [0, 384], sizes = [2, 128], strides = [1, 1]} : vector<2x512xf32> to vector<2x128xf32>
    %342 = math.tanh %341 : vector<2x128xf32>
    %343 = arith.mulf %339, %323 : vector<2x128xf32>
    %344 = arith.mulf %338, %342 : vector<2x128xf32>
    %345 = arith.addf %343, %344 : vector<2x128xf32>
    %346 = math.tanh %345 : vector<2x128xf32>
    %347 = arith.mulf %340, %346 : vector<2x128xf32>
    %c5_i32_131 = arith.constant 5 : i32
    %348 = arith.index_cast %c5_i32_131 : i32 to index
    %c0_132 = arith.constant 0 : index
    %c0_133 = arith.constant 0 : index
    %349 = vector.load %arg11[%348, %c0_132, %c0_133] : memref<8x2x512xf32, #tpu.memory_space<vmem>>, vector<1x2x512xf32>
    %350 = vector.shape_cast %349 : vector<1x2x512xf32> to vector<2x512xf32>
    %c0_134 = arith.constant 0 : index
    %c0_135 = arith.constant 0 : index
    %351 = vector.load %arg6[%c0_134, %c0_135] : memref<128x512xf32, #tpu.memory_space<vmem>>, vector<128x512xf32>
    %cst_136 = arith.constant dense<0.000000e+00> : vector<2x512xf32>
    %352 = tpu.matmul %347, %351, %cst_136 {dimension_numbers = #tpu.dot_dimension_numbers<[1], [0], [0], [1], [0, 0, 1, 1], [], []>} : vector<2x128xf32>, vector<128x512xf32>, vector<2x512xf32> -> vector<2x512xf32>
    %353 = arith.addf %350, %352 : vector<2x512xf32>
    %354 = vector.extract_strided_slice %353 {offsets = [0, 0], sizes = [2, 384], strides = [1, 1]} : vector<2x512xf32> to vector<2x384xf32>
    %355 = arith.negf %354 : vector<2x384xf32>
    %356 = math.exp %355 : vector<2x384xf32>
    %cst_137 = arith.constant 1.000000e+00 : f32
    %357 = vector.broadcast %cst_137 : f32 to vector<2x384xf32>
    %358 = arith.addf %357, %356 : vector<2x384xf32>
    %359 = arith.divf %357, %358 : vector<2x384xf32>
    %360 = vector.extract_strided_slice %359 {offsets = [0, 0], sizes = [2, 128], strides = [1, 1]} : vector<2x384xf32> to vector<2x128xf32>
    %361 = vector.extract_strided_slice %359 {offsets = [0, 128], sizes = [2, 128], strides = [1, 1]} : vector<2x384xf32> to vector<2x128xf32>
    %362 = vector.extract_strided_slice %359 {offsets = [0, 256], sizes = [2, 128], strides = [1, 1]} : vector<2x384xf32> to vector<2x128xf32>
    %363 = vector.extract_strided_slice %353 {offsets = [0, 384], sizes = [2, 128], strides = [1, 1]} : vector<2x512xf32> to vector<2x128xf32>
    %364 = math.tanh %363 : vector<2x128xf32>
    %365 = arith.mulf %361, %345 : vector<2x128xf32>
    %366 = arith.mulf %360, %364 : vector<2x128xf32>
    %367 = arith.addf %365, %366 : vector<2x128xf32>
    %368 = math.tanh %367 : vector<2x128xf32>
    %369 = arith.mulf %362, %368 : vector<2x128xf32>
    %c6_i32_138 = arith.constant 6 : i32
    %370 = arith.index_cast %c6_i32_138 : i32 to index
    %c0_139 = arith.constant 0 : index
    %c0_140 = arith.constant 0 : index
    %371 = vector.load %arg11[%370, %c0_139, %c0_140] : memref<8x2x512xf32, #tpu.memory_space<vmem>>, vector<1x2x512xf32>
    %372 = vector.shape_cast %371 : vector<1x2x512xf32> to vector<2x512xf32>
    %c0_141 = arith.constant 0 : index
    %c0_142 = arith.constant 0 : index
    %373 = vector.load %arg6[%c0_141, %c0_142] : memref<128x512xf32, #tpu.memory_space<vmem>>, vector<128x512xf32>
    %cst_143 = arith.constant dense<0.000000e+00> : vector<2x512xf32>
    %374 = tpu.matmul %369, %373, %cst_143 {dimension_numbers = #tpu.dot_dimension_numbers<[1], [0], [0], [1], [0, 0, 1, 1], [], []>} : vector<2x128xf32>, vector<128x512xf32>, vector<2x512xf32> -> vector<2x512xf32>
    %375 = arith.addf %372, %374 : vector<2x512xf32>
    %376 = vector.extract_strided_slice %375 {offsets = [0, 0], sizes = [2, 384], strides = [1, 1]} : vector<2x512xf32> to vector<2x384xf32>
    %377 = arith.negf %376 : vector<2x384xf32>
    %378 = math.exp %377 : vector<2x384xf32>
    %cst_144 = arith.constant 1.000000e+00 : f32
    %379 = vector.broadcast %cst_144 : f32 to vector<2x384xf32>
    %380 = arith.addf %379, %378 : vector<2x384xf32>
    %381 = arith.divf %379, %380 : vector<2x384xf32>
    %382 = vector.extract_strided_slice %381 {offsets = [0, 0], sizes = [2, 128], strides = [1, 1]} : vector<2x384xf32> to vector<2x128xf32>
    %383 = vector.extract_strided_slice %381 {offsets = [0, 128], sizes = [2, 128], strides = [1, 1]} : vector<2x384xf32> to vector<2x128xf32>
    %384 = vector.extract_strided_slice %381 {offsets = [0, 256], sizes = [2, 128], strides = [1, 1]} : vector<2x384xf32> to vector<2x128xf32>
    %385 = vector.extract_strided_slice %375 {offsets = [0, 384], sizes = [2, 128], strides = [1, 1]} : vector<2x512xf32> to vector<2x128xf32>
    %386 = math.tanh %385 : vector<2x128xf32>
    %387 = arith.mulf %383, %367 : vector<2x128xf32>
    %388 = arith.mulf %382, %386 : vector<2x128xf32>
    %389 = arith.addf %387, %388 : vector<2x128xf32>
    %390 = math.tanh %389 : vector<2x128xf32>
    %391 = arith.mulf %384, %390 : vector<2x128xf32>
    %c7_i32_145 = arith.constant 7 : i32
    %392 = arith.index_cast %c7_i32_145 : i32 to index
    %c0_146 = arith.constant 0 : index
    %c0_147 = arith.constant 0 : index
    %393 = vector.load %arg11[%392, %c0_146, %c0_147] : memref<8x2x512xf32, #tpu.memory_space<vmem>>, vector<1x2x512xf32>
    %394 = vector.shape_cast %393 : vector<1x2x512xf32> to vector<2x512xf32>
    %c0_148 = arith.constant 0 : index
    %c0_149 = arith.constant 0 : index
    %395 = vector.load %arg6[%c0_148, %c0_149] : memref<128x512xf32, #tpu.memory_space<vmem>>, vector<128x512xf32>
    %cst_150 = arith.constant dense<0.000000e+00> : vector<2x512xf32>
    %396 = tpu.matmul %391, %395, %cst_150 {dimension_numbers = #tpu.dot_dimension_numbers<[1], [0], [0], [1], [0, 0, 1, 1], [], []>} : vector<2x128xf32>, vector<128x512xf32>, vector<2x512xf32> -> vector<2x512xf32>
    %397 = arith.addf %394, %396 : vector<2x512xf32>
    %398 = vector.extract_strided_slice %397 {offsets = [0, 0], sizes = [2, 384], strides = [1, 1]} : vector<2x512xf32> to vector<2x384xf32>
    %399 = arith.negf %398 : vector<2x384xf32>
    %400 = math.exp %399 : vector<2x384xf32>
    %cst_151 = arith.constant 1.000000e+00 : f32
    %401 = vector.broadcast %cst_151 : f32 to vector<2x384xf32>
    %402 = arith.addf %401, %400 : vector<2x384xf32>
    %403 = arith.divf %401, %402 : vector<2x384xf32>
    %404 = vector.extract_strided_slice %403 {offsets = [0, 0], sizes = [2, 128], strides = [1, 1]} : vector<2x384xf32> to vector<2x128xf32>
    %405 = vector.extract_strided_slice %403 {offsets = [0, 128], sizes = [2, 128], strides = [1, 1]} : vector<2x384xf32> to vector<2x128xf32>
    %406 = vector.extract_strided_slice %403 {offsets = [0, 256], sizes = [2, 128], strides = [1, 1]} : vector<2x384xf32> to vector<2x128xf32>
    %407 = vector.extract_strided_slice %397 {offsets = [0, 384], sizes = [2, 128], strides = [1, 1]} : vector<2x512xf32> to vector<2x128xf32>
    %408 = math.tanh %407 : vector<2x128xf32>
    %409 = arith.mulf %405, %389 : vector<2x128xf32>
    %410 = arith.mulf %404, %408 : vector<2x128xf32>
    %411 = arith.addf %409, %410 : vector<2x128xf32>
    %412 = math.tanh %411 : vector<2x128xf32>
    %413 = arith.mulf %406, %412 : vector<2x128xf32>
    %c8_i32_152 = arith.constant 8 : i32
    %c0_153 = arith.constant 0 : index
    %c0_154 = arith.constant 0 : index
    %414 = vector.load %arg8[%c0_153, %c0_154] : memref<128x2xf32, #tpu.memory_space<vmem>>, vector<128x2xf32>
    %cst_155 = arith.constant dense<0.000000e+00> : vector<2x2xf32>
    %415 = tpu.matmul %413, %414, %cst_155 {dimension_numbers = #tpu.dot_dimension_numbers<[1], [0], [0], [1], [0, 0, 1, 1], [], []>} : vector<2x128xf32>, vector<128x2xf32>, vector<2x2xf32> -> vector<2x2xf32>
    %c0_156 = arith.constant 0 : index
    %c0_157 = arith.constant 0 : index
    %416 = vector.load %arg9[%c0_156, %c0_157] : memref<1x2xf32, #tpu.memory_space<vmem>>, vector<1x2xf32>
    %417 = vector.broadcast %416 : vector<1x2xf32> to vector<2x2xf32>
    %418 = arith.addf %415, %417 : vector<2x2xf32>
    %c0_158 = arith.constant 0 : index
    %c0_159 = arith.constant 0 : index
    %419 = vector.load %arg10[%c0_158, %c0_159] : memref<2x2xf32, #tpu.memory_space<vmem>>, vector<2x2xf32>
    tpu.vector_store %arg10[%c0_158, %c0_159], %418 {strides = array<i32>} : memref<2x2xf32, #tpu.memory_space<vmem>>, vector<2x2xf32>,
    return
  }
  func.func @transform_0(%arg0: i32) -> (i32, i32, i32) {
    %c0_i32 = arith.constant 0 : i32
    %c0_i32_0 = arith.constant 0 : i32
    %c0_i32_1 = arith.constant 0 : i32
    return %c0_i32, %arg0, %c0_i32_0 : i32, i32, i32
  }
  func.func @transform_1(%arg0: i32) -> (i32, i32) {
    %c0_i32 = arith.constant 0 : i32
    %c0_i32_0 = arith.constant 0 : i32
    %c0_i32_1 = arith.constant 0 : i32
    return %c0_i32, %c0_i32_0 : i32, i32
  }
  func.func @transform_2(%arg0: i32) -> (i32, i32) {
    %c0_i32 = arith.constant 0 : i32
    %c0_i32_0 = arith.constant 0 : i32
    %c0_i32_1 = arith.constant 0 : i32
    return %c0_i32, %c0_i32_0 : i32, i32
  }
  func.func @transform_3(%arg0: i32) -> (i32, i32) {
    %c0_i32 = arith.constant 0 : i32
    %c0_i32_0 = arith.constant 0 : i32
    %c0_i32_1 = arith.constant 0 : i32
    return %c0_i32, %c0_i32_0 : i32, i32
  }
  func.func @transform_4(%arg0: i32) -> (i32, i32) {
    %c0_i32 = arith.constant 0 : i32
    %c0_i32_0 = arith.constant 0 : i32
    %c0_i32_1 = arith.constant 0 : i32
    return %c0_i32, %c0_i32_0 : i32, i32
  }
  func.func @transform_5(%arg0: i32) -> (i32, i32) {
    %c0_i32 = arith.constant 0 : i32
    %c0_i32_0 = arith.constant 0 : i32
    %c0_i32_1 = arith.constant 0 : i32
    return %c0_i32, %c0_i32_0 : i32, i32
  }
  func.func @transform_6(%arg0: i32) -> (i32, i32) {
    %c0_i32 = arith.constant 0 : i32
    %c0_i32_0 = arith.constant 0 : i32
    %c0_i32_1 = arith.constant 0 : i32
    return %c0_i32, %c0_i32_0 : i32, i32
  }
  func.func @transform_7(%arg0: i32) -> (i32, i32) {
    %c0_i32 = arith.constant 0 : i32
    %c0_i32_0 = arith.constant 0 : i32
    %c0_i32_1 = arith.constant 0 : i32
    return %c0_i32, %c0_i32_0 : i32, i32
  }
  func.func @transform_8(%arg0: i32) -> (i32, i32) {
    %c0_i32 = arith.constant 0 : i32
    %c0_i32_0 = arith.constant 0 : i32
    %c0_i32_1 = arith.constant 0 : i32
    return %c0_i32, %c0_i32_0 : i32, i32
  }
  func.func @transform_9(%arg0: i32) -> (i32, i32) {
    %c0_i32 = arith.constant 0 : i32
    %c0_i32_0 = arith.constant 0 : i32
    return %arg0, %c0_i32 : i32, i32
  }
}

</mosaic_0001>

<bundles_post_ra>
// kernel: lancet_bc_forward.1
= control target key start
LH: loop header
LB: loop body
LE: loop exit
PB: predicated region body
PF: predicated region fallthrough
CT: control target
= control target key end

     0   :  { %14 = vsyncpa [#allocation5], 0  ;;  %s7117_s0 = inlined_call_operand.vmem [shape: f32[8,2,16], index: 0, kind: input, shape index: {}]   ;;  %s7118_s1 = inlined_call_operand.vmem [shape: f32[16,512], index: 1, kind: input, shape index: {}]   ;;  %s7119_s2 = inlined_call_operand.hbm [shape: f32[128,512], index: 2, kind: input, shape index: {}]   ;;  %s7120_s3 = inlined_call_operand.vmem [shape: f32[1,512], index: 3, kind: input, shape index: {}]   ;;  %s7121_s4 = inlined_call_operand.hbm [shape: f32[128,512], index: 4, kind: input, shape index: {}]   ;;  %s7122_s5 = inlined_call_operand.hbm [shape: f32[128,512], index: 5, kind: input, shape index: {}]   ;;  %s7123_s6 = inlined_call_operand.vmem [shape: f32[1,512], index: 6, kind: input, shape index: {}]   ;;  %s7124_s7 = inlined_call_operand.vmem [shape: f32[128,2], index: 7, kind: input, shape index: {}]   ;;  %s7125_s8 = inlined_call_operand.vmem [shape: f32[1,2], index: 8, kind: input, shape index: {}]   ;;  %s7126_s9 = inlined_call_operand.hbm [shape: f32[2,2], index: 9, kind: output, shape index: {}]  }
   0x1   :  { %15 = vsyncpa [#allocation8], 0 }
   0x2   :  { %16 = vsyncpa [#allocation6], 0  ;;  %s5907_s30 = smov [#allocation7]   ;;  %s5908_s11 = smov [#allocation4]  }
   0x3   :  { %s40_s10 = sshll.u32 %s5907_s30, 4  ;;  %s26_s12 = sshll.u32 %s5908_s11, 4  ;;  %s41_s10 = int_to_ptr.vmem [resolvable:$true] %s40_s10  ;;  %s5967_s12 = int_to_ptr.vmem [resolvable:$true] %s26_s12 }
   0x4   :  { %s5813_s15 = scalar_lea.hbm %s7121_s4, 8192 }
   0x5   :  { %p5814_p0 = scmp.ne.s32.totalorder %s7121_s4, %s5813_s15  ;;  %p5817_p1 = scmp.lt.u32.totalorder %s5813_s15, %s7121_s4 }
   0x7   :  { %p5819_p2 = pnand %p5817_p1, %p5814_p0 }
   0x9   :  { %5822 = shalt.err (!%p5819_p2)
}
   0xa   :  { %s5823_s20 = scalar_lea.vmem %s41_s10, 8192  ;;  %p5828_p4 = scmp.lt.s32.totalorder %s41_s10, %s41_s10 }
   0xb   :  { %p5824_p3 = scmp.ne.s32.totalorder %s41_s10, %s5823_s20  ;;  %p5829_p5 = scmp.lt.s32.totalorder %s5823_s20, %s5823_s20 }
   0xd   :  { %p5830_p6 = por %p5829_p5, %p5828_p4 }
   0xf   :  { %p5831_p7 = pnand %p5830_p6, %p5824_p3 }
  0x11   :  { %5834 = shalt.err (!%p5831_p7)
}
  0x12   :  { %s5909_s21 = smov 512   ;;  %s5910_s22 = smov 32  }
  0x13   :  { %46 = dma.hbm_to_vmem [thread:$0]  %s7121_s4, 8192, %s41_s10, [#allocation8], %s5909_s21, %s5909_s21, %s5910_s22  }
  0x14   :  { %s5835_s27 = scalar_lea.hbm %s7119_s2, 8192 }
  0x15   :  { %p5836_p8 = scmp.ne.s32.totalorder %s7119_s2, %s5835_s27  ;;  %p5839_p9 = scmp.lt.u32.totalorder %s5835_s27, %s7119_s2 }
  0x17   :  { %p5841_p10 = pnand %p5839_p9, %p5836_p8 }
  0x19   :  { %5844 = shalt.err (!%p5841_p10)
}
  0x1a   :  { %s5845_s13 = scalar_lea.vmem %s5967_s12, 8192  ;;  %p5850_p12 = scmp.lt.s32.totalorder %s5967_s12, %s5967_s12 }
  0x1b   :  { %p5846_p11 = scmp.ne.s32.totalorder %s5967_s12, %s5845_s13  ;;  %p5851_p13 = scmp.lt.s32.totalorder %s5845_s13, %s5845_s13 }
  0x1d   :  { %p5852_p0 = por %p5851_p13, %p5850_p12 }
  0x1f   :  { %p5853_p1 = pnand %p5852_p0, %p5846_p11 }
  0x21   :  { %5856 = shalt.err (!%p5853_p1)
}
  0x22   :  { %32 = dma.hbm_to_vmem [thread:$0]  %s7119_s2, 8192, %s5967_s12, [#allocation5], %s5909_s21, %s5909_s21, %s5910_s22  }
  0x23   :  { %s5911_s14 = smov [#allocation9]   ;;  %s5857_s18 = scalar_lea.hbm %s7122_s5, 8192 }
  0x24   :  { %s52_s15 = sshll.u32 %s5911_s14, 4  ;;  %p5858_p2 = scmp.ne.s32.totalorder %s7122_s5, %s5857_s18  ;;  %s53_s15 = int_to_ptr.vmem [resolvable:$true] %s52_s15 }
  0x25   :  { %p5861_p3 = scmp.lt.u32.totalorder %s5857_s18, %s7122_s5 }
  0x27   :  { %p5863_p4 = pnand %p5861_p3, %p5858_p2 }
  0x29   :  { %5866 = shalt.err (!%p5863_p4)
}
  0x2a   :  { %s5867_s25 = scalar_lea.vmem %s53_s15, 8192  ;;  %p5872_p6 = scmp.lt.s32.totalorder %s53_s15, %s53_s15 }
  0x2b   :  { %p5868_p5 = scmp.ne.s32.totalorder %s53_s15, %s5867_s25  ;;  %p5873_p7 = scmp.lt.s32.totalorder %s5867_s25, %s5867_s25 }
  0x2d   :  { %p5874_p8 = por %p5873_p7, %p5872_p6 }
  0x2f   :  { %p5875_p9 = pnand %p5874_p8, %p5868_p5 }
  0x31   :  { %5878 = shalt.err (!%p5875_p9)
}
  0x32   :  { %58 = dma.hbm_to_vmem [thread:$0]  %s7122_s5, 8192, %s53_s15, [#allocation8], %s5909_s21, %s5909_s21, %s5910_s22  }
  0x33   :  { %5901 = dma.done.wait [#allocation5], 8192  }
  0x34   :  { %5902 = vsyncadd [#allocation5], 4294959104 }
  0x35   :  { %5903 = dma.done.wait [#allocation8], 16384  }
  0x36   :  { %5904 = vsyncadd [#allocation8], 4294950912  ;;  %v92_v0 = vlaneseq  ;;  %v5912_v1 = vmov 0.0   ;;  %v5913_v2 = vmov 1983009808   ;;  %v84_v6 = vld [vmem:[%s7118_s1 + $0x8] sm:$0xff] }
  0x37   :  { %223 = vmatprep.mubr.f32.mxu1 %v5912_v1  ;;  %v123_v3 = vunpack.c.l.s4 %v5913_v2  ;;  %538 = vmatprep.mubr.f32.mxu0 %v5912_v1  ;;  %v88_v7 = vld [vmem:[%s7118_s1 + $0x28] sm:$0xff]  ;;  %v83_v8 = vld [vmem:[%s7118_s1] sm:$0xff]  ;;  %v86_v18 = vld [vmem:[%s7118_s1 + $0x18] sm:$0xff]  ;;  %vm154_vm0 = vcmask 130048   ;;  %vm5915_vm1 = vmmov 0   ;;  %s5916_s15 = smov [#allocation10]  }
  0x38   :  { %v6021_v4 = vshrl.u32 %v92_v0, 7  ;;  %v4555_v10 = vpack.c.bf16 %v88_v7, %v84_v6  ;;  %v87_v11 = vld [vmem:[%s7118_s1 + $0x20] sm:$0xff]  ;;  %v90_v20 = vld [vmem:[%s7118_s1 + $0x38] sm:$0xff]  ;;  %v85_v21 = vld [vmem:[%s7118_s1 + $0x10] sm:$0xff]  ;;  %s4472_s16 = sshll.u32 %s5916_s15, 4  ;;  %vm4464_vm2 = vcmask 9216   ;;  %s4473_s16 = int_to_ptr.vmem [resolvable:$true] %s4472_s16 }
  0x39   :  { %v124_v5 = vunpack.c.0.s8 %v123_v3  ;;  %v75_v12 = vld [vmem:[%s7117_s0] sm:$0x3]  ;;  %v76_v13 = vld [vmem:[%s7117_s0 + $0x2] sm:$0x3]  ;;  %v4557_v14 = vpack.c.bf16 %v87_v11, %v83_v8  ;;  %v77_v15 = vld [vmem:[%s7117_s0 + $0x4] sm:$0x3]  ;;  %v4559_v24 = vpack.c.bf16 %v90_v20, %v86_v18  ;;  %p5884_p11 = scmp.lt.s32.totalorder %s4473_s16, %s4473_s16 }
  0x3a   :  { %v78_v16 = vld [vmem:[%s7117_s0 + $0x6] sm:$0x3]  ;;  %v120_v17 = vcombine.low %v75_v12, %v76_v13  ;;  %4556 = vmatprep.subr.bf16.mxu1 %v4555_v10  ;;  %v89_v22 = vld [vmem:[%s7118_s1 + $0x30] sm:$0xff]  ;;  %v79_v25 = vld [vmem:[%s7117_s0 + $0x8] sm:$0x3]  ;;  %s5879_s17 = scalar_lea.vmem %s4473_s16, 32 }
  0x3b   :  { %v6033_v9 = vsub.s32 %v124_v5, %v6021_v4  ;;  %v121_v19 = vcombine.low %v77_v15, %v78_v16  ;;  %4558 = vmatpush1.bf16.msra.mxu1 %v4557_v14  ;;  %v80_v26 = vld [vmem:[%s7117_s0 + $0xa] sm:$0x3]  ;;  %v81_v27 = vld [vmem:[%s7117_s0 + $0xc] sm:$0x3]  ;;  %v82_v29 = vld [vmem:[%s7117_s0 + $0xe] sm:$0x3]  ;;  %v4561_v33 = vpack.c.bf16 %v89_v22, %v85_v21  ;;  %p5880_p10 = scmp.ne.s32.totalorder %s4473_s16, %s5879_s17  ;;  %p5885_p12 = scmp.lt.s32.totalorder %s5879_s17, %s5879_s17 }
  0x3c   :  { %v137_v30 = vcombine.low %v79_v25, %v80_v26  ;;  %v411_v31 = vld [vmem:[#allocation4 + $0x8] sm:$0xff]  ;;  %4560 = vmatprep.subr.bf16.mxu1 %v4559_v24  ;;  %v138_v34 = vcombine.low %v81_v27, %v82_v29  ;;  %v413_v36 = vld [vmem:[#allocation4 + $0x18] sm:$0xff]  ;;  %v410_v38 = vld [vmem:[#allocation4] sm:$0xff] }
  0x3d   :  { %v128_v23 = vrot.slane %v120_v17, %v6033_v9  ;;  %v135_v28 = vrot.slane %v121_v19, %v6033_v9  ;;  %v415_v32 = vld [vmem:[#allocation4 + $0x28] sm:$0xff]  ;;  %v417_v37 = vld [vmem:[#allocation4 + $0x38] sm:$0xff]  ;;  %v414_v42 = vld [vmem:[#allocation4 + $0x20] sm:$0xff]  ;;  %p5886_p13 = por %p5885_p12, %p5884_p11 }
  0x3e   :  { %v6076_v35 = vpack.c.bf16 %v415_v32, %v411_v31  ;;  %v145_v40 = vrot.slane %v137_v30, %v6033_v9  ;;  %v6079_v41 = vpack.c.bf16 %v417_v37, %v413_v36  ;;  %v152_v43 = vrot.slane %v138_v34, %v6033_v9  ;;  %v419_v45 = vld [vmem:[#allocation4 + $0x48] sm:$0xff]  ;;  %v418_v48 = vld [vmem:[#allocation4 + $0x40] sm:$0xff]  ;;  %v412_v51 = vld [vmem:[#allocation4 + $0x10] sm:$0xff] }
  0x3f   :  { %v136_v39 = vcombine.low %v128_v23, %v135_v28  ;;  %v6083_v44 = vpack.c.bf16 %v414_v42, %v410_v38  ;;  %v423_v46 = vld [vmem:[#allocation4 + $0x68] sm:$0xff]  ;;  %v422_v49 = vld [vmem:[#allocation4 + $0x60] sm:$0xff]  ;;  %v416_v53 = vld [vmem:[#allocation4 + $0x30] sm:$0xff]  ;;  %p5887_p0 = pnand %p5886_p13, %p5880_p10 }
  0x40   :  { %4564 = vmatprep.subr.bf16.mxu0 %v6076_v35  ;;  %v6086_v47 = vpack.c.bf16 %v423_v46, %v419_v45  ;;  %v153_v50 = vcombine.low %v145_v40, %v152_v43  ;;  %v427_v52 = vld [vmem:[#allocation4 + $0x88] sm:$0xff]  ;;  %v421_v54 = vld [vmem:[#allocation4 + $0x58] sm:$0xff]  ;;  %v6091_v55 = vpack.c.bf16 %v422_v49, %v418_v48  ;;  %v426_v59 = vld [vmem:[#allocation4 + $0x80] sm:$0xff]  ;;  %v6098_v63 = vpack.c.bf16 %v416_v53, %v412_v51 }
  0x41   :  { %4482 = vmatmul.mubr.msk.f32.vlgmr.msra.gmra.mrb[0].mxu1 %vm154_vm0, %v136_v39  ;;  %4566 = vmatpush1.bf16.msra.mxu0 %v6083_v44  ;;  %v431_v56 = vld [vmem:[#allocation4 + $0xa8] sm:$0xff]  ;;  %v425_v57 = vld [vmem:[#allocation4 + $0x78] sm:$0xff]  ;;  %v430_v60 = vld [vmem:[#allocation4 + $0xa0] sm:$0xff] }
  0x42   :  { %4562 = vmatpush1.bf16.msra.mxu1 %v4561_v33  ;;  %229 = vmatprep.mubr.f32.mxu1 %v5912_v1  ;;  %v6094_v58 = vpack.c.bf16 %v431_v56, %v427_v52  ;;  %v435_v61 = vld [vmem:[#allocation4 + $0xc8] sm:$0xff]  ;;  %v6100_v0 = vpack.c.bf16 %v425_v57, %v421_v54  ;;  %v420_v2 = vld [vmem:[#allocation4 + $0x50] sm:$0xff]  ;;  %v429_v5 = vld [vmem:[#allocation4 + $0x98] sm:$0xff]  ;;  %v6103_v6 = vpack.c.bf16 %v430_v60, %v426_v59 }
  0x43   :  { %4596 = vmatprep.subr.bf16.mxu1 %v6079_v41  ;;  %4568 = vmatprep.subr.bf16.mxu0 %v6086_v47  ;;  %v439_v62 = vld [vmem:[#allocation4 + $0xe8] sm:$0xff]  ;;  %v424_v3 = vld [vmem:[#allocation4 + $0x70] sm:$0xff]  ;;  %v433_v7 = vld [vmem:[#allocation4 + $0xb8] sm:$0xff] }
  0x44   :  { %v6106_v8 = vpack.c.bf16 %v439_v62, %v435_v61  ;;  %v434_v10 = vld [vmem:[#allocation4 + $0xc0] sm:$0xff]  ;;  %v443_v12 = vld [vmem:[#allocation4 + $0x108] sm:$0xff]  ;;  %v6111_v14 = vpack.c.bf16 %v424_v3, %v420_v2  ;;  %v6114_v15 = vpack.c.bf16 %v433_v7, %v429_v5  ;;  %v428_v16 = vld [vmem:[#allocation4 + $0x90] sm:$0xff] }
  0x45   :  { %4483 = vmatmul.mubr.msk.f32.gmra.mrb[2].mxu1 %vm154_vm0, %v153_v50  ;;  %4570 = vmatpush1.bf16.msra.mxu0 %v6091_v55  ;;  %v438_v11 = vld [vmem:[#allocation4 + $0xe0] sm:$0xff]  ;;  %v447_v13 = vld [vmem:[#allocation4 + $0x128] sm:$0xff]  ;;  %v432_v17 = vld [vmem:[#allocation4 + $0xb0] sm:$0xff] }
  0x46   :  { %300 = vmatprep.mubr.f32.mxu1 %v5912_v1  ;;  %4572 = vmatprep.subr.bf16.mxu0 %v6094_v58  ;;  %v437_v18 = vld [vmem:[#allocation4 + $0xd8] sm:$0xff]  ;;  %v6117_v19 = vpack.c.bf16 %v438_v11, %v434_v10  ;;  %v6120_v21 = vpack.c.bf16 %v447_v13, %v443_v12  ;;  %v442_v22 = vld [vmem:[#allocation4 + $0x100] sm:$0xff]  ;;  %v451_v24 = vld [vmem:[#allocation4 + $0x148] sm:$0xff]  ;;  %v6124_v26 = vpack.c.bf16 %v432_v17, %v428_v16 }
  0x47   :  { %v441_v20 = vld [vmem:[#allocation4 + $0xf8] sm:$0xff]  ;;  %v446_v23 = vld [vmem:[#allocation4 + $0x120] sm:$0xff]  ;;  %v455_v25 = vld [vmem:[#allocation4 + $0x168] sm:$0xff] }
  0x48   :  { %v6128_v27 = vpack.c.bf16 %v441_v20, %v437_v18  ;;  %v436_v28 = vld [vmem:[#allocation4 + $0xd0] sm:$0xff]  ;;  %v445_v30 = vld [vmem:[#allocation4 + $0x118] sm:$0xff]  ;;  %v6131_v31 = vpack.c.bf16 %v446_v23, %v442_v22  ;;  %v6134_v33 = vpack.c.bf16 %v455_v25, %v451_v24  ;;  %v450_v34 = vld [vmem:[#allocation4 + $0x140] sm:$0xff]  ;;  %v7130_v25 = vsub.s32 0, %v6021_v4 }
  0x49   :  { %4484 = vmatmul.mubr.msk.f32.vlgmr.msra.gmra.mrb[4].mxu1 %vm154_vm0, %v136_v39  ;;  %4574 = vmatpush1.bf16.msra.mxu0 %v6103_v6  ;;  %v440_v29 = vld [vmem:[#allocation4 + $0xf0] sm:$0xff]  ;;  %v449_v32 = vld [vmem:[#allocation4 + $0x138] sm:$0xff]  ;;  %v454_v36 = vld [vmem:[#allocation4 + $0x160] sm:$0xff] }
  0x4a   :  { %4598 = vmatpush1.bf16.msra.mxu1 %v6098_v63  ;;  %306 = vmatprep.mubr.f32.mxu1 %v5912_v1  ;;  %v459_v37 = vld [vmem:[#allocation4 + $0x188] sm:$0xff]  ;;  %v6137_v39 = vpack.c.bf16 %v440_v29, %v436_v28  ;;  %v6140_v40 = vpack.c.bf16 %v449_v32, %v445_v30  ;;  %v444_v42 = vld [vmem:[#allocation4 + $0x110] sm:$0xff]  ;;  %v453_v45 = vld [vmem:[#allocation4 + $0x158] sm:$0xff]  ;;  %v6143_v46 = vpack.c.bf16 %v454_v36, %v450_v34  ;;  %v7128_v29 = vsub.s32 1, %v6021_v4 }
  0x4b   :  { %4600 = vmatprep.subr.bf16.mxu1 %v6100_v0  ;;  %4576 = vmatprep.subr.bf16.mxu0 %v6106_v8  ;;  %v463_v38 = vld [vmem:[#allocation4 + $0x1a8] sm:$0xff]  ;;  %v448_v43 = vld [vmem:[#allocation4 + $0x130] sm:$0xff]  ;;  %v457_v48 = vld [vmem:[#allocation4 + $0x178] sm:$0xff] }
  0x4c   :  { %v6146_v49 = vpack.c.bf16 %v463_v38, %v459_v37  ;;  %v462_v51 = vld [vmem:[#allocation4 + $0x1a0] sm:$0xff]  ;;  %v467_v52 = vld [vmem:[#allocation4 + $0x1c8] sm:$0xff]  ;;  %v6149_v54 = vpack.c.bf16 %v448_v43, %v444_v42  ;;  %v6152_v56 = vpack.c.bf16 %v457_v48, %v453_v45  ;;  %v452_v57 = vld [vmem:[#allocation4 + $0x150] sm:$0xff]  ;;  %v7129_v37 = vsub.s32 2, %v6021_v4 }
  0x4d   :  { %4485 = vmatmul.mubr.msk.f32.gmra.mrb[6].mxu1 %vm154_vm0, %v153_v50  ;;  %4578 = vmatpush1.bf16.msra.mxu0 %v6117_v19  ;;  %v458_v50 = vld [vmem:[#allocation4 + $0x180] sm:$0xff]  ;;  %v471_v53 = vld [vmem:[#allocation4 + $0x1e8] sm:$0xff]  ;;  %v456_v59 = vld [vmem:[#allocation4 + $0x170] sm:$0xff]  ;;  %v7127_v38 = vsub.s32 3, %v6021_v4 }
  0x4e   :  { %4602 = vmatpush1.bf16.msra.mxu1 %v6111_v14  ;;  %609 = vmatprep.mubr.f32.mxu1 %v5912_v1  ;;  %v461_v60 = vld [vmem:[#allocation4 + $0x198] sm:$0xff]  ;;  %v6155_v61 = vpack.c.bf16 %v462_v51, %v458_v50  ;;  %v6158_v2 = vpack.c.bf16 %v471_v53, %v467_v52  ;;  %v466_v3 = vld [vmem:[#allocation4 + $0x1c0] sm:$0xff]  ;;  %v6161_v7 = vpack.c.bf16 %v456_v59, %v452_v57  ;;  %v460_v11 = vld [vmem:[#allocation4 + $0x190] sm:$0xff] }
  0x4f   :  { %4604 = vmatprep.subr.bf16.mxu1 %v6114_v15  ;;  %4580 = vmatprep.subr.bf16.mxu0 %v6120_v21  ;;  %v465_v62 = vld [vmem:[#allocation4 + $0x1b8] sm:$0xff]  ;;  %v470_v5 = vld [vmem:[#allocation4 + $0x1e0] sm:$0xff]  ;;  %v464_v12 = vld [vmem:[#allocation4 + $0x1b0] sm:$0xff] }
  0x50   :  { %v6164_v10 = vpack.c.bf16 %v465_v62, %v461_v60  ;;  %v6167_v13 = vpack.c.bf16 %v470_v5, %v466_v3  ;;  %v469_v16 = vld [vmem:[#allocation4 + $0x1d8] sm:$0xff]  ;;  %v6171_v18 = vpack.c.bf16 %v464_v12, %v460_v11  ;;  %v468_v22 = vld [vmem:[#allocation4 + $0x1d0] sm:$0xff] }
  0x51   :  { %4582 = vmatpush1.bf16.msra.mxu0 %v6131_v31  ;;  %v473_v17 = vld [vmem:[#allocation4 + $0x1f8] sm:$0xff]  ;;  %v472_v23 = vld [vmem:[#allocation4 + $0x1f0] sm:$0xff] }
  0x52   :  { %4606 = vmatpush1.bf16.msra.mxu1 %v6124_v26  ;;  %4584 = vmatprep.subr.bf16.mxu0 %v6134_v33  ;;  %v6174_v20 = vpack.c.bf16 %v473_v17, %v469_v16  ;;  %v6179_v24 = vpack.c.bf16 %v472_v23, %v468_v22  ;;  %v74_v28 = vld [vmem:[%s7120_s3] sm:$0xf] }
  0x53   :  { %4608 = vmatprep.subr.bf16.mxu1 %v6128_v27  ;;  %v95_v30 = vrot.slane %v74_v28, %v7130_v25  ;;  %v103_v51 = vrot.slane %v74_v28, %v7129_v37  ;;  %v107_v53 = vrot.slane %v74_v28, %v7127_v38 }
  0x55   :  { %4586 = vmatpush1.bf16.msra.mxu0 %v6143_v46 }
  0x56   :  { %4610 = vmatpush1.bf16.msra.mxu1 %v6137_v39  ;;  %4588 = vmatprep.subr.bf16.mxu0 %v6146_v49 }
  0x57   :  { %4612 = vmatprep.subr.bf16.mxu1 %v6140_v40 }
  0x59   :  { %4590 = vmatpush1.bf16.msra.mxu0 %v6155_v61 }
  0x5a   :  { %4614 = vmatpush1.bf16.msra.mxu1 %v6149_v54  ;;  %4592 = vmatprep.subr.bf16.mxu0 %v6158_v2 }
  0x5b   :  { %4616 = vmatprep.subr.bf16.mxu1 %v6152_v56 }
  0x5d   :  { %4594 = vmatpush1.bf16.msra.mxu0 %v6167_v13 }
  0x5e   :  { %4618 = vmatpush1.bf16.msra.mxu1 %v6161_v7  ;;  %4628 = vmatprep.subr.bf16.mxu0 %v6076_v35 }
  0x5f   :  { %4620 = vmatprep.subr.bf16.mxu1 %v6164_v10 }
  0x60   :  { %539 = vmatmul.mubr.f32.vlgmr.msra.gmra.mrb[0].mxu0 %v5912_v1 }
  0x61   :  { %4630 = vmatpush1.bf16.msra.mxu0 %v6083_v44  ;;  %790 = vmatprep.mubr.f32.mxu0 %v5912_v1 }
  0x62   :  { %4622 = vmatpush1.bf16.msra.mxu1 %v6171_v18  ;;  %4632 = vmatprep.subr.bf16.mxu0 %v6086_v47 }
  0x63   :  { %4624 = vmatprep.subr.bf16.mxu1 %v6174_v20 }
  0x65   :  { %4634 = vmatpush1.bf16.msra.mxu0 %v6091_v55 }
  0x66   :  { %4626 = vmatpush1.bf16.msra.mxu1 %v6179_v24  ;;  %4636 = vmatprep.subr.bf16.mxu0 %v6094_v58 }
  0x67   :  { %4660 = vmatprep.subr.bf16.mxu1 %v6079_v41 }
  0x69   :  { %610 = vmatmul.mubr.f32.vlgmr.msra.gmra.mrb[8].mxu1 %v5912_v1  ;;  %4638 = vmatpush1.bf16.msra.mxu0 %v6103_v6 }
  0x6a   :  { %4662 = vmatpush1.bf16.msra.mxu1 %v6098_v63  ;;  %861 = vmatprep.mubr.f32.mxu1 %v5912_v1 }
  0x6b   :  { %4664 = vmatprep.subr.bf16.mxu1 %v6100_v0  ;;  %4640 = vmatprep.subr.bf16.mxu0 %v6106_v8 }
  0x6d   :  { %4642 = vmatpush1.bf16.msra.mxu0 %v6117_v19 }
  0x6e   :  { %4666 = vmatpush1.bf16.msra.mxu1 %v6111_v14  ;;  %4644 = vmatprep.subr.bf16.mxu0 %v6120_v21 }
  0x6f   :  { %4668 = vmatprep.subr.bf16.mxu1 %v6114_v15 }
  0x71   :  { %4646 = vmatpush1.bf16.msra.mxu0 %v6131_v31 }
  0x72   :  { %4670 = vmatpush1.bf16.msra.mxu1 %v6124_v26  ;;  %4648 = vmatprep.subr.bf16.mxu0 %v6134_v33 }
  0x73   :  { %4672 = vmatprep.subr.bf16.mxu1 %v6128_v27 }
  0x75   :  { %4650 = vmatpush1.bf16.msra.mxu0 %v6143_v46 }
  0x76   :  { %4674 = vmatpush1.bf16.msra.mxu1 %v6137_v39  ;;  %4652 = vmatprep.subr.bf16.mxu0 %v6146_v49 }
  0x77   :  { %4676 = vmatprep.subr.bf16.mxu1 %v6140_v40 }
  0x79   :  { %4654 = vmatpush1.bf16.msra.mxu0 %v6155_v61 }
  0x7a   :  { %4678 = vmatpush1.bf16.msra.mxu1 %v6149_v54  ;;  %4656 = vmatprep.subr.bf16.mxu0 %v6158_v2 }
  0x7b   :  { %4680 = vmatprep.subr.bf16.mxu1 %v6152_v56 }
  0x7d   :  { %4658 = vmatpush1.bf16.msra.mxu0 %v6167_v13 }
  0x7e   :  { %4682 = vmatpush1.bf16.msra.mxu1 %v6161_v7  ;;  %4692 = vmatprep.subr.bf16.mxu0 %v6076_v35  ;;  %v99_v35 = vrot.slane %v74_v28, %v7128_v29 }
  0x7f   :  { %4684 = vmatprep.subr.bf16.mxu1 %v6164_v10 }
  0x82   :  { %4686 = vmatpush1.bf16.msra.mxu1 %v6171_v18 }
  0x83   :  { %4688 = vmatprep.subr.bf16.mxu1 %v6174_v20 }
  0x86   :  { %4690 = vmatpush1.bf16.msra.mxu1 %v6179_v24 }
  0x87   :  { %4724 = vmatprep.subr.bf16.mxu1 %v6079_v41 }
 0x114   :  { %v225_v32 = vpop.f32.mrb[0].mxu1 }
 0x115   :  { %v226_v34 = vadd.f32 %v225_v32, %v95_v30  ;;  %v227_v36 = vpop.f32.mrb[1].mxu1 }
 0x116   :  { %v228_v41 = vadd.f32 %v227_v36, %v99_v35 }
 0x118   :  { %v321_v42 = vcombine.low %v226_v34, %v228_v41  ;;  %v322_v43 = vcombine.high %v226_v34, %v228_v41  ;;  %v231_v45 = vpop.f32.mrb[2].mxu1 }
 0x119   :  { %v232_v48 = vadd.f32 %v231_v45, %v95_v30  ;;  %v233_v50 = vpop.f32.mrb[3].mxu1 }
 0x11a   :  { %v234_v52 = vadd.f32 %v233_v50, %v99_v35  ;;  %v6236_v17 = vrot.slane %v321_v42, %v6033_v9  ;;  %v6239_v30 = vrot.slane %v322_v43, %v6033_v9 }
 0x11c   :  { %v357_v57 = vcombine.low %v232_v48, %v234_v52  ;;  %v358_v59 = vcombine.high %v232_v48, %v234_v52  ;;  %v302_v60 = vpop.f32.mrb[4].mxu1 }
 0x11d   :  { %v303_v62 = vadd.f32 %v302_v60, %v103_v51  ;;  %v304_v3 = vpop.f32.mrb[5].mxu1 }
 0x11e   :  { %v305_v5 = vadd.f32 %v304_v3, %v107_v53  ;;  %v6256_v48 = vrot.slane %v357_v57, %v6033_v9  ;;  %v6259_v50 = vrot.slane %v358_v59, %v6033_v9 }
 0x120   :  { %v323_v11 = vcombine.low %v303_v62, %v305_v5  ;;  %v324_v12 = vcombine.high %v303_v62, %v305_v5  ;;  %v308_v16 = vpop.f32.mrb[6].mxu1 }
 0x121   :  { %v309_v22 = vadd.f32 %v308_v16, %v103_v51  ;;  %v310_v23 = vpop.f32.mrb[7].mxu1 }
 0x122   :  { %v6242_v35 = vrot.slane %v323_v11, %v6033_v9  ;;  %v6245_v28 = vrot.slane %v324_v12, %v6033_v9  ;;  %v311_v32 = vadd.f32 %v310_v23, %v107_v53 }
 0x124   :  { %v353_v34 = vcombine.low %v6236_v17, %v6242_v35  ;;  %v354_v36 = vcombine.high %v6236_v17, %v6242_v35  ;;  %v355_v41 = vcombine.low %v6239_v30, %v6245_v28  ;;  %v356_v42 = vcombine.high %v6239_v30, %v6245_v28  ;;  %v1169_v35 = vld [vmem:[#allocation4 + $0x8] sm:$0xff] }
 0x125   :  { %v359_v43 = vcombine.low %v309_v22, %v311_v32  ;;  %v360_v45 = vcombine.high %v309_v22, %v311_v32 }
 0x127   :  { %v6262_v51 = vrot.slane %v359_v43, %v6033_v9  ;;  %v6265_v52 = vrot.slane %v360_v45, %v6033_v9 }
 0x129   :  { %v389_v53 = vcombine.low %v6256_v48, %v6262_v51 }
 0x133   :  { %v540_v59 = vpop.f32.mrb[0].mxu0 }
 0x134   :  { %v542_v3 = vpop.f32.mrb[1].mxu0 }
 0x135   :  { %v620_v5 = vcombine.low %v540_v59, %v542_v3 }
 0x137   :  { %v628_v16 = vrot.slane %v620_v5, %v6033_v9 }
 0x13c   :  { %v611_v11 = vpop.f32.mrb[8].mxu1 }
 0x13d   :  { %v613_v12 = vpop.f32.mrb[9].mxu1 }
 0x13e   :  { %v621_v22 = vcombine.low %v611_v11, %v613_v12 }
 0x140   :  { %v635_v23 = vrot.slane %v621_v22, %v6033_v9 }
 0x142   :  { %v636_v32 = vcombine.low %v628_v16, %v635_v23 }
 0x144   :  { %v638_v43 = vadd.f32 %v636_v32, %v353_v34 }
 0x146   :  { %v4486_v45 = vmul.f32 -1.442695, %v638_v43  ;;  %v646_v37 = vrot.slane %v638_v43, 6 }
 0x148   :  { %5685 = vpow2.f32 %v4486_v45 }
 0x152   :  { %v5686_v38 = vpop.eup %5685 }
 0x153   :  { %v642_v29 = vadd.f32 1.0, %v5686_v38 }
 0x155   :  { %5687 = vrcp.f32 %v642_v29 }
 0x156   :  { %5689 = vtanh.f32 %v646_v37 }
 0x15f   :  { %v5688_v25 = vpop.eup %5687 }
 0x160   :  { %v650_v57 = vrot.slane %v5688_v25, 2  ;;  %v5690_v62 = vpop.eup %5689  ;;  %v656_v5 = vrot.slane %v5688_v25, 4 }
 0x161   :  { %v653_v59 = vmul.f32 %v5690_v62, %v5688_v25 }
 0x162   :  { %v652_v3 = vmul.f32 0.0, %v650_v57 }
 0x164   :  { %v654_v60 = vadd.f32 %v653_v59, %v652_v3 }
 0x166   :  { %5691 = vtanh.f32 %v654_v60 }
 0x170   :  { %v5692_v11 = vpop.eup %5691 }
 0x171   :  { %v658_v12 = vmul.f32 %v5692_v11, %v656_v5 }
 0x173   :  { %659 = vst [vmem:[#allocation3] sm:$0x3] %v658_v12  ;;  %791 = vmatmul.mubr.f32.vlgmr.msra.gmra.mrb[2].mxu0 %v658_v12  ;;  %862 = vmatmul.mubr.f32.vlgmr.msra.gmra.mrb[10].mxu1 %v658_v12 }
 0x174   :  { %4694 = vmatpush1.bf16.msra.mxu0 %v6083_v44  ;;  %4726 = vmatpush1.bf16.msra.mxu1 %v6098_v63 }
 0x175   :  { %4696 = vmatprep.subr.bf16.mxu0 %v6086_v47  ;;  %4728 = vmatprep.subr.bf16.mxu1 %v6100_v0 }
 0x176   :  { %1043 = vmatprep.mubr.f32.mxu0 %v5912_v1  ;;  %1114 = vmatprep.mubr.f32.mxu1 %v5912_v1 }
 0x178   :  { %4698 = vmatpush1.bf16.msra.mxu0 %v6091_v55  ;;  %4730 = vmatpush1.bf16.msra.mxu1 %v6111_v14 }
 0x179   :  { %4700 = vmatprep.subr.bf16.mxu0 %v6094_v58  ;;  %4732 = vmatprep.subr.bf16.mxu1 %v6114_v15 }
 0x17c   :  { %4702 = vmatpush1.bf16.msra.mxu0 %v6103_v6  ;;  %4734 = vmatpush1.bf16.msra.mxu1 %v6124_v26 }
 0x17d   :  { %4704 = vmatprep.subr.bf16.mxu0 %v6106_v8  ;;  %4736 = vmatprep.subr.bf16.mxu1 %v6128_v27 }
 0x180   :  { %4706 = vmatpush1.bf16.msra.mxu0 %v6117_v19  ;;  %4738 = vmatpush1.bf16.msra.mxu1 %v6137_v39 }
 0x181   :  { %4708 = vmatprep.subr.bf16.mxu0 %v6120_v21  ;;  %4740 = vmatprep.subr.bf16.mxu1 %v6140_v40 }
 0x184   :  { %4710 = vmatpush1.bf16.msra.mxu0 %v6131_v31  ;;  %4742 = vmatpush1.bf16.msra.mxu1 %v6149_v54 }
 0x185   :  { %4712 = vmatprep.subr.bf16.mxu0 %v6134_v33  ;;  %4744 = vmatprep.subr.bf16.mxu1 %v6152_v56 }
 0x188   :  { %4714 = vmatpush1.bf16.msra.mxu0 %v6143_v46  ;;  %4746 = vmatpush1.bf16.msra.mxu1 %v6161_v7 }
 0x189   :  { %4716 = vmatprep.subr.bf16.mxu0 %v6146_v49  ;;  %4748 = vmatprep.subr.bf16.mxu1 %v6164_v10 }
 0x18c   :  { %4718 = vmatpush1.bf16.msra.mxu0 %v6155_v61  ;;  %4750 = vmatpush1.bf16.msra.mxu1 %v6171_v18 }
 0x18d   :  { %4720 = vmatprep.subr.bf16.mxu0 %v6158_v2  ;;  %4752 = vmatprep.subr.bf16.mxu1 %v6174_v20 }
 0x190   :  { %4722 = vmatpush1.bf16.msra.mxu0 %v6167_v13  ;;  %4754 = vmatpush1.bf16.msra.mxu1 %v6179_v24 }
 0x246   :  { %v792_v25 = vpop.f32.mrb[2].mxu0  ;;  %v863_v29 = vpop.f32.mrb[10].mxu1 }
 0x247   :  { %v794_v37 = vpop.f32.mrb[3].mxu0  ;;  %v865_v38 = vpop.f32.mrb[11].mxu1 }
 0x248   :  { %v872_v34 = vcombine.low %v792_v25, %v794_v37  ;;  %v873_v62 = vcombine.low %v863_v29, %v865_v38 }
 0x24a   :  { %v880_v57 = vrot.slane %v872_v34, %v6033_v9  ;;  %v887_v16 = vrot.slane %v873_v62, %v6033_v9  ;;  %v1171_v34 = vld [vmem:[#allocation4 + $0x18] sm:$0xff] }
 0x24c   :  { %v888_v22 = vcombine.low %v880_v57, %v887_v16  ;;  %v1432_v16 = vld [vmem:[#allocation4 + $0x58] sm:$0xff] }
 0x24e   :  { %v890_v23 = vadd.f32 %v888_v22, %v354_v36  ;;  %v1173_v36 = vld [vmem:[#allocation4 + $0x28] sm:$0xff] }
 0x24f   :  { %v6319_v62 = vpack.c.bf16 %v1173_v36, %v1169_v35  ;;  %v1441_v35 = vld [vmem:[#allocation4 + $0xa0] sm:$0xff] }
 0x250   :  { %v4487_v32 = vmul.f32 -1.442695, %v890_v23  ;;  %v898_v59 = vrot.slane %v890_v23, 6  ;;  %v1436_v23 = vld [vmem:[#allocation4 + $0x78] sm:$0xff] }
 0x251   :  { %4756 = vmatprep.subr.bf16.mxu0 %v6319_v62 }
 0x252   :  { %5693 = vpow2.f32 %v4487_v32  ;;  %v1429_v32 = vld [vmem:[#allocation4 + $0x40] sm:$0xff] }
 0x25c   :  { %v5694_v43 = vpop.eup %5693 }
 0x25d   :  { %v894_v45 = vadd.f32 1.0, %v5694_v43  ;;  %v1433_v43 = vld [vmem:[#allocation4 + $0x60] sm:$0xff] }
 0x25f   :  { %5695 = vrcp.f32 %v894_v45  ;;  %v6376_v45 = vpack.c.bf16 %v1436_v23, %v1432_v16  ;;  %v1464_v16 = vld [vmem:[#allocation4 + $0x158] sm:$0xff] }
 0x260   :  { %5697 = vtanh.f32 %v898_v59  ;;  %v6378_v59 = vpack.c.bf16 %v1433_v43, %v1429_v32  ;;  %v1468_v23 = vld [vmem:[#allocation4 + $0x178] sm:$0xff] }
 0x261   :  { %v6422_v43 = vpack.c.bf16 %v1468_v23, %v1464_v16 }
 0x269   :  { %v5696_v3 = vpop.eup %5695 }
 0x26a   :  { %v902_v5 = vrot.slane %v5696_v3, 2  ;;  %v5698_v11 = vpop.eup %5697  ;;  %v908_v37 = vrot.slane %v5696_v3, 4 }
 0x26b   :  { %v905_v12 = vmul.f32 %v5698_v11, %v5696_v3  ;;  %v1431_v3 = vld [vmem:[#allocation4 + $0x50] sm:$0xff] }
 0x26c   :  { %v904_v25 = vmul.f32 %v902_v5, %v654_v60  ;;  %v1175_v60 = vld [vmem:[#allocation4 + $0x38] sm:$0xff]  ;;  %v1435_v5 = vld [vmem:[#allocation4 + $0x70] sm:$0xff] }
 0x26d   :  { %v6321_v57 = vpack.c.bf16 %v1175_v60, %v1171_v34  ;;  %v6381_v11 = vpack.c.bf16 %v1435_v5, %v1431_v3  ;;  %v1439_v60 = vld [vmem:[#allocation4 + $0x90] sm:$0xff]  ;;  %v1461_v3 = vld [vmem:[#allocation4 + $0x140] sm:$0xff] }
 0x26e   :  { %v6314_v29 = vadd.f32 %v905_v12, %v904_v25  ;;  %v1438_v12 = vld [vmem:[#allocation4 + $0x88] sm:$0xff]  ;;  %v1465_v5 = vld [vmem:[#allocation4 + $0x160] sm:$0xff] }
 0x26f   :  { %4788 = vmatprep.subr.bf16.mxu1 %v6321_v57  ;;  %v1442_v25 = vld [vmem:[#allocation4 + $0xa8] sm:$0xff] }
 0x270   :  { %5699 = vtanh.f32 %v6314_v29 }
 0x27a   :  { %v5700_v38 = vpop.eup %5699 }
 0x27b   :  { %v910_v17 = vmul.f32 %v5700_v38, %v908_v37  ;;  %v6386_v37 = vpack.c.bf16 %v1442_v25, %v1438_v12  ;;  %v1444_v38 = vld [vmem:[#allocation4 + $0xb8] sm:$0xff]  ;;  %v1463_v12 = vld [vmem:[#allocation4 + $0x150] sm:$0xff]  ;;  %v6425_v25 = vpack.c.bf16 %v1465_v5, %v1461_v3 }
 0x27d   :  { %912 = vst [vmem:[#allocation3 + $0x2] sm:$0x3] %v910_v17  ;;  %1044 = vmatmul.mubr.f32.vlgmr.msra.gmra.mrb[4].mxu0 %v910_v17  ;;  %1115 = vmatmul.mubr.f32.vlgmr.msra.gmra.mrb[12].mxu1 %v910_v17  ;;  %v1437_v17 = vld [vmem:[#allocation4 + $0x80] sm:$0xff] }
 0x27e   :  { %1296 = vmatprep.mubr.f32.mxu0 %v5912_v1  ;;  %1367 = vmatprep.mubr.f32.mxu1 %v5912_v1  ;;  %v6390_v34 = vpack.c.bf16 %v1441_v35, %v1437_v17  ;;  %v1474_v17 = vld [vmem:[#allocation4 + $0x1a8] sm:$0xff] }
 0x27f   :  { %4758 = vmatpush1.bf16.msra.mxu0 %v6083_v44  ;;  %4790 = vmatpush1.bf16.msra.mxu1 %v6098_v63 }
 0x280   :  { %4760 = vmatprep.subr.bf16.mxu0 %v6086_v47  ;;  %4792 = vmatprep.subr.bf16.mxu1 %v6100_v0 }
 0x283   :  { %4762 = vmatpush1.bf16.msra.mxu0 %v6091_v55  ;;  %4794 = vmatpush1.bf16.msra.mxu1 %v6111_v14 }
 0x284   :  { %4764 = vmatprep.subr.bf16.mxu0 %v6094_v58  ;;  %4796 = vmatprep.subr.bf16.mxu1 %v6114_v15 }
 0x287   :  { %4766 = vmatpush1.bf16.msra.mxu0 %v6103_v6  ;;  %4798 = vmatpush1.bf16.msra.mxu1 %v6124_v26 }
 0x288   :  { %4768 = vmatprep.subr.bf16.mxu0 %v6106_v8  ;;  %4800 = vmatprep.subr.bf16.mxu1 %v6128_v27 }
 0x28b   :  { %4770 = vmatpush1.bf16.msra.mxu0 %v6117_v19  ;;  %4802 = vmatpush1.bf16.msra.mxu1 %v6137_v39 }
 0x28c   :  { %4772 = vmatprep.subr.bf16.mxu0 %v6120_v21  ;;  %4804 = vmatprep.subr.bf16.mxu1 %v6140_v40 }
 0x28f   :  { %4774 = vmatpush1.bf16.msra.mxu0 %v6131_v31  ;;  %4806 = vmatpush1.bf16.msra.mxu1 %v6149_v54 }
 0x290   :  { %4776 = vmatprep.subr.bf16.mxu0 %v6134_v33  ;;  %4808 = vmatprep.subr.bf16.mxu1 %v6152_v56 }
 0x293   :  { %4778 = vmatpush1.bf16.msra.mxu0 %v6143_v46  ;;  %4810 = vmatpush1.bf16.msra.mxu1 %v6161_v7  ;;  %v1425_v7 = vld [vmem:[#allocation4 + $0x20] sm:$0xff] }
 0x294   :  { %4780 = vmatprep.subr.bf16.mxu0 %v6146_v49  ;;  %4812 = vmatprep.subr.bf16.mxu1 %v6164_v10  ;;  %v1423_v10 = vld [vmem:[#allocation4 + $0x10] sm:$0xff] }
 0x297   :  { %4782 = vmatpush1.bf16.msra.mxu0 %v6155_v61  ;;  %4814 = vmatpush1.bf16.msra.mxu1 %v6171_v18  ;;  %v1427_v18 = vld [vmem:[#allocation4 + $0x30] sm:$0xff] }
 0x298   :  { %4784 = vmatprep.subr.bf16.mxu0 %v6158_v2  ;;  %4816 = vmatprep.subr.bf16.mxu1 %v6174_v20  ;;  %v1421_v2 = vld [vmem:[#allocation4] sm:$0xff]  ;;  %v6370_v20 = vpack.c.bf16 %v1427_v18, %v1423_v10  ;;  %v1459_v10 = vld [vmem:[#allocation4 + $0x130] sm:$0xff]  ;;  %v1462_v18 = vld [vmem:[#allocation4 + $0x148] sm:$0xff] }
 0x29b   :  { %4786 = vmatpush1.bf16.msra.mxu0 %v6167_v13  ;;  %4818 = vmatpush1.bf16.msra.mxu1 %v6179_v24  ;;  %v6368_v13 = vpack.c.bf16 %v1425_v7, %v1421_v2  ;;  %v1430_v24 = vld [vmem:[#allocation4 + $0x48] sm:$0xff]  ;;  %v1455_v7 = vld [vmem:[#allocation4 + $0x110] sm:$0xff] }
 0x29c   :  { %4820 = vmatprep.subr.bf16.mxu0 %v6319_v62  ;;  %4852 = vmatprep.subr.bf16.mxu1 %v6321_v57 }
 0x350   :  { %v1045_v44 = vpop.f32.mrb[4].mxu0  ;;  %v1116_v47 = vpop.f32.mrb[12].mxu1 }
 0x351   :  { %v1047_v55 = vpop.f32.mrb[5].mxu0  ;;  %v1118_v58 = vpop.f32.mrb[13].mxu1 }
 0x352   :  { %v1125_v63 = vcombine.low %v1045_v44, %v1047_v55  ;;  %v1126_v0 = vcombine.low %v1116_v47, %v1118_v58  ;;  %v1443_v44 = vld [vmem:[#allocation4 + $0xb0] sm:$0xff]  ;;  %v1446_v55 = vld [vmem:[#allocation4 + $0xc8] sm:$0xff] }
 0x353   :  { %v6393_v47 = vpack.c.bf16 %v1443_v44, %v1439_v60  ;;  %v1450_v58 = vld [vmem:[#allocation4 + $0xe8] sm:$0xff]  ;;  %v1472_v44 = vld [vmem:[#allocation4 + $0x198] sm:$0xff] }
 0x354   :  { %v1133_v6 = vrot.slane %v1125_v63, %v6033_v9  ;;  %v1140_v8 = vrot.slane %v1126_v0, %v6033_v9  ;;  %v1448_v63 = vld [vmem:[#allocation4 + $0xd8] sm:$0xff]  ;;  %v6398_v0 = vpack.c.bf16 %v1450_v58, %v1446_v55  ;;  %v1469_v58 = vld [vmem:[#allocation4 + $0x180] sm:$0xff] }
 0x355   :  { %v1476_v55 = vld [vmem:[#allocation4 + $0x1b8] sm:$0xff] }
 0x356   :  { %v1141_v14 = vcombine.low %v1133_v6, %v1140_v8  ;;  %v1452_v6 = vld [vmem:[#allocation4 + $0xf8] sm:$0xff]  ;;  %v1445_v8 = vld [vmem:[#allocation4 + $0xc0] sm:$0xff] }
 0x358   :  { %v1143_v15 = vadd.f32 %v1141_v14, %v355_v41  ;;  %v1434_v41 = vld [vmem:[#allocation4 + $0x68] sm:$0xff]  ;;  %v1449_v14 = vld [vmem:[#allocation4 + $0xe0] sm:$0xff] }
 0x359   :  { %v6374_v22 = vpack.c.bf16 %v1434_v41, %v1430_v24  ;;  %v6417_v24 = vpack.c.bf16 %v1459_v10, %v1455_v7  ;;  %v1466_v41 = vld [vmem:[#allocation4 + $0x168] sm:$0xff]  ;;  %v1481_v7 = vld [vmem:[#allocation4 + $0x1e0] sm:$0xff] }
 0x35a   :  { %v4488_v19 = vmul.f32 -1.442695, %v1143_v15  ;;  %v1151_v27 = vrot.slane %v1143_v15, 6  ;;  %v6400_v15 = vpack.c.bf16 %v1452_v6, %v1448_v63  ;;  %v6420_v32 = vpack.c.bf16 %v1466_v41, %v1462_v18  ;;  %v1473_v6 = vld [vmem:[#allocation4 + $0x1a0] sm:$0xff]  ;;  %v1479_v18 = vld [vmem:[#allocation4 + $0x1d0] sm:$0xff] }
 0x35b   :  { %v6434_v63 = vpack.c.bf16 %v1476_v55, %v1472_v44  ;;  %v1483_v41 = vld [vmem:[#allocation4 + $0x1f0] sm:$0xff] }
 0x35c   :  { %5701 = vpow2.f32 %v4488_v19  ;;  %v6402_v19 = vpack.c.bf16 %v1449_v14, %v1445_v8  ;;  %v1471_v8 = vld [vmem:[#allocation4 + $0x190] sm:$0xff]  ;;  %v6453_v23 = vpack.c.bf16 %v1483_v41, %v1479_v18 }
 0x35d   :  { %v1475_v14 = vld [vmem:[#allocation4 + $0x1b0] sm:$0xff] }
 0x366   :  { %v5702_v21 = vpop.eup %5701 }
 0x367   :  { %v1147_v26 = vadd.f32 1.0, %v5702_v21  ;;  %v1447_v21 = vld [vmem:[#allocation4 + $0xd0] sm:$0xff] }
 0x369   :  { %5703 = vrcp.f32 %v1147_v26  ;;  %v1451_v26 = vld [vmem:[#allocation4 + $0xf0] sm:$0xff] }
 0x36a   :  { %5705 = vtanh.f32 %v1151_v27  ;;  %v6405_v27 = vpack.c.bf16 %v1451_v26, %v1447_v21  ;;  %v1478_v21 = vld [vmem:[#allocation4 + $0x1c8] sm:$0xff] }
 0x36b   :  { %v1482_v26 = vld [vmem:[#allocation4 + $0x1e8] sm:$0xff] }
 0x373   :  { %v5704_v31 = vpop.eup %5703 }
 0x374   :  { %v1155_v33 = vrot.slane %v5704_v31, 2  ;;  %v5706_v39 = vpop.eup %5705  ;;  %v1161_v54 = vrot.slane %v5704_v31, 4 }
 0x375   :  { %v1158_v40 = vmul.f32 %v5706_v39, %v5704_v31  ;;  %v1454_v31 = vld [vmem:[#allocation4 + $0x108] sm:$0xff]  ;;  %v1456_v39 = vld [vmem:[#allocation4 + $0x118] sm:$0xff] }
 0x376   :  { %v1157_v46 = vmul.f32 %v1155_v33, %v6314_v29  ;;  %v1440_v29 = vld [vmem:[#allocation4 + $0x98] sm:$0xff]  ;;  %v1458_v33 = vld [vmem:[#allocation4 + $0x128] sm:$0xff] }
 0x377   :  { %v6388_v36 = vpack.c.bf16 %v1444_v38, %v1440_v29  ;;  %v1467_v29 = vld [vmem:[#allocation4 + $0x170] sm:$0xff]  ;;  %v1470_v38 = vld [vmem:[#allocation4 + $0x188] sm:$0xff] }
 0x378   :  { %v6363_v49 = vadd.f32 %v1158_v40, %v1157_v46  ;;  %v6409_v40 = vpack.c.bf16 %v1458_v33, %v1454_v31  ;;  %v1460_v46 = vld [vmem:[#allocation4 + $0x138] sm:$0xff]  ;;  %v6429_v35 = vpack.c.bf16 %v1467_v29, %v1463_v12  ;;  %v6431_v60 = vpack.c.bf16 %v1474_v17, %v1470_v38 }
 0x379   :  { %v1480_v31 = vld [vmem:[#allocation4 + $0x1d8] sm:$0xff]  ;;  %v6437_v33 = vpack.c.bf16 %v1473_v6, %v1469_v58 }
 0x37a   :  { %5707 = vtanh.f32 %v6363_v49 }
 0x384   :  { %v5708_v56 = vpop.eup %5707 }
 0x385   :  { %v1163_v61 = vmul.f32 %v5708_v56, %v1161_v54  ;;  %v1453_v54 = vld [vmem:[#allocation4 + $0x100] sm:$0xff] }
 0x386   :  { %v1457_v56 = vld [vmem:[#allocation4 + $0x120] sm:$0xff] }
 0x387   :  { %1165 = vst [vmem:[#allocation3 + $0x4] sm:$0x3] %v1163_v61  ;;  %1297 = vmatmul.mubr.f32.vlgmr.msra.gmra.mrb[6].mxu0 %v1163_v61  ;;  %1368 = vmatmul.mubr.f32.vlgmr.msra.gmra.mrb[14].mxu1 %v1163_v61  ;;  %v6412_v61 = vpack.c.bf16 %v1460_v46, %v1456_v39  ;;  %v6414_v2 = vpack.c.bf16 %v1457_v56, %v1453_v54  ;;  %v1484_v39 = vld [vmem:[#allocation4 + $0x1f8] sm:$0xff]  ;;  %v1477_v56 = vld [vmem:[#allocation4 + $0x1c0] sm:$0xff] }
 0x388   :  { %1549 = vmatprep.mubr.f32.mxu0 %v5912_v1  ;;  %1620 = vmatprep.mubr.f32.mxu1 %v5912_v1  ;;  %v6441_v46 = vpack.c.bf16 %v1475_v14, %v1471_v8  ;;  %v6443_v54 = vpack.c.bf16 %v1482_v26, %v1478_v21  ;;  %v6446_v10 = vpack.c.bf16 %v1484_v39, %v1480_v31 }
 0x389   :  { %4822 = vmatpush1.bf16.msra.mxu0 %v6368_v13  ;;  %4854 = vmatpush1.bf16.msra.mxu1 %v6370_v20  ;;  %v6449_v16 = vpack.c.bf16 %v1481_v7, %v1477_v56 }
 0x38a   :  { %4824 = vmatprep.subr.bf16.mxu0 %v6374_v22  ;;  %4856 = vmatprep.subr.bf16.mxu1 %v6376_v45 }
 0x38d   :  { %4826 = vmatpush1.bf16.msra.mxu0 %v6378_v59  ;;  %4858 = vmatpush1.bf16.msra.mxu1 %v6381_v11 }
 0x38e   :  { %4828 = vmatprep.subr.bf16.mxu0 %v6386_v37  ;;  %4860 = vmatprep.subr.bf16.mxu1 %v6388_v36 }
 0x391   :  { %4830 = vmatpush1.bf16.msra.mxu0 %v6390_v34  ;;  %4862 = vmatpush1.bf16.msra.mxu1 %v6393_v47 }
 0x392   :  { %4832 = vmatprep.subr.bf16.mxu0 %v6398_v0  ;;  %4864 = vmatprep.subr.bf16.mxu1 %v6400_v15 }
 0x395   :  { %4834 = vmatpush1.bf16.msra.mxu0 %v6402_v19  ;;  %4866 = vmatpush1.bf16.msra.mxu1 %v6405_v27 }
 0x396   :  { %4836 = vmatprep.subr.bf16.mxu0 %v6409_v40  ;;  %4868 = vmatprep.subr.bf16.mxu1 %v6412_v61 }
 0x399   :  { %4838 = vmatpush1.bf16.msra.mxu0 %v6414_v2  ;;  %4870 = vmatpush1.bf16.msra.mxu1 %v6417_v24 }
 0x39a   :  { %4840 = vmatprep.subr.bf16.mxu0 %v6420_v32  ;;  %4872 = vmatprep.subr.bf16.mxu1 %v6422_v43 }
 0x39d   :  { %4842 = vmatpush1.bf16.msra.mxu0 %v6425_v25  ;;  %4874 = vmatpush1.bf16.msra.mxu1 %v6429_v35 }
 0x39e   :  { %4844 = vmatprep.subr.bf16.mxu0 %v6431_v60  ;;  %4876 = vmatprep.subr.bf16.mxu1 %v6434_v63 }
 0x3a1   :  { %4846 = vmatpush1.bf16.msra.mxu0 %v6437_v33  ;;  %4878 = vmatpush1.bf16.msra.mxu1 %v6441_v46 }
 0x3a2   :  { %4848 = vmatprep.subr.bf16.mxu0 %v6443_v54  ;;  %4880 = vmatprep.subr.bf16.mxu1 %v6446_v10 }
 0x3a5   :  { %4850 = vmatpush1.bf16.msra.mxu0 %v6449_v16  ;;  %4882 = vmatpush1.bf16.msra.mxu1 %v6453_v23 }
 0x3a6   :  { %4884 = vmatprep.subr.bf16.mxu0 %v6319_v62  ;;  %4916 = vmatprep.subr.bf16.mxu1 %v6321_v57 }
 0x45a   :  { %v1298_v3 = vpop.f32.mrb[6].mxu0  ;;  %v1369_v5 = vpop.f32.mrb[14].mxu1 }
 0x45b   :  { %v1300_v12 = vpop.f32.mrb[7].mxu0  ;;  %v1371_v29 = vpop.f32.mrb[15].mxu1 }
 0x45c   :  { %v1378_v38 = vcombine.low %v1298_v3, %v1300_v12  ;;  %v1379_v17 = vcombine.low %v1369_v5, %v1371_v29 }
 0x45e   :  { %v1386_v44 = vrot.slane %v1378_v38, %v6033_v9  ;;  %v1393_v55 = vrot.slane %v1379_v17, %v6033_v9 }
 0x460   :  { %v1394_v58 = vcombine.low %v1386_v44, %v1393_v55 }
 0x462   :  { %v1396_v6 = vadd.f32 %v1394_v58, %v356_v42 }
 0x464   :  { %v4489_v8 = vmul.f32 -1.442695, %v1396_v6  ;;  %v1404_v26 = vrot.slane %v1396_v6, 6 }
 0x466   :  { %5709 = vpow2.f32 %v4489_v8 }
 0x470   :  { %v5710_v14 = vpop.eup %5709 }
 0x471   :  { %v1400_v21 = vadd.f32 1.0, %v5710_v14 }
 0x473   :  { %5711 = vrcp.f32 %v1400_v21 }
 0x474   :  { %5713 = vtanh.f32 %v1404_v26 }
 0x47d   :  { %v5712_v31 = vpop.eup %5711 }
 0x47e   :  { %v1408_v39 = vrot.slane %v5712_v31, 2  ;;  %v5714_v56 = vpop.eup %5713  ;;  %v1414_v3 = vrot.slane %v5712_v31, 4 }
 0x47f   :  { %v1411_v7 = vmul.f32 %v5714_v56, %v5712_v31 }
 0x480   :  { %v1410_v18 = vmul.f32 %v1408_v39, %v6363_v49 }
 0x482   :  { %v6466_v41 = vadd.f32 %v1411_v7, %v1410_v18 }
 0x484   :  { %5715 = vtanh.f32 %v6466_v41 }
 0x48e   :  { %v5716_v30 = vpop.eup %5715 }
 0x48f   :  { %v1416_v28 = vmul.f32 %v5716_v30, %v1414_v3 }
 0x491   :  { %1418 = vst [vmem:[#allocation3 + $0x6] sm:$0x3] %v1416_v28  ;;  %1550 = vmatmul.mubr.f32.vlgmr.msra.gmra.mrb[8].mxu0 %v1416_v28  ;;  %1621 = vmatmul.mubr.f32.vlgmr.msra.gmra.mrb[16].mxu1 %v1416_v28 }
 0x492   :  { %4886 = vmatpush1.bf16.msra.mxu0 %v6368_v13  ;;  %4918 = vmatpush1.bf16.msra.mxu1 %v6370_v20 }
 0x493   :  { %4888 = vmatprep.subr.bf16.mxu0 %v6374_v22  ;;  %4920 = vmatprep.subr.bf16.mxu1 %v6376_v45 }
 0x494   :  { %1802 = vmatprep.mubr.f32.mxu0 %v5912_v1  ;;  %1873 = vmatprep.mubr.f32.mxu1 %v5912_v1 }
 0x496   :  { %4890 = vmatpush1.bf16.msra.mxu0 %v6378_v59  ;;  %4922 = vmatpush1.bf16.msra.mxu1 %v6381_v11 }
 0x497   :  { %4892 = vmatprep.subr.bf16.mxu0 %v6386_v37  ;;  %4924 = vmatprep.subr.bf16.mxu1 %v6388_v36 }
 0x49a   :  { %4894 = vmatpush1.bf16.msra.mxu0 %v6390_v34  ;;  %4926 = vmatpush1.bf16.msra.mxu1 %v6393_v47 }
 0x49b   :  { %4896 = vmatprep.subr.bf16.mxu0 %v6398_v0  ;;  %4928 = vmatprep.subr.bf16.mxu1 %v6400_v15 }
 0x49e   :  { %4898 = vmatpush1.bf16.msra.mxu0 %v6402_v19  ;;  %4930 = vmatpush1.bf16.msra.mxu1 %v6405_v27 }
 0x49f   :  { %4900 = vmatprep.subr.bf16.mxu0 %v6409_v40  ;;  %4932 = vmatprep.subr.bf16.mxu1 %v6412_v61 }
 0x4a2   :  { %4902 = vmatpush1.bf16.msra.mxu0 %v6414_v2  ;;  %4934 = vmatpush1.bf16.msra.mxu1 %v6417_v24 }
 0x4a3   :  { %4904 = vmatprep.subr.bf16.mxu0 %v6420_v32  ;;  %4936 = vmatprep.subr.bf16.mxu1 %v6422_v43 }
 0x4a6   :  { %4906 = vmatpush1.bf16.msra.mxu0 %v6425_v25  ;;  %4938 = vmatpush1.bf16.msra.mxu1 %v6429_v35 }
 0x4a7   :  { %4908 = vmatprep.subr.bf16.mxu0 %v6431_v60  ;;  %4940 = vmatprep.subr.bf16.mxu1 %v6434_v63 }
 0x4aa   :  { %4910 = vmatpush1.bf16.msra.mxu0 %v6437_v33  ;;  %4942 = vmatpush1.bf16.msra.mxu1 %v6441_v46 }
 0x4ab   :  { %4912 = vmatprep.subr.bf16.mxu0 %v6443_v54  ;;  %4944 = vmatprep.subr.bf16.mxu1 %v6446_v10 }
 0x4ae   :  { %4914 = vmatpush1.bf16.msra.mxu0 %v6449_v16  ;;  %4946 = vmatpush1.bf16.msra.mxu1 %v6453_v23 }
 0x4af   :  { %4948 = vmatprep.subr.bf16.mxu0 %v6319_v62  ;;  %4980 = vmatprep.subr.bf16.mxu1 %v6321_v57 }
 0x564   :  { %v1551_v42 = vpop.f32.mrb[8].mxu0  ;;  %v1622_v49 = vpop.f32.mrb[16].mxu1 }
 0x565   :  { %v1553_v5 = vpop.f32.mrb[9].mxu0  ;;  %v1624_v12 = vpop.f32.mrb[17].mxu1 }
 0x566   :  { %v1631_v29 = vcombine.low %v1551_v42, %v1553_v5  ;;  %v1632_v38 = vcombine.low %v1622_v49, %v1624_v12 }
 0x568   :  { %v1639_v17 = vrot.slane %v1631_v29, %v6033_v9  ;;  %v1646_v44 = vrot.slane %v1632_v38, %v6033_v9  ;;  %v7131_v38 = vcombine.high %v6256_v48, %v6262_v51  ;;  %v2181_v51 = vld [vmem:[#allocation4 + $0x8] sm:$0xff] }
 0x56a   :  { %v1647_v55 = vcombine.low %v1639_v17, %v1646_v44 }
 0x56c   :  { %v1649_v58 = vadd.f32 %v1647_v55, %v389_v53 }
 0x56e   :  { %v4490_v6 = vmul.f32 -1.442695, %v1649_v58  ;;  %v1657_v57 = vrot.slane %v1649_v58, 6 }
 0x570   :  { %5717 = vpow2.f32 %v4490_v6 }
 0x57a   :  { %v5718_v62 = vpop.eup %5717 }
 0x57b   :  { %v1653_v8 = vadd.f32 1.0, %v5718_v62 }
 0x57d   :  { %5719 = vrcp.f32 %v1653_v8 }
 0x57e   :  { %5721 = vtanh.f32 %v1657_v57 }
 0x587   :  { %v5720_v14 = vpop.eup %5719 }
 0x588   :  { %v1661_v21 = vrot.slane %v5720_v14, 2  ;;  %v5722_v26 = vpop.eup %5721  ;;  %v1667_v7 = vrot.slane %v5720_v14, 4 }
 0x589   :  { %v1664_v31 = vmul.f32 %v5722_v26, %v5720_v14 }
 0x58a   :  { %v1663_v39 = vmul.f32 %v1661_v21, %v6466_v41 }
 0x58c   :  { %v1665_v56 = vadd.f32 %v1664_v31, %v1663_v39 }
 0x58e   :  { %5723 = vtanh.f32 %v1665_v56 }
 0x598   :  { %v5724_v18 = vpop.eup %5723 }
 0x599   :  { %v1669_v3 = vmul.f32 %v5724_v18, %v1667_v7  ;;  %v2185_v7 = vld [vmem:[#allocation4 + $0x28] sm:$0xff]  ;;  %v2183_v18 = vld [vmem:[#allocation4 + $0x18] sm:$0xff] }
 0x59b   :  { %1671 = vst [vmem:[#allocation3 + $0x8] sm:$0x3] %v1669_v3  ;;  %1803 = vmatmul.mubr.f32.vlgmr.msra.gmra.mrb[10].mxu0 %v1669_v3  ;;  %1874 = vmatmul.mubr.f32.vlgmr.msra.gmra.mrb[18].mxu1 %v1669_v3  ;;  %v5011_v3 = vpack.c.bf16 %v2185_v7, %v2181_v51  ;;  %v2460_v51 = vld [vmem:[#allocation7 + $0xa0] sm:$0xff] }
 0x59c   :  { %4950 = vmatpush1.bf16.msra.mxu0 %v6368_v13  ;;  %4982 = vmatpush1.bf16.msra.mxu1 %v6370_v20 }
 0x59d   :  { %4952 = vmatprep.subr.bf16.mxu0 %v6374_v22  ;;  %4984 = vmatprep.subr.bf16.mxu1 %v6376_v45 }
 0x59e   :  { %2055 = vmatprep.mubr.f32.mxu0 %v5912_v1  ;;  %2126 = vmatprep.mubr.f32.mxu1 %v5912_v1 }
 0x5a0   :  { %4954 = vmatpush1.bf16.msra.mxu0 %v6378_v59  ;;  %4986 = vmatpush1.bf16.msra.mxu1 %v6381_v11 }
 0x5a1   :  { %4956 = vmatprep.subr.bf16.mxu0 %v6386_v37  ;;  %4988 = vmatprep.subr.bf16.mxu1 %v6388_v36 }
 0x5a4   :  { %4958 = vmatpush1.bf16.msra.mxu0 %v6390_v34  ;;  %4990 = vmatpush1.bf16.msra.mxu1 %v6393_v47 }
 0x5a5   :  { %4960 = vmatprep.subr.bf16.mxu0 %v6398_v0  ;;  %4992 = vmatprep.subr.bf16.mxu1 %v6400_v15 }
 0x5a8   :  { %4962 = vmatpush1.bf16.msra.mxu0 %v6402_v19  ;;  %4994 = vmatpush1.bf16.msra.mxu1 %v6405_v27 }
 0x5a9   :  { %4964 = vmatprep.subr.bf16.mxu0 %v6409_v40  ;;  %4996 = vmatprep.subr.bf16.mxu1 %v6412_v61 }
 0x5ac   :  { %4966 = vmatpush1.bf16.msra.mxu0 %v6414_v2  ;;  %4998 = vmatpush1.bf16.msra.mxu1 %v6417_v24 }
 0x5ad   :  { %4968 = vmatprep.subr.bf16.mxu0 %v6420_v32  ;;  %5000 = vmatprep.subr.bf16.mxu1 %v6422_v43 }
 0x5b0   :  { %4970 = vmatpush1.bf16.msra.mxu0 %v6425_v25  ;;  %5002 = vmatpush1.bf16.msra.mxu1 %v6429_v35 }
 0x5b1   :  { %4972 = vmatprep.subr.bf16.mxu0 %v6431_v60  ;;  %5004 = vmatprep.subr.bf16.mxu1 %v6434_v63 }
 0x5b4   :  { %4974 = vmatpush1.bf16.msra.mxu0 %v6437_v33  ;;  %5006 = vmatpush1.bf16.msra.mxu1 %v6441_v46 }
 0x5b5   :  { %4976 = vmatprep.subr.bf16.mxu0 %v6443_v54  ;;  %5008 = vmatprep.subr.bf16.mxu1 %v6446_v10 }
 0x5b8   :  { %4978 = vmatpush1.bf16.msra.mxu0 %v6449_v16  ;;  %5010 = vmatpush1.bf16.msra.mxu1 %v6453_v23 }
 0x5b9   :  { %5012 = vmatprep.subr.bf16.mxu0 %v5011_v3  ;;  %v2458_v3 = vld [vmem:[#allocation7 + $0x90] sm:$0xff] }
 0x66e   :  { %v1804_v53 = vpop.f32.mrb[10].mxu0  ;;  %v1875_v41 = vpop.f32.mrb[18].mxu1 }
 0x66f   :  { %v1806_v30 = vpop.f32.mrb[11].mxu0  ;;  %v1877_v28 = vpop.f32.mrb[19].mxu1 }
 0x670   :  { %v1884_v42 = vcombine.low %v1804_v53, %v1806_v30  ;;  %v1885_v49 = vcombine.low %v1875_v41, %v1877_v28  ;;  %v2187_v53 = vld [vmem:[#allocation4 + $0x38] sm:$0xff]  ;;  %v2446_v41 = vld [vmem:[#allocation7 + $0x30] sm:$0xff]  ;;  %v2449_v30 = vld [vmem:[#allocation7 + $0x48] sm:$0xff] }
 0x671   :  { %v2453_v28 = vld [vmem:[#allocation7 + $0x68] sm:$0xff] }
 0x672   :  { %v1892_v5 = vrot.slane %v1884_v42, %v6033_v9  ;;  %v1899_v12 = vrot.slane %v1885_v49, %v6033_v9  ;;  %v2451_v42 = vld [vmem:[#allocation7 + $0x58] sm:$0xff] }
 0x673   :  { %v2455_v49 = vld [vmem:[#allocation7 + $0x78] sm:$0xff] }
 0x674   :  { %v1900_v29 = vcombine.low %v1892_v5, %v1899_v12 }
 0x676   :  { %v1902_v17 = vadd.f32 %v1900_v29, %v7131_v38 }
 0x678   :  { %v4491_v44 = vmul.f32 -1.442695, %v1902_v17  ;;  %v1910_v6 = vrot.slane %v1902_v17, 6  ;;  %v2448_v17 = vld [vmem:[#allocation7 + $0x40] sm:$0xff] }
 0x67a   :  { %5725 = vpow2.f32 %v4491_v44  ;;  %v2452_v44 = vld [vmem:[#allocation7 + $0x60] sm:$0xff] }
 0x684   :  { %v5726_v55 = vpop.eup %5725 }
 0x685   :  { %v1906_v58 = vadd.f32 1.0, %v5726_v55 }
 0x687   :  { %5727 = vrcp.f32 %v1906_v58  ;;  %v5079_v58 = vpack.c.bf16 %v2453_v28, %v2449_v30  ;;  %v2484_v30 = vld [vmem:[#allocation7 + $0x160] sm:$0xff] }
 0x688   :  { %5729 = vtanh.f32 %v1910_v6  ;;  %v5111_v6 = vpack.c.bf16 %v2455_v49, %v2451_v42  ;;  %v2482_v49 = vld [vmem:[#allocation7 + $0x150] sm:$0xff] }
 0x691   :  { %v5728_v62 = vpop.eup %5727 }
 0x692   :  { %v1914_v8 = vrot.slane %v5728_v62, 2  ;;  %v5730_v57 = vpop.eup %5729  ;;  %v1920_v31 = vrot.slane %v5728_v62, 4 }
 0x693   :  { %v1917_v14 = vmul.f32 %v5730_v57, %v5728_v62  ;;  %v2450_v62 = vld [vmem:[#allocation7 + $0x50] sm:$0xff]  ;;  %v2457_v57 = vld [vmem:[#allocation7 + $0x88] sm:$0xff] }
 0x694   :  { %v1916_v21 = vmul.f32 %v1914_v8, %v1665_v56  ;;  %v5043_v56 = vpack.c.bf16 %v2187_v53, %v2183_v18  ;;  %v2454_v8 = vld [vmem:[#allocation7 + $0x70] sm:$0xff] }
 0x695   :  { %v2462_v53 = vld [vmem:[#allocation7 + $0xb0] sm:$0xff] }
 0x696   :  { %v6546_v26 = vadd.f32 %v1917_v14, %v1916_v21  ;;  %5044 = vmatprep.subr.bf16.mxu1 %v5043_v56  ;;  %v2461_v14 = vld [vmem:[#allocation7 + $0xa8] sm:$0xff]  ;;  %v2459_v21 = vld [vmem:[#allocation7 + $0x98] sm:$0xff] }
 0x697   :  { %v5083_v7 = vpack.c.bf16 %v2461_v14, %v2457_v57  ;;  %v2465_v56 = vld [vmem:[#allocation7 + $0xc8] sm:$0xff]  ;;  %v2490_v14 = vld [vmem:[#allocation7 + $0x190] sm:$0xff] }
 0x698   :  { %5731 = vtanh.f32 %v6546_v26 }
 0x6a2   :  { %v5732_v39 = vpop.eup %5731 }
 0x6a3   :  { %v1922_v48 = vmul.f32 %v5732_v39, %v1920_v31  ;;  %v5081_v31 = vpack.c.bf16 %v2452_v44, %v2448_v17  ;;  %v5113_v39 = vpack.c.bf16 %v2454_v8, %v2450_v62  ;;  %v2495_v17 = vld [vmem:[#allocation7 + $0x1b8] sm:$0xff]  ;;  %v2435_v62 = vld [vmem:[#allocation3 + $0x6] sm:$0x3] }
 0x6a5   :  { %1924 = vst [vmem:[#allocation3 + $0xa] sm:$0x3] %v1922_v48  ;;  %2056 = vmatmul.mubr.f32.vlgmr.msra.gmra.mrb[12].mxu0 %v1922_v48  ;;  %2127 = vmatmul.mubr.f32.vlgmr.msra.gmra.mrb[20].mxu1 %v1922_v48  ;;  %v2456_v48 = vld [vmem:[#allocation7 + $0x80] sm:$0xff] }
 0x6a6   :  { %2308 = vmatprep.mubr.f32.mxu0 %v5912_v1  ;;  %2379 = vmatprep.mubr.f32.mxu1 %v5912_v1 }
 0x6a7   :  { %5014 = vmatpush1.bf16.msra.mxu0 %v6368_v13  ;;  %5046 = vmatpush1.bf16.msra.mxu1 %v6370_v20  ;;  %v2441_v13 = vld [vmem:[#allocation7 + $0x8] sm:$0xff] }
 0x6a8   :  { %5016 = vmatprep.subr.bf16.mxu0 %v6374_v22  ;;  %5048 = vmatprep.subr.bf16.mxu1 %v6376_v45  ;;  %v2445_v20 = vld [vmem:[#allocation7 + $0x28] sm:$0xff]  ;;  %v2443_v22 = vld [vmem:[#allocation7 + $0x18] sm:$0xff] }
 0x6a9   :  { %v2447_v45 = vld [vmem:[#allocation7 + $0x38] sm:$0xff] }
 0x6ab   :  { %5018 = vmatpush1.bf16.msra.mxu0 %v6378_v59  ;;  %5050 = vmatpush1.bf16.msra.mxu1 %v6381_v11  ;;  %v5075_v59 = vpack.c.bf16 %v2445_v20, %v2441_v13  ;;  %v5107_v11 = vpack.c.bf16 %v2447_v45, %v2443_v22  ;;  %v2469_v13 = vld [vmem:[#allocation7 + $0xe8] sm:$0xff]  ;;  %v2467_v20 = vld [vmem:[#allocation7 + $0xd8] sm:$0xff]  ;;  %v5085_v45 = vpack.c.bf16 %v2460_v51, %v2456_v48 }
 0x6ac   :  { %5020 = vmatprep.subr.bf16.mxu0 %v6386_v37  ;;  %5052 = vmatprep.subr.bf16.mxu1 %v6388_v36  ;;  %v2471_v22 = vld [vmem:[#allocation7 + $0xf8] sm:$0xff] }
 0x6ad   :  { %v2503_v48 = vld [vmem:[#allocation7 + $0x1f8] sm:$0xff] }
 0x6af   :  { %5022 = vmatpush1.bf16.msra.mxu0 %v6390_v34  ;;  %5054 = vmatpush1.bf16.msra.mxu1 %v6393_v47 }
 0x6b0   :  { %5024 = vmatprep.subr.bf16.mxu0 %v6398_v0  ;;  %5056 = vmatprep.subr.bf16.mxu1 %v6400_v15 }
 0x6b3   :  { %5026 = vmatpush1.bf16.msra.mxu0 %v6402_v19  ;;  %5058 = vmatpush1.bf16.msra.mxu1 %v6405_v27 }
 0x6b4   :  { %5028 = vmatprep.subr.bf16.mxu0 %v6409_v40  ;;  %5060 = vmatprep.subr.bf16.mxu1 %v6412_v61  ;;  %v7132_v61 = vcombine.low %v6259_v50, %v6265_v52 }
 0x6b7   :  { %5030 = vmatpush1.bf16.msra.mxu0 %v6414_v2  ;;  %5062 = vmatpush1.bf16.msra.mxu1 %v6417_v24 }
 0x6b8   :  { %5032 = vmatprep.subr.bf16.mxu0 %v6420_v32  ;;  %5064 = vmatprep.subr.bf16.mxu1 %v6422_v43 }
 0x6bb   :  { %5034 = vmatpush1.bf16.msra.mxu0 %v6425_v25  ;;  %5066 = vmatpush1.bf16.msra.mxu1 %v6429_v35 }
 0x6bc   :  { %5036 = vmatprep.subr.bf16.mxu0 %v6431_v60  ;;  %5068 = vmatprep.subr.bf16.mxu1 %v6434_v63 }
 0x6bf   :  { %5038 = vmatpush1.bf16.msra.mxu0 %v6437_v33  ;;  %5070 = vmatpush1.bf16.msra.mxu1 %v6441_v46 }
 0x6c0   :  { %5040 = vmatprep.subr.bf16.mxu0 %v6443_v54  ;;  %5072 = vmatprep.subr.bf16.mxu1 %v6446_v10  ;;  %v2440_v10 = vld [vmem:[#allocation7] sm:$0xff] }
 0x6c3   :  { %5042 = vmatpush1.bf16.msra.mxu0 %v6449_v16  ;;  %5074 = vmatpush1.bf16.msra.mxu1 %v6453_v23  ;;  %v2444_v16 = vld [vmem:[#allocation7 + $0x20] sm:$0xff]  ;;  %v2442_v23 = vld [vmem:[#allocation7 + $0x10] sm:$0xff] }
 0x6c4   :  { %5076 = vmatprep.subr.bf16.mxu0 %v5075_v59  ;;  %5108 = vmatprep.subr.bf16.mxu1 %v5107_v11  ;;  %v5077_v29 = vpack.c.bf16 %v2444_v16, %v2440_v10  ;;  %v5109_v38 = vpack.c.bf16 %v2446_v41, %v2442_v23  ;;  %v5117_v59 = vpack.c.bf16 %v2462_v53, %v2458_v3  ;;  %v2464_v11 = vld [vmem:[#allocation7 + $0xc0] sm:$0xff]  ;;  %v2487_v10 = vld [vmem:[#allocation7 + $0x178] sm:$0xff]  ;;  %v2433_v3 = vld [vmem:[#allocation3 + $0x2] sm:$0x3] }
 0x6c5   :  { %v2480_v41 = vld [vmem:[#allocation7 + $0x140] sm:$0xff]  ;;  %v2434_v53 = vld [vmem:[#allocation3 + $0x4] sm:$0x3] }
 0x6c6   :  { %v5097_v44 = vpack.c.bf16 %v2484_v30, %v2480_v41  ;;  %v2828_v41 = vld [vmem:[#allocation9 + $0x40] sm:$0xff] }
 0x6c7   :  { %v2832_v30 = vld [vmem:[#allocation9 + $0x60] sm:$0xff] }
 0x778   :  { %v2057_v37 = vpop.f32.mrb[12].mxu0  ;;  %v2128_v36 = vpop.f32.mrb[20].mxu1 }
 0x779   :  { %v2059_v34 = vpop.f32.mrb[13].mxu0  ;;  %v2130_v47 = vpop.f32.mrb[21].mxu1 }
 0x77a   :  { %v2137_v0 = vcombine.low %v2057_v37, %v2059_v34  ;;  %v2138_v15 = vcombine.low %v2128_v36, %v2130_v47  ;;  %v2468_v37 = vld [vmem:[#allocation7 + $0xe0] sm:$0xff]  ;;  %v5087_v36 = vpack.c.bf16 %v2469_v13, %v2465_v56  ;;  %v5119_v34 = vpack.c.bf16 %v2471_v22, %v2467_v20  ;;  %v2466_v47 = vld [vmem:[#allocation7 + $0xd0] sm:$0xff] }
 0x77b   :  { %v2500_v20 = vld [vmem:[#allocation7 + $0x1e0] sm:$0xff]  ;;  %v2498_v22 = vld [vmem:[#allocation7 + $0x1d0] sm:$0xff] }
 0x77c   :  { %v2145_v19 = vrot.slane %v2137_v0, %v6033_v9  ;;  %v2152_v27 = vrot.slane %v2138_v15, %v6033_v9  ;;  %v2470_v0 = vld [vmem:[#allocation7 + $0xf0] sm:$0xff]  ;;  %v2473_v15 = vld [vmem:[#allocation7 + $0x108] sm:$0xff] }
 0x77e   :  { %v2153_v40 = vcombine.low %v2145_v19, %v2152_v27  ;;  %v2477_v19 = vld [vmem:[#allocation7 + $0x128] sm:$0xff]  ;;  %v2475_v27 = vld [vmem:[#allocation7 + $0x118] sm:$0xff] }
 0x780   :  { %v2155_v2 = vadd.f32 %v2153_v40, %v7132_v61  ;;  %v2479_v40 = vld [vmem:[#allocation7 + $0x138] sm:$0xff]  ;;  %v5089_v61 = vpack.c.bf16 %v2468_v37, %v2464_v11  ;;  %v2432_v11 = vld [vmem:[#allocation3] sm:$0x3] }
 0x781   :  { %v2533_v37 = vcombine.low %v2432_v11, %v2433_v3 }
 0x782   :  { %v4492_v24 = vmul.f32 -1.442695, %v2155_v2  ;;  %v2163_v25 = vrot.slane %v2155_v2, 6  ;;  %v5121_v2 = vpack.c.bf16 %v2470_v0, %v2466_v47 }
 0x783   :  { %v2541_v0 = vrot.slane %v2533_v37, %v6033_v9  ;;  %v2859_v37 = vld [vmem:[#allocation9 + $0x138] sm:$0xff] }
 0x784   :  { %5733 = vpow2.f32 %v4492_v24  ;;  %v2472_v24 = vld [vmem:[#allocation7 + $0x100] sm:$0xff] }
 0x78e   :  { %v5734_v32 = vpop.eup %5733 }
 0x78f   :  { %v2159_v43 = vadd.f32 1.0, %v5734_v32  ;;  %v2476_v32 = vld [vmem:[#allocation7 + $0x120] sm:$0xff] }
 0x790   :  { %v5093_v16 = vpack.c.bf16 %v2476_v32, %v2472_v24  ;;  %v2820_v24 = vld [vmem:[#allocation9] sm:$0xff] }
 0x791   :  { %5735 = vrcp.f32 %v2159_v43  ;;  %v5091_v43 = vpack.c.bf16 %v2477_v19, %v2473_v15  ;;  %v2821_v19 = vld [vmem:[#allocation9 + $0x8] sm:$0xff]  ;;  %v2824_v32 = vld [vmem:[#allocation9 + $0x20] sm:$0xff] }
 0x792   :  { %5737 = vtanh.f32 %v2163_v25  ;;  %v5123_v25 = vpack.c.bf16 %v2479_v40, %v2475_v27  ;;  %v2825_v27 = vld [vmem:[#allocation9 + $0x28] sm:$0xff]  ;;  %v2823_v40 = vld [vmem:[#allocation9 + $0x18] sm:$0xff] }
 0x79b   :  { %v5736_v35 = vpop.eup %5735 }
 0x79c   :  { %v2167_v60 = vrot.slane %v5736_v35, 2  ;;  %v5738_v63 = vpop.eup %5737  ;;  %v2173_v5 = vrot.slane %v5736_v35, 4 }
 0x79d   :  { %v2170_v33 = vmul.f32 %v5738_v63, %v5736_v35  ;;  %v2474_v35 = vld [vmem:[#allocation7 + $0x110] sm:$0xff]  ;;  %v2481_v63 = vld [vmem:[#allocation7 + $0x148] sm:$0xff] }
 0x79e   :  { %v2169_v46 = vmul.f32 %v2167_v60, %v6546_v26  ;;  %v2463_v26 = vld [vmem:[#allocation7 + $0xb8] sm:$0xff]  ;;  %v2478_v60 = vld [vmem:[#allocation7 + $0x130] sm:$0xff] }
 0x79f   :  { %v5115_v18 = vpack.c.bf16 %v2463_v26, %v2459_v21  ;;  %v5125_v23 = vpack.c.bf16 %v2478_v60, %v2474_v35  ;;  %v2494_v21 = vld [vmem:[#allocation7 + $0x1b0] sm:$0xff]  ;;  %v2497_v26 = vld [vmem:[#allocation7 + $0x1c8] sm:$0xff] }
 0x7a0   :  { %v6587_v54 = vadd.f32 %v2170_v33, %v2169_v46  ;;  %v2485_v33 = vld [vmem:[#allocation7 + $0x168] sm:$0xff]  ;;  %v2483_v46 = vld [vmem:[#allocation7 + $0x158] sm:$0xff]  ;;  %v2822_v35 = vld [vmem:[#allocation9 + $0x10] sm:$0xff] }
 0x7a1   :  { %v5095_v28 = vpack.c.bf16 %v2485_v33, %v2481_v63  ;;  %v5127_v42 = vpack.c.bf16 %v2487_v10, %v2483_v46  ;;  %v2826_v60 = vld [vmem:[#allocation9 + $0x30] sm:$0xff]  ;;  %v2829_v33 = vld [vmem:[#allocation9 + $0x48] sm:$0xff]  ;;  %v2831_v10 = vld [vmem:[#allocation9 + $0x58] sm:$0xff] }
 0x7a2   :  { %5739 = vtanh.f32 %v6587_v54  ;;  %v6603_v63 = vpack.c.bf16 %v2826_v60, %v2822_v35  ;;  %v2833_v46 = vld [vmem:[#allocation9 + $0x68] sm:$0xff] }
 0x7ac   :  { %v5740_v12 = vpop.eup %5739 }
 0x7ad   :  { %v2175_v55 = vmul.f32 %v5740_v12, %v2173_v5  ;;  %v2486_v5 = vld [vmem:[#allocation7 + $0x170] sm:$0xff]  ;;  %v2489_v12 = vld [vmem:[#allocation7 + $0x188] sm:$0xff] }
 0x7af   :  { %2177 = vst [vmem:[#allocation3 + $0xc] sm:$0x3] %v2175_v55  ;;  %2309 = vmatmul.mubr.f32.vlgmr.msra.gmra.mrb[14].mxu0 %v2175_v55  ;;  %2380 = vmatmul.mubr.f32.vlgmr.msra.gmra.mrb[22].mxu1 %v2175_v55  ;;  %v5129_v55 = vpack.c.bf16 %v2486_v5, %v2482_v49  ;;  %v2830_v49 = vld [vmem:[#allocation9 + $0x50] sm:$0xff] }
 0x7b0   :  { %5078 = vmatpush1.bf16.msra.mxu0 %v5077_v29  ;;  %5110 = vmatpush1.bf16.msra.mxu1 %v5109_v38  ;;  %v2493_v29 = vld [vmem:[#allocation7 + $0x1a8] sm:$0xff]  ;;  %v2491_v38 = vld [vmem:[#allocation7 + $0x198] sm:$0xff]  ;;  %v2834_v5 = vld [vmem:[#allocation9 + $0x70] sm:$0xff] }
 0x7b1   :  { %5080 = vmatprep.subr.bf16.mxu0 %v5079_v58  ;;  %5112 = vmatprep.subr.bf16.mxu1 %v5111_v6  ;;  %v2488_v58 = vld [vmem:[#allocation7 + $0x180] sm:$0xff]  ;;  %v5099_v8 = vpack.c.bf16 %v2493_v29, %v2489_v12  ;;  %v5131_v57 = vpack.c.bf16 %v2495_v17, %v2491_v38  ;;  %v6615_v12 = vpack.c.bf16 %v2834_v5, %v2830_v49  ;;  %v2837_v29 = vld [vmem:[#allocation9 + $0x88] sm:$0xff]  ;;  %v2839_v17 = vld [vmem:[#allocation9 + $0x98] sm:$0xff] }
 0x7b2   :  { %2633 = vmatprep.mubr.f32.mxu0 %v5912_v1  ;;  %2710 = vmatprep.mubr.f32.mxu1 %v5912_v1  ;;  %v2492_v6 = vld [vmem:[#allocation7 + $0x1a0] sm:$0xff]  ;;  %v2841_v38 = vld [vmem:[#allocation9 + $0xa8] sm:$0xff] }
 0x7b3   :  { %v5101_v51 = vpack.c.bf16 %v2492_v6, %v2488_v58  ;;  %v2836_v58 = vld [vmem:[#allocation9 + $0x80] sm:$0xff]  ;;  %v2873_v49 = vld [vmem:[#allocation9 + $0x1a8] sm:$0xff] }
 0x7b4   :  { %5082 = vmatpush1.bf16.msra.mxu0 %v5081_v31  ;;  %5114 = vmatpush1.bf16.msra.mxu1 %v5113_v39  ;;  %v2501_v31 = vld [vmem:[#allocation7 + $0x1e8] sm:$0xff]  ;;  %v2499_v39 = vld [vmem:[#allocation7 + $0x1d8] sm:$0xff]  ;;  %v2840_v6 = vld [vmem:[#allocation9 + $0xa0] sm:$0xff] }
 0x7b5   :  { %5084 = vmatprep.subr.bf16.mxu0 %v5083_v7  ;;  %5116 = vmatprep.subr.bf16.mxu1 %v5115_v18  ;;  %v5133_v7 = vpack.c.bf16 %v2494_v21, %v2490_v14  ;;  %v2496_v18 = vld [vmem:[#allocation7 + $0x1c0] sm:$0xff]  ;;  %v5103_v56 = vpack.c.bf16 %v2501_v31, %v2497_v26  ;;  %v5135_v13 = vpack.c.bf16 %v2503_v48, %v2499_v39  ;;  %v2842_v14 = vld [vmem:[#allocation9 + $0xb0] sm:$0xff]  ;;  %v2845_v26 = vld [vmem:[#allocation9 + $0xc8] sm:$0xff] }
 0x7b6   :  { %v2849_v31 = vld [vmem:[#allocation9 + $0xe8] sm:$0xff]  ;;  %v2847_v39 = vld [vmem:[#allocation9 + $0xd8] sm:$0xff] }
 0x7b7   :  { %v6632_v48 = vpack.c.bf16 %v2849_v31, %v2845_v26 }
 0x7b8   :  { %5086 = vmatpush1.bf16.msra.mxu0 %v5085_v45  ;;  %5118 = vmatpush1.bf16.msra.mxu1 %v5117_v59  ;;  %v2502_v45 = vld [vmem:[#allocation7 + $0x1f0] sm:$0xff]  ;;  %v2534_v59 = vcombine.low %v2434_v53, %v2435_v62 }
 0x7b9   :  { %5088 = vmatprep.subr.bf16.mxu0 %v5087_v36  ;;  %5120 = vmatprep.subr.bf16.mxu1 %v5119_v34  ;;  %v5105_v36 = vpack.c.bf16 %v2500_v20, %v2496_v18  ;;  %v5137_v34 = vpack.c.bf16 %v2502_v45, %v2498_v22  ;;  %v2848_v18 = vld [vmem:[#allocation9 + $0xe0] sm:$0xff]  ;;  %v2853_v22 = vld [vmem:[#allocation9 + $0x108] sm:$0xff] }
 0x7ba   :  { %v2548_v47 = vrot.slane %v2534_v59, %v6033_v9  ;;  %v2857_v45 = vld [vmem:[#allocation9 + $0x128] sm:$0xff]  ;;  %v2855_v59 = vld [vmem:[#allocation9 + $0x118] sm:$0xff] }
 0x7bb   :  { %v6643_v11 = vpack.c.bf16 %v2857_v45, %v2853_v22  ;;  %v2880_v22 = vld [vmem:[#allocation9 + $0x1e0] sm:$0xff] }
 0x7bc   :  { %5090 = vmatpush1.bf16.msra.mxu0 %v5089_v61  ;;  %5122 = vmatpush1.bf16.msra.mxu1 %v5121_v2  ;;  %v2549_v15 = vcombine.low %v2541_v0, %v2548_v47  ;;  %v6596_v61 = vpack.c.bf16 %v2825_v27, %v2821_v19  ;;  %v2827_v2 = vld [vmem:[#allocation9 + $0x38] sm:$0xff]  ;;  %v6646_v47 = vpack.c.bf16 %v2859_v37, %v2855_v59  ;;  %v2858_v19 = vld [vmem:[#allocation9 + $0x130] sm:$0xff]  ;;  %v2861_v27 = vld [vmem:[#allocation9 + $0x148] sm:$0xff] }
 0x7bd   :  { %5092 = vmatprep.subr.bf16.mxu0 %v5091_v43  ;;  %5124 = vmatprep.subr.bf16.mxu1 %v5123_v25  ;;  %v6598_v43 = vpack.c.bf16 %v2827_v2, %v2823_v40  ;;  %v6600_v25 = vpack.c.bf16 %v2824_v32, %v2820_v24  ;;  %v2865_v2 = vld [vmem:[#allocation9 + $0x168] sm:$0xff]  ;;  %v2863_v24 = vld [vmem:[#allocation9 + $0x158] sm:$0xff]  ;;  %v2878_v37 = vld [vmem:[#allocation9 + $0x1d0] sm:$0xff] }
 0x7be   :  { %v2867_v32 = vld [vmem:[#allocation9 + $0x178] sm:$0xff]  ;;  %v6654_v35 = vpack.c.bf16 %v2865_v2, %v2861_v27 }
 0x7bf   :  { %v6656_v60 = vpack.c.bf16 %v2867_v32, %v2863_v24 }
 0x7c0   :  { %5094 = vmatpush1.bf16.msra.mxu0 %v5093_v16  ;;  %5126 = vmatpush1.bf16.msra.mxu1 %v5125_v23  ;;  %v6608_v16 = vpack.c.bf16 %v2833_v46, %v2829_v33  ;;  %v2835_v23 = vld [vmem:[#allocation9 + $0x78] sm:$0xff]  ;;  %v2860_v33 = vld [vmem:[#allocation9 + $0x140] sm:$0xff] }
 0x7c1   :  { %5096 = vmatprep.subr.bf16.mxu0 %v5095_v28  ;;  %5128 = vmatprep.subr.bf16.mxu1 %v5127_v42  ;;  %v6610_v28 = vpack.c.bf16 %v2835_v23, %v2831_v10  ;;  %v6612_v42 = vpack.c.bf16 %v2832_v30, %v2828_v41  ;;  %v2864_v46 = vld [vmem:[#allocation9 + $0x160] sm:$0xff]  ;;  %v2862_v10 = vld [vmem:[#allocation9 + $0x150] sm:$0xff]  ;;  %v2869_v30 = vld [vmem:[#allocation9 + $0x188] sm:$0xff] }
 0x7c2   :  { %v6659_v23 = vpack.c.bf16 %v2864_v46, %v2860_v33  ;;  %v2866_v41 = vld [vmem:[#allocation9 + $0x170] sm:$0xff] }
 0x7c3   :  { %v6663_v5 = vpack.c.bf16 %v2866_v41, %v2862_v10  ;;  %v7133_v41 = vcombine.high %v6259_v50, %v6265_v52  ;;  %v7136_v50 = vsub.s32 1, %v6021_v4 }
 0x7c4   :  { %5098 = vmatpush1.bf16.msra.mxu0 %v5097_v44  ;;  %5130 = vmatpush1.bf16.msra.mxu1 %v5129_v55  ;;  %v6620_v44 = vpack.c.bf16 %v2841_v38, %v2837_v29  ;;  %v2843_v55 = vld [vmem:[#allocation9 + $0xb8] sm:$0xff]  ;;  %v6665_v29 = vpack.c.bf16 %v2873_v49, %v2869_v30 }
 0x7c5   :  { %5100 = vmatprep.subr.bf16.mxu0 %v5099_v8  ;;  %5132 = vmatprep.subr.bf16.mxu1 %v5131_v57  ;;  %v6622_v62 = vpack.c.bf16 %v2843_v55, %v2839_v17  ;;  %v6624_v8 = vpack.c.bf16 %v2840_v6, %v2836_v58  ;;  %v2838_v57 = vld [vmem:[#allocation9 + $0x90] sm:$0xff]  ;;  %v2871_v38 = vld [vmem:[#allocation9 + $0x198] sm:$0xff]  ;;  %v2868_v55 = vld [vmem:[#allocation9 + $0x180] sm:$0xff] }
 0x7c6   :  { %v6627_v21 = vpack.c.bf16 %v2842_v14, %v2838_v57  ;;  %v2875_v17 = vld [vmem:[#allocation9 + $0x1b8] sm:$0xff]  ;;  %v2872_v6 = vld [vmem:[#allocation9 + $0x1a0] sm:$0xff]  ;;  %v2870_v57 = vld [vmem:[#allocation9 + $0x190] sm:$0xff] }
 0x7c7   :  { %v6668_v58 = vpack.c.bf16 %v2875_v17, %v2871_v38  ;;  %v2874_v14 = vld [vmem:[#allocation9 + $0x1b0] sm:$0xff]  ;;  %v6671_v26 = vpack.c.bf16 %v2872_v6, %v2868_v55 }
 0x7c8   :  { %5102 = vmatpush1.bf16.msra.mxu0 %v5101_v51  ;;  %5134 = vmatpush1.bf16.msra.mxu1 %v5133_v7  ;;  %v2851_v51 = vld [vmem:[#allocation9 + $0xf8] sm:$0xff]  ;;  %v2844_v7 = vld [vmem:[#allocation9 + $0xc0] sm:$0xff]  ;;  %v6675_v31 = vpack.c.bf16 %v2874_v14, %v2870_v57  ;;  %v2431_v6 = vld [vmem:[%s7123_s6] sm:$0xf]  ;;  %v7134_v57 = vsub.s32 0, %v6021_v4 }
 0x7c9   :  { %5104 = vmatprep.subr.bf16.mxu0 %v5103_v56  ;;  %5136 = vmatprep.subr.bf16.mxu1 %v5135_v13  ;;  %v6634_v3 = vpack.c.bf16 %v2851_v51, %v2847_v39  ;;  %v6636_v53 = vpack.c.bf16 %v2848_v18, %v2844_v7  ;;  %v2846_v56 = vld [vmem:[#allocation9 + $0xd0] sm:$0xff]  ;;  %v2877_v39 = vld [vmem:[#allocation9 + $0x1c8] sm:$0xff]  ;;  %v2879_v7 = vld [vmem:[#allocation9 + $0x1d8] sm:$0xff]  ;;  %v6712_v52 = vrot.slane %v2431_v6, %v7136_v50 }
 0x7ca   :  { %v2850_v13 = vld [vmem:[#allocation9 + $0xf0] sm:$0xff]  ;;  %v2881_v51 = vld [vmem:[#allocation9 + $0x1e8] sm:$0xff]  ;;  %v6704_v14 = vrot.slane %v2431_v6, %v7134_v57 }
 0x7cb   :  { %v6639_v20 = vpack.c.bf16 %v2850_v13, %v2846_v56  ;;  %v6680_v18 = vpack.c.bf16 %v2881_v51, %v2877_v39  ;;  %v2883_v56 = vld [vmem:[#allocation9 + $0x1f8] sm:$0xff]  ;;  %v2876_v13 = vld [vmem:[#allocation9 + $0x1c0] sm:$0xff]  ;;  %v7135_v39 = vsub.s32 2, %v6021_v4 }
 0x7cc   :  { %5106 = vmatpush1.bf16.msra.mxu0 %v5105_v36  ;;  %5138 = vmatpush1.bf16.msra.mxu1 %v5137_v34  ;;  %v2852_v36 = vld [vmem:[#allocation9 + $0x100] sm:$0xff]  ;;  %v6682_v45 = vpack.c.bf16 %v2883_v56, %v2879_v7  ;;  %v6684_v59 = vpack.c.bf16 %v2880_v22, %v2876_v13  ;;  %v7137_v7 = vsub.s32 3, %v6021_v4 }
 0x7cd   :  { %5140 = vmatprep.subr.bf16.mxu0 %v6596_v61  ;;  %5172 = vmatprep.subr.bf16.mxu1 %v6598_v43  ;;  %v2856_v34 = vld [vmem:[#allocation9 + $0x120] sm:$0xff]  ;;  %v6708_v51 = vrot.slane %v2431_v6, %v7135_v39 }
 0x7ce   :  { %v6648_v0 = vpack.c.bf16 %v2856_v34, %v2852_v36  ;;  %v2882_v36 = vld [vmem:[#allocation9 + $0x1f0] sm:$0xff]  ;;  %v6716_v56 = vrot.slane %v2431_v6, %v7137_v7 }
 0x7cf   :  { %2634 = vmatmul.mubr.f32.vlgmr.msra.gmra.mrb[16].mxu0 %v2549_v15  ;;  %2711 = vmatmul.mubr.f32.vlgmr.msra.gmra.mrb[24].mxu1 %v2549_v15  ;;  %v2854_v15 = vld [vmem:[#allocation9 + $0x110] sm:$0xff]  ;;  %v6687_v34 = vpack.c.bf16 %v2882_v36, %v2878_v37 }
 0x7d0   :  { %2639 = vmatprep.mubr.f32.mxu0 %v5912_v1  ;;  %2716 = vmatprep.mubr.f32.mxu1 %v5912_v1  ;;  %v6651_v40 = vpack.c.bf16 %v2858_v19, %v2854_v15 }
 0x7d1   :  { %5142 = vmatpush1.bf16.msra.mxu0 %v6600_v25  ;;  %5174 = vmatpush1.bf16.msra.mxu1 %v6603_v63 }
 0x7d2   :  { %5144 = vmatprep.subr.bf16.mxu0 %v6608_v16  ;;  %5176 = vmatprep.subr.bf16.mxu1 %v6610_v28 }
 0x7d5   :  { %5146 = vmatpush1.bf16.msra.mxu0 %v6612_v42  ;;  %5178 = vmatpush1.bf16.msra.mxu1 %v6615_v12 }
 0x7d6   :  { %5148 = vmatprep.subr.bf16.mxu0 %v6620_v44  ;;  %5180 = vmatprep.subr.bf16.mxu1 %v6622_v62 }
 0x7d9   :  { %5150 = vmatpush1.bf16.msra.mxu0 %v6624_v8  ;;  %5182 = vmatpush1.bf16.msra.mxu1 %v6627_v21 }
 0x7da   :  { %5152 = vmatprep.subr.bf16.mxu0 %v6632_v48  ;;  %5184 = vmatprep.subr.bf16.mxu1 %v6634_v3 }
 0x7dd   :  { %5154 = vmatpush1.bf16.msra.mxu0 %v6636_v53  ;;  %5186 = vmatpush1.bf16.msra.mxu1 %v6639_v20 }
 0x7de   :  { %5156 = vmatprep.subr.bf16.mxu0 %v6643_v11  ;;  %5188 = vmatprep.subr.bf16.mxu1 %v6646_v47 }
 0x7e1   :  { %5158 = vmatpush1.bf16.msra.mxu0 %v6648_v0  ;;  %5190 = vmatpush1.bf16.msra.mxu1 %v6651_v40 }
 0x7e2   :  { %5160 = vmatprep.subr.bf16.mxu0 %v6654_v35  ;;  %5192 = vmatprep.subr.bf16.mxu1 %v6656_v60 }
 0x7e5   :  { %5162 = vmatpush1.bf16.msra.mxu0 %v6659_v23  ;;  %5194 = vmatpush1.bf16.msra.mxu1 %v6663_v5 }
 0x7e6   :  { %5164 = vmatprep.subr.bf16.mxu0 %v6665_v29  ;;  %5196 = vmatprep.subr.bf16.mxu1 %v6668_v58 }
 0x7e9   :  { %5166 = vmatpush1.bf16.msra.mxu0 %v6671_v26  ;;  %5198 = vmatpush1.bf16.msra.mxu1 %v6675_v31 }
 0x7ea   :  { %5168 = vmatprep.subr.bf16.mxu0 %v6680_v18  ;;  %5200 = vmatprep.subr.bf16.mxu1 %v6682_v45 }
 0x7ed   :  { %5170 = vmatpush1.bf16.msra.mxu0 %v6684_v59  ;;  %5202 = vmatpush1.bf16.msra.mxu1 %v6687_v34 }
 0x7ee   :  { %5204 = vmatprep.subr.bf16.mxu0 %v6596_v61  ;;  %5236 = vmatprep.subr.bf16.mxu1 %v6598_v43 }
 0x882   :  { %v2310_v15 = vpop.f32.mrb[14].mxu0  ;;  %v2381_v19 = vpop.f32.mrb[22].mxu1 }
 0x883   :  { %v2312_v27 = vpop.f32.mrb[15].mxu0  ;;  %v2383_v2 = vpop.f32.mrb[23].mxu1 }
 0x884   :  { %v2390_v24 = vcombine.low %v2310_v15, %v2312_v27  ;;  %v2391_v32 = vcombine.low %v2381_v19, %v2383_v2 }
 0x886   :  { %v2398_v33 = vrot.slane %v2390_v24, %v6033_v9  ;;  %v2405_v46 = vrot.slane %v2391_v32, %v6033_v9 }
 0x888   :  { %v2406_v10 = vcombine.low %v2398_v33, %v2405_v46 }
 0x88a   :  { %v2408_v30 = vadd.f32 %v2406_v10, %v7133_v41 }
 0x88c   :  { %v4493_v49 = vmul.f32 -1.442695, %v2408_v30  ;;  %v2416_v55 = vrot.slane %v2408_v30, 6 }
 0x88e   :  { %5741 = vpow2.f32 %v4493_v49 }
 0x898   :  { %v5742_v38 = vpop.eup %5741 }
 0x899   :  { %v2412_v17 = vadd.f32 1.0, %v5742_v38 }
 0x89b   :  { %5743 = vrcp.f32 %v2412_v17 }
 0x89c   :  { %5745 = vtanh.f32 %v2416_v55 }
 0x8a2   :  { %v2635_v13 = vpop.f32.mrb[16].mxu0  ;;  %v2712_v22 = vpop.f32.mrb[24].mxu1 }
 0x8a3   :  { %v2636_v37 = vadd.f32 %v2635_v13, %v6704_v14  ;;  %v2713_v36 = vadd.f32 %v2712_v22, %v6708_v51  ;;  %v2637_v15 = vpop.f32.mrb[17].mxu0  ;;  %v2714_v19 = vpop.f32.mrb[25].mxu1 }
 0x8a4   :  { %v2638_v27 = vadd.f32 %v2637_v15, %v6712_v52  ;;  %v2715_v2 = vadd.f32 %v2714_v19, %v6716_v56  ;;  %v2436_v15 = vld [vmem:[#allocation3 + $0x8] sm:$0x3] }
 0x8a5   :  { %v5744_v24 = vpop.eup %5743 }
 0x8a6   :  { %v2420_v32 = vrot.slane %v5744_v24, 2  ;;  %v2731_v33 = vcombine.low %v2636_v37, %v2638_v27  ;;  %v5746_v46 = vpop.eup %5745  ;;  %v2732_v10 = vcombine.high %v2636_v37, %v2638_v27  ;;  %v2733_v4 = vcombine.low %v2713_v36, %v2715_v2  ;;  %v2438_v27 = vld [vmem:[#allocation3 + $0xc] sm:$0x3] }
 0x8a7   :  { %v2734_v41 = vcombine.high %v2713_v36, %v2715_v2  ;;  %v2423_v49 = vmul.f32 %v5746_v46, %v5744_v24  ;;  %v2426_v13 = vrot.slane %v5744_v24, 4  ;;  %v2437_v36 = vld [vmem:[#allocation3 + $0xa] sm:$0x3] }
 0x8a8   :  { %v2422_v30 = vmul.f32 %v2420_v32, %v6587_v54  ;;  %v6724_v38 = vrot.slane %v2731_v33, %v6033_v9  ;;  %v6727_v17 = vrot.slane %v2732_v10, %v6033_v9  ;;  %v6730_v55 = vrot.slane %v2733_v4, %v6033_v9 }
 0x8a9   :  { %v6733_v6 = vrot.slane %v2734_v41, %v6033_v9  ;;  %v2550_v19 = vcombine.low %v2436_v15, %v2437_v36 }
 0x8aa   :  { %v2424_v57 = vadd.f32 %v2423_v49, %v2422_v30  ;;  %v2763_v39 = vcombine.low %v6724_v38, %v6730_v55  ;;  %v2764_v54 = vcombine.high %v6724_v38, %v6730_v55 }
 0x8ab   :  { %v2765_v50 = vcombine.low %v6727_v17, %v6733_v6  ;;  %v2766_v7 = vcombine.high %v6727_v17, %v6733_v6  ;;  %v2558_v33 = vrot.slane %v2550_v19, %v6033_v9 }
 0x8ac   :  { %5747 = vtanh.f32 %v2424_v57 }
 0x8b6   :  { %v5748_v22 = vpop.eup %5747 }
 0x8b7   :  { %v2428_v37 = vmul.f32 %v5748_v22, %v2426_v13 }
 0x8b9   :  { %2430 = vst [vmem:[#allocation3 + $0xe] sm:$0x3] %v2428_v37 }
 0x8c0   :  { %v2439_v2 = vld [vmem:[#allocation3 + $0xe] sm:$0x3] }
 0x8c1   :  { %v2551_v32 = vcombine.low %v2438_v27, %v2439_v2 }
 0x8c3   :  { %v2565_v46 = vrot.slane %v2551_v32, %v6033_v9 }
 0x8c5   :  { %v2566_v10 = vcombine.low %v2558_v33, %v2565_v46 }
 0x8c7   :  { %2640 = vmatmul.mubr.f32.gmra.mrb[18].mxu0 %v2566_v10  ;;  %2717 = vmatmul.mubr.f32.gmra.mrb[26].mxu1 %v2566_v10 }
 0x8c8   :  { %2948 = vmatprep.mubr.f32.mxu0 %v5912_v1  ;;  %3019 = vmatprep.mubr.f32.mxu1 %v5912_v1 }
 0x8cb   :  { %2949 = vmatmul.mubr.f32.vlgmr.msra.gmra.mrb[20].mxu0 %v5912_v1  ;;  %3020 = vmatmul.mubr.f32.vlgmr.msra.gmra.mrb[28].mxu1 %v5912_v1 }
 0x8cc   :  { %5206 = vmatpush1.bf16.msra.mxu0 %v6600_v25  ;;  %5238 = vmatpush1.bf16.msra.mxu1 %v6603_v63 }
 0x8cd   :  { %5208 = vmatprep.subr.bf16.mxu0 %v6608_v16  ;;  %5240 = vmatprep.subr.bf16.mxu1 %v6610_v28 }
 0x8ce   :  { %3134 = vmatprep.mubr.f32.mxu0 %v5912_v1  ;;  %3205 = vmatprep.mubr.f32.mxu1 %v5912_v1 }
 0x8d0   :  { %5210 = vmatpush1.bf16.msra.mxu0 %v6612_v42  ;;  %5242 = vmatpush1.bf16.msra.mxu1 %v6615_v12 }
 0x8d1   :  { %5212 = vmatprep.subr.bf16.mxu0 %v6620_v44  ;;  %5244 = vmatprep.subr.bf16.mxu1 %v6622_v62 }
 0x8d4   :  { %5214 = vmatpush1.bf16.msra.mxu0 %v6624_v8  ;;  %5246 = vmatpush1.bf16.msra.mxu1 %v6627_v21 }
 0x8d5   :  { %5216 = vmatprep.subr.bf16.mxu0 %v6632_v48  ;;  %5248 = vmatprep.subr.bf16.mxu1 %v6634_v3 }
 0x8d8   :  { %5218 = vmatpush1.bf16.msra.mxu0 %v6636_v53  ;;  %5250 = vmatpush1.bf16.msra.mxu1 %v6639_v20 }
 0x8d9   :  { %5220 = vmatprep.subr.bf16.mxu0 %v6643_v11  ;;  %5252 = vmatprep.subr.bf16.mxu1 %v6646_v47 }
 0x8dc   :  { %5222 = vmatpush1.bf16.msra.mxu0 %v6648_v0  ;;  %5254 = vmatpush1.bf16.msra.mxu1 %v6651_v40 }
 0x8dd   :  { %5224 = vmatprep.subr.bf16.mxu0 %v6654_v35  ;;  %5256 = vmatprep.subr.bf16.mxu1 %v6656_v60 }
 0x8e0   :  { %5226 = vmatpush1.bf16.msra.mxu0 %v6659_v23  ;;  %5258 = vmatpush1.bf16.msra.mxu1 %v6663_v5 }
 0x8e1   :  { %5228 = vmatprep.subr.bf16.mxu0 %v6665_v29  ;;  %5260 = vmatprep.subr.bf16.mxu1 %v6668_v58 }
 0x8e4   :  { %5230 = vmatpush1.bf16.msra.mxu0 %v6671_v26  ;;  %5262 = vmatpush1.bf16.msra.mxu1 %v6675_v31 }
 0x8e5   :  { %5232 = vmatprep.subr.bf16.mxu0 %v6680_v18  ;;  %5264 = vmatprep.subr.bf16.mxu1 %v6682_v45 }
 0x8e8   :  { %5234 = vmatpush1.bf16.msra.mxu0 %v6684_v59  ;;  %5266 = vmatpush1.bf16.msra.mxu1 %v6687_v34 }
 0x8e9   :  { %5268 = vmatprep.subr.bf16.mxu0 %v6596_v61  ;;  %5300 = vmatprep.subr.bf16.mxu1 %v6598_v43 }
 0x99a   :  { %v2641_v24 = vpop.f32.mrb[18].mxu0  ;;  %v2718_v4 = vpop.f32.mrb[26].mxu1 }
 0x99b   :  { %v2642_v41 = vadd.f32 %v2641_v24, %v6704_v14  ;;  %v2719_v30 = vadd.f32 %v2718_v4, %v6708_v51  ;;  %v2643_v49 = vpop.f32.mrb[19].mxu0  ;;  %v2720_v57 = vpop.f32.mrb[27].mxu1 }
 0x99c   :  { %v2644_v13 = vadd.f32 %v2643_v49, %v6712_v52  ;;  %v2721_v22 = vadd.f32 %v2720_v57, %v6716_v56 }
 0x99e   :  { %v2767_v37 = vcombine.low %v2642_v41, %v2644_v13  ;;  %v2768_v36 = vcombine.high %v2642_v41, %v2644_v13  ;;  %v2769_v15 = vcombine.low %v2719_v30, %v2721_v22  ;;  %v2770_v19 = vcombine.high %v2719_v30, %v2721_v22  ;;  %v2950_v27 = vpop.f32.mrb[20].mxu0  ;;  %v3021_v2 = vpop.f32.mrb[28].mxu1 }
 0x99f   :  { %v2952_v32 = vpop.f32.mrb[21].mxu0  ;;  %v3023_v33 = vpop.f32.mrb[29].mxu1 }
 0x9a0   :  { %v6788_v46 = vrot.slane %v2767_v37, %v6033_v9  ;;  %v6791_v14 = vrot.slane %v2768_v36, %v6033_v9  ;;  %v6794_v51 = vrot.slane %v2769_v15, %v6033_v9  ;;  %v6797_v52 = vrot.slane %v2770_v19, %v6033_v9 }
 0x9a1   :  { %v3030_v56 = vcombine.low %v2950_v27, %v2952_v32  ;;  %v3031_v10 = vcombine.low %v3021_v2, %v3023_v33 }
 0x9a2   :  { %v2799_v24 = vcombine.low %v6788_v46, %v6794_v51  ;;  %v2800_v4 = vcombine.high %v6788_v46, %v6794_v51  ;;  %v4375_v51 = vld [vmem:[%s7124_s7 + $0x20] sm:$0xff] }
 0x9a3   :  { %v3038_v49 = vrot.slane %v3030_v56, %v6033_v9  ;;  %v3045_v57 = vrot.slane %v3031_v10, %v6033_v9 }
 0x9a5   :  { %v3046_v13 = vcombine.low %v3038_v49, %v3045_v57 }
 0x9a7   :  { %v3048_v22 = vadd.f32 %v3046_v13, %v2763_v39 }
 0x9a9   :  { %v4494_v37 = vmul.f32 -1.442695, %v3048_v22  ;;  %v3056_v19 = vrot.slane %v3048_v22, 6 }
 0x9ab   :  { %5749 = vpow2.f32 %v4494_v37 }
 0x9b5   :  { %v5750_v36 = vpop.eup %5749 }
 0x9b6   :  { %v3052_v15 = vadd.f32 1.0, %v5750_v36 }
 0x9b8   :  { %5751 = vrcp.f32 %v3052_v15 }
 0x9b9   :  { %5753 = vtanh.f32 %v3056_v19 }
 0x9c2   :  { %v5752_v27 = vpop.eup %5751 }
 0x9c3   :  { %v3060_v2 = vrot.slane %v5752_v27, 2  ;;  %v5754_v32 = vpop.eup %5753  ;;  %v3066_v10 = vrot.slane %v5752_v27, 4 }
 0x9c4   :  { %v3063_v33 = vmul.f32 %v5754_v32, %v5752_v27 }
 0x9c5   :  { %v3062_v30 = vmul.f32 0.0, %v3060_v2 }
 0x9c7   :  { %v3064_v56 = vadd.f32 %v3063_v33, %v3062_v30 }
 0x9c9   :  { %5755 = vtanh.f32 %v3064_v56 }
 0x9d3   :  { %v5756_v49 = vpop.eup %5755 }
 0x9d4   :  { %v3068_v57 = vmul.f32 %v5756_v49, %v3066_v10 }
 0x9d6   :  { %3135 = vmatmul.mubr.f32.vlgmr.msra.gmra.mrb[22].mxu0 %v3068_v57  ;;  %3206 = vmatmul.mubr.f32.vlgmr.msra.gmra.mrb[30].mxu1 %v3068_v57 }
 0x9d7   :  { %5270 = vmatpush1.bf16.msra.mxu0 %v6600_v25  ;;  %5302 = vmatpush1.bf16.msra.mxu1 %v6603_v63 }
 0x9d8   :  { %5272 = vmatprep.subr.bf16.mxu0 %v6608_v16  ;;  %5304 = vmatprep.subr.bf16.mxu1 %v6610_v28 }
 0x9d9   :  { %3320 = vmatprep.mubr.f32.mxu0 %v5912_v1  ;;  %3391 = vmatprep.mubr.f32.mxu1 %v5912_v1 }
 0x9db   :  { %5274 = vmatpush1.bf16.msra.mxu0 %v6612_v42  ;;  %5306 = vmatpush1.bf16.msra.mxu1 %v6615_v12 }
 0x9dc   :  { %5276 = vmatprep.subr.bf16.mxu0 %v6620_v44  ;;  %5308 = vmatprep.subr.bf16.mxu1 %v6622_v62 }
 0x9df   :  { %5278 = vmatpush1.bf16.msra.mxu0 %v6624_v8  ;;  %5310 = vmatpush1.bf16.msra.mxu1 %v6627_v21 }
 0x9e0   :  { %5280 = vmatprep.subr.bf16.mxu0 %v6632_v48  ;;  %5312 = vmatprep.subr.bf16.mxu1 %v6634_v3 }
 0x9e3   :  { %5282 = vmatpush1.bf16.msra.mxu0 %v6636_v53  ;;  %5314 = vmatpush1.bf16.msra.mxu1 %v6639_v20 }
 0x9e4   :  { %5284 = vmatprep.subr.bf16.mxu0 %v6643_v11  ;;  %5316 = vmatprep.subr.bf16.mxu1 %v6646_v47 }
 0x9e7   :  { %5286 = vmatpush1.bf16.msra.mxu0 %v6648_v0  ;;  %5318 = vmatpush1.bf16.msra.mxu1 %v6651_v40 }
 0x9e8   :  { %5288 = vmatprep.subr.bf16.mxu0 %v6654_v35  ;;  %5320 = vmatprep.subr.bf16.mxu1 %v6656_v60 }
 0x9eb   :  { %5290 = vmatpush1.bf16.msra.mxu0 %v6659_v23  ;;  %5322 = vmatpush1.bf16.msra.mxu1 %v6663_v5 }
 0x9ec   :  { %5292 = vmatprep.subr.bf16.mxu0 %v6665_v29  ;;  %5324 = vmatprep.subr.bf16.mxu1 %v6668_v58 }
 0x9ef   :  { %5294 = vmatpush1.bf16.msra.mxu0 %v6671_v26  ;;  %5326 = vmatpush1.bf16.msra.mxu1 %v6675_v31 }
 0x9f0   :  { %5296 = vmatprep.subr.bf16.mxu0 %v6680_v18  ;;  %5328 = vmatprep.subr.bf16.mxu1 %v6682_v45 }
 0x9f3   :  { %5298 = vmatpush1.bf16.msra.mxu0 %v6684_v59  ;;  %5330 = vmatpush1.bf16.msra.mxu1 %v6687_v34 }
 0x9f4   :  { %5332 = vmatprep.subr.bf16.mxu0 %v6596_v61  ;;  %5364 = vmatprep.subr.bf16.mxu1 %v6598_v43 }
 0xaa9   :  { %v3136_v39 = vpop.f32.mrb[22].mxu0  ;;  %v3207_v30 = vpop.f32.mrb[30].mxu1 }
 0xaaa   :  { %v3138_v13 = vpop.f32.mrb[23].mxu0  ;;  %v3209_v22 = vpop.f32.mrb[31].mxu1 }
 0xaab   :  { %v3216_v37 = vcombine.low %v3136_v39, %v3138_v13  ;;  %v3217_v36 = vcombine.low %v3207_v30, %v3209_v22 }
 0xaad   :  { %v3224_v15 = vrot.slane %v3216_v37, %v6033_v9  ;;  %v3231_v19 = vrot.slane %v3217_v36, %v6033_v9 }
 0xaaf   :  { %v3232_v27 = vcombine.low %v3224_v15, %v3231_v19 }
 0xab1   :  { %v3234_v2 = vadd.f32 %v3232_v27, %v2764_v54 }
 0xab3   :  { %v4495_v32 = vmul.f32 -1.442695, %v3234_v2  ;;  %v3242_v49 = vrot.slane %v3234_v2, 6 }
 0xab5   :  { %5757 = vpow2.f32 %v4495_v32 }
 0xabf   :  { %v5758_v33 = vpop.eup %5757 }
 0xac0   :  { %v3238_v10 = vadd.f32 1.0, %v5758_v33 }
 0xac2   :  { %5759 = vrcp.f32 %v3238_v10 }
 0xac3   :  { %5761 = vtanh.f32 %v3242_v49 }
 0xacc   :  { %v5760_v57 = vpop.eup %5759 }
 0xacd   :  { %v3246_v41 = vrot.slane %v5760_v57, 2  ;;  %v5762_v39 = vpop.eup %5761  ;;  %v3252_v37 = vrot.slane %v5760_v57, 4 }
 0xace   :  { %v3249_v30 = vmul.f32 %v5762_v39, %v5760_v57 }
 0xacf   :  { %v3248_v13 = vmul.f32 %v3246_v41, %v3064_v56 }
 0xad1   :  { %v3250_v22 = vadd.f32 %v3249_v30, %v3248_v13 }
 0xad3   :  { %5763 = vtanh.f32 %v3250_v22 }
 0xadd   :  { %v5764_v36 = vpop.eup %5763 }
 0xade   :  { %v3254_v15 = vmul.f32 %v5764_v36, %v3252_v37 }
 0xae0   :  { %3321 = vmatmul.mubr.f32.vlgmr.msra.gmra.mrb[24].mxu0 %v3254_v15  ;;  %3392 = vmatmul.mubr.f32.vlgmr.msra.gmra.mrb[32].mxu1 %v3254_v15 }
 0xae1   :  { %5334 = vmatpush1.bf16.msra.mxu0 %v6600_v25  ;;  %5366 = vmatpush1.bf16.msra.mxu1 %v6603_v63 }
 0xae2   :  { %5336 = vmatprep.subr.bf16.mxu0 %v6608_v16  ;;  %5368 = vmatprep.subr.bf16.mxu1 %v6610_v28 }
 0xae3   :  { %3506 = vmatprep.mubr.f32.mxu0 %v5912_v1  ;;  %3577 = vmatprep.mubr.f32.mxu1 %v5912_v1 }
 0xae5   :  { %5338 = vmatpush1.bf16.msra.mxu0 %v6612_v42  ;;  %5370 = vmatpush1.bf16.msra.mxu1 %v6615_v12 }
 0xae6   :  { %5340 = vmatprep.subr.bf16.mxu0 %v6620_v44  ;;  %5372 = vmatprep.subr.bf16.mxu1 %v6622_v62 }
 0xae9   :  { %5342 = vmatpush1.bf16.msra.mxu0 %v6624_v8  ;;  %5374 = vmatpush1.bf16.msra.mxu1 %v6627_v21 }
 0xaea   :  { %5344 = vmatprep.subr.bf16.mxu0 %v6632_v48  ;;  %5376 = vmatprep.subr.bf16.mxu1 %v6634_v3 }
 0xaed   :  { %5346 = vmatpush1.bf16.msra.mxu0 %v6636_v53  ;;  %5378 = vmatpush1.bf16.msra.mxu1 %v6639_v20 }
 0xaee   :  { %5348 = vmatprep.subr.bf16.mxu0 %v6643_v11  ;;  %5380 = vmatprep.subr.bf16.mxu1 %v6646_v47 }
 0xaf1   :  { %5350 = vmatpush1.bf16.msra.mxu0 %v6648_v0  ;;  %5382 = vmatpush1.bf16.msra.mxu1 %v6651_v40 }
 0xaf2   :  { %5352 = vmatprep.subr.bf16.mxu0 %v6654_v35  ;;  %5384 = vmatprep.subr.bf16.mxu1 %v6656_v60 }
 0xaf5   :  { %5354 = vmatpush1.bf16.msra.mxu0 %v6659_v23  ;;  %5386 = vmatpush1.bf16.msra.mxu1 %v6663_v5 }
 0xaf6   :  { %5356 = vmatprep.subr.bf16.mxu0 %v6665_v29  ;;  %5388 = vmatprep.subr.bf16.mxu1 %v6668_v58 }
 0xaf9   :  { %5358 = vmatpush1.bf16.msra.mxu0 %v6671_v26  ;;  %5390 = vmatpush1.bf16.msra.mxu1 %v6675_v31 }
 0xafa   :  { %5360 = vmatprep.subr.bf16.mxu0 %v6680_v18  ;;  %5392 = vmatprep.subr.bf16.mxu1 %v6682_v45 }
 0xafd   :  { %5362 = vmatpush1.bf16.msra.mxu0 %v6684_v59  ;;  %5394 = vmatpush1.bf16.msra.mxu1 %v6687_v34 }
 0xafe   :  { %5396 = vmatprep.subr.bf16.mxu0 %v6596_v61  ;;  %5428 = vmatprep.subr.bf16.mxu1 %v6598_v43 }
 0xbb3   :  { %v3322_v38 = vpop.f32.mrb[24].mxu0  ;;  %v3393_v55 = vpop.f32.mrb[32].mxu1 }
 0xbb4   :  { %v3324_v54 = vpop.f32.mrb[25].mxu0  ;;  %v3395_v41 = vpop.f32.mrb[33].mxu1 }
 0xbb5   :  { %v3402_v56 = vcombine.low %v3322_v38, %v3324_v54  ;;  %v3403_v19 = vcombine.low %v3393_v55, %v3395_v41 }
 0xbb7   :  { %v3410_v27 = vrot.slane %v3402_v56, %v6033_v9  ;;  %v3417_v2 = vrot.slane %v3403_v19, %v6033_v9 }
 0xbb9   :  { %v3418_v32 = vcombine.low %v3410_v27, %v3417_v2 }
 0xbbb   :  { %v3420_v33 = vadd.f32 %v3418_v32, %v2765_v50 }
 0xbbd   :  { %v4496_v10 = vmul.f32 -1.442695, %v3420_v33  ;;  %v3428_v39 = vrot.slane %v3420_v33, 6 }
 0xbbf   :  { %5765 = vpow2.f32 %v4496_v10 }
 0xbc9   :  { %v5766_v49 = vpop.eup %5765 }
 0xbca   :  { %v3424_v57 = vadd.f32 1.0, %v5766_v49 }
 0xbcc   :  { %5767 = vrcp.f32 %v3424_v57 }
 0xbcd   :  { %5769 = vtanh.f32 %v3428_v39 }
 0xbd6   :  { %v5768_v30 = vpop.eup %5767 }
 0xbd7   :  { %v3432_v13 = vrot.slane %v5768_v30, 2  ;;  %v5770_v37 = vpop.eup %5769  ;;  %v3438_v55 = vrot.slane %v5768_v30, 4 }
 0xbd8   :  { %v3435_v36 = vmul.f32 %v5770_v37, %v5768_v30 }
 0xbd9   :  { %v3434_v15 = vmul.f32 %v3432_v13, %v3250_v22 }
 0xbdb   :  { %v3436_v38 = vadd.f32 %v3435_v36, %v3434_v15 }
 0xbdd   :  { %5771 = vtanh.f32 %v3436_v38 }
 0xbe7   :  { %v5772_v54 = vpop.eup %5771 }
 0xbe8   :  { %v3440_v41 = vmul.f32 %v5772_v54, %v3438_v55 }
 0xbea   :  { %3507 = vmatmul.mubr.f32.vlgmr.msra.gmra.mrb[26].mxu0 %v3440_v41  ;;  %3578 = vmatmul.mubr.f32.vlgmr.msra.gmra.mrb[34].mxu1 %v3440_v41 }
 0xbeb   :  { %5398 = vmatpush1.bf16.msra.mxu0 %v6600_v25  ;;  %5430 = vmatpush1.bf16.msra.mxu1 %v6603_v63 }
 0xbec   :  { %5400 = vmatprep.subr.bf16.mxu0 %v6608_v16  ;;  %5432 = vmatprep.subr.bf16.mxu1 %v6610_v28 }
 0xbed   :  { %3692 = vmatprep.mubr.f32.mxu0 %v5912_v1  ;;  %3763 = vmatprep.mubr.f32.mxu1 %v5912_v1 }
 0xbef   :  { %5402 = vmatpush1.bf16.msra.mxu0 %v6612_v42  ;;  %5434 = vmatpush1.bf16.msra.mxu1 %v6615_v12 }
 0xbf0   :  { %5404 = vmatprep.subr.bf16.mxu0 %v6620_v44  ;;  %5436 = vmatprep.subr.bf16.mxu1 %v6622_v62 }
 0xbf3   :  { %5406 = vmatpush1.bf16.msra.mxu0 %v6624_v8  ;;  %5438 = vmatpush1.bf16.msra.mxu1 %v6627_v21 }
 0xbf4   :  { %5408 = vmatprep.subr.bf16.mxu0 %v6632_v48  ;;  %5440 = vmatprep.subr.bf16.mxu1 %v6634_v3 }
 0xbf7   :  { %5410 = vmatpush1.bf16.msra.mxu0 %v6636_v53  ;;  %5442 = vmatpush1.bf16.msra.mxu1 %v6639_v20 }
 0xbf8   :  { %5412 = vmatprep.subr.bf16.mxu0 %v6643_v11  ;;  %5444 = vmatprep.subr.bf16.mxu1 %v6646_v47 }
 0xbfb   :  { %5414 = vmatpush1.bf16.msra.mxu0 %v6648_v0  ;;  %5446 = vmatpush1.bf16.msra.mxu1 %v6651_v40 }
 0xbfc   :  { %5416 = vmatprep.subr.bf16.mxu0 %v6654_v35  ;;  %5448 = vmatprep.subr.bf16.mxu1 %v6656_v60 }
 0xbff   :  { %5418 = vmatpush1.bf16.msra.mxu0 %v6659_v23  ;;  %5450 = vmatpush1.bf16.msra.mxu1 %v6663_v5 }
 0xc00   :  { %5420 = vmatprep.subr.bf16.mxu0 %v6665_v29  ;;  %5452 = vmatprep.subr.bf16.mxu1 %v6668_v58 }
 0xc03   :  { %5422 = vmatpush1.bf16.msra.mxu0 %v6671_v26  ;;  %5454 = vmatpush1.bf16.msra.mxu1 %v6675_v31 }
 0xc04   :  { %5424 = vmatprep.subr.bf16.mxu0 %v6680_v18  ;;  %5456 = vmatprep.subr.bf16.mxu1 %v6682_v45 }
 0xc07   :  { %5426 = vmatpush1.bf16.msra.mxu0 %v6684_v59  ;;  %5458 = vmatpush1.bf16.msra.mxu1 %v6687_v34 }
 0xc08   :  { %5460 = vmatprep.subr.bf16.mxu0 %v6596_v61  ;;  %5492 = vmatprep.subr.bf16.mxu1 %v6598_v43 }
 0xcbd   :  { %v3508_v50 = vpop.f32.mrb[26].mxu0  ;;  %v3579_v22 = vpop.f32.mrb[34].mxu1 }
 0xcbe   :  { %v3510_v56 = vpop.f32.mrb[27].mxu0  ;;  %v3581_v19 = vpop.f32.mrb[35].mxu1 }
 0xcbf   :  { %v3588_v27 = vcombine.low %v3508_v50, %v3510_v56  ;;  %v3589_v2 = vcombine.low %v3579_v22, %v3581_v19 }
 0xcc1   :  { %v3596_v32 = vrot.slane %v3588_v27, %v6033_v9  ;;  %v3603_v33 = vrot.slane %v3589_v2, %v6033_v9 }
 0xcc3   :  { %v3604_v10 = vcombine.low %v3596_v32, %v3603_v33 }
 0xcc5   :  { %v3606_v49 = vadd.f32 %v3604_v10, %v2766_v7 }
 0xcc7   :  { %v4497_v57 = vmul.f32 -1.442695, %v3606_v49  ;;  %v3614_v13 = vrot.slane %v3606_v49, 6 }
 0xcc9   :  { %5773 = vpow2.f32 %v4497_v57 }
 0xcd3   :  { %v5774_v39 = vpop.eup %5773 }
 0xcd4   :  { %v3610_v30 = vadd.f32 1.0, %v5774_v39 }
 0xcd6   :  { %5775 = vrcp.f32 %v3610_v30 }
 0xcd7   :  { %5777 = vtanh.f32 %v3614_v13 }
 0xce0   :  { %v5776_v37 = vpop.eup %5775 }
 0xce1   :  { %v3618_v36 = vrot.slane %v5776_v37, 2  ;;  %v5778_v15 = vpop.eup %5777  ;;  %v3624_v50 = vrot.slane %v5776_v37, 4 }
 0xce2   :  { %v3621_v55 = vmul.f32 %v5778_v15, %v5776_v37 }
 0xce3   :  { %v3620_v54 = vmul.f32 %v3618_v36, %v3436_v38 }
 0xce5   :  { %v3622_v41 = vadd.f32 %v3621_v55, %v3620_v54 }
 0xce7   :  { %5779 = vtanh.f32 %v3622_v41 }
 0xcf1   :  { %v5780_v22 = vpop.eup %5779 }
 0xcf2   :  { %v3626_v56 = vmul.f32 %v5780_v22, %v3624_v50 }
 0xcf4   :  { %3693 = vmatmul.mubr.f32.vlgmr.msra.gmra.mrb[28].mxu0 %v3626_v56  ;;  %3764 = vmatmul.mubr.f32.vlgmr.msra.gmra.mrb[36].mxu1 %v3626_v56 }
 0xcf5   :  { %5462 = vmatpush1.bf16.msra.mxu0 %v6600_v25  ;;  %5494 = vmatpush1.bf16.msra.mxu1 %v6603_v63 }
 0xcf6   :  { %5464 = vmatprep.subr.bf16.mxu0 %v6608_v16  ;;  %5496 = vmatprep.subr.bf16.mxu1 %v6610_v28 }
 0xcf7   :  { %3878 = vmatprep.mubr.f32.mxu0 %v5912_v1  ;;  %3949 = vmatprep.mubr.f32.mxu1 %v5912_v1 }
 0xcf9   :  { %5466 = vmatpush1.bf16.msra.mxu0 %v6612_v42  ;;  %5498 = vmatpush1.bf16.msra.mxu1 %v6615_v12 }
 0xcfa   :  { %5468 = vmatprep.subr.bf16.mxu0 %v6620_v44  ;;  %5500 = vmatprep.subr.bf16.mxu1 %v6622_v62 }
 0xcfd   :  { %5470 = vmatpush1.bf16.msra.mxu0 %v6624_v8  ;;  %5502 = vmatpush1.bf16.msra.mxu1 %v6627_v21 }
 0xcfe   :  { %5472 = vmatprep.subr.bf16.mxu0 %v6632_v48  ;;  %5504 = vmatprep.subr.bf16.mxu1 %v6634_v3 }
 0xd01   :  { %5474 = vmatpush1.bf16.msra.mxu0 %v6636_v53  ;;  %5506 = vmatpush1.bf16.msra.mxu1 %v6639_v20 }
 0xd02   :  { %5476 = vmatprep.subr.bf16.mxu0 %v6643_v11  ;;  %5508 = vmatprep.subr.bf16.mxu1 %v6646_v47 }
 0xd05   :  { %5478 = vmatpush1.bf16.msra.mxu0 %v6648_v0  ;;  %5510 = vmatpush1.bf16.msra.mxu1 %v6651_v40 }
 0xd06   :  { %5480 = vmatprep.subr.bf16.mxu0 %v6654_v35  ;;  %5512 = vmatprep.subr.bf16.mxu1 %v6656_v60 }
 0xd09   :  { %5482 = vmatpush1.bf16.msra.mxu0 %v6659_v23  ;;  %5514 = vmatpush1.bf16.msra.mxu1 %v6663_v5 }
 0xd0a   :  { %5484 = vmatprep.subr.bf16.mxu0 %v6665_v29  ;;  %5516 = vmatprep.subr.bf16.mxu1 %v6668_v58 }
 0xd0d   :  { %5486 = vmatpush1.bf16.msra.mxu0 %v6671_v26  ;;  %5518 = vmatpush1.bf16.msra.mxu1 %v6675_v31 }
 0xd0e   :  { %5488 = vmatprep.subr.bf16.mxu0 %v6680_v18  ;;  %5520 = vmatprep.subr.bf16.mxu1 %v6682_v45 }
 0xd11   :  { %5490 = vmatpush1.bf16.msra.mxu0 %v6684_v59  ;;  %5522 = vmatpush1.bf16.msra.mxu1 %v6687_v34 }
 0xd12   :  { %5524 = vmatprep.subr.bf16.mxu0 %v6596_v61  ;;  %5556 = vmatprep.subr.bf16.mxu1 %v6598_v43 }
 0xdc7   :  { %v3694_v17 = vpop.f32.mrb[28].mxu0  ;;  %v3765_v6 = vpop.f32.mrb[36].mxu1 }
 0xdc8   :  { %v3696_v7 = vpop.f32.mrb[29].mxu0  ;;  %v3767_v38 = vpop.f32.mrb[37].mxu1 }
 0xdc9   :  { %v3774_v19 = vcombine.low %v3694_v17, %v3696_v7  ;;  %v3775_v27 = vcombine.low %v3765_v6, %v3767_v38 }
 0xdcb   :  { %v3782_v2 = vrot.slane %v3774_v19, %v6033_v9  ;;  %v3789_v32 = vrot.slane %v3775_v27, %v6033_v9 }
 0xdcd   :  { %v3790_v33 = vcombine.low %v3782_v2, %v3789_v32 }
 0xdcf   :  { %v3792_v10 = vadd.f32 %v3790_v33, %v2799_v24 }
 0xdd1   :  { %v4498_v49 = vmul.f32 -1.442695, %v3792_v10  ;;  %v3800_v30 = vrot.slane %v3792_v10, 6 }
 0xdd3   :  { %5781 = vpow2.f32 %v4498_v49 }
 0xddd   :  { %v5782_v57 = vpop.eup %5781 }
 0xdde   :  { %v3796_v39 = vadd.f32 1.0, %v5782_v57 }
 0xde0   :  { %5783 = vrcp.f32 %v3796_v39 }
 0xde1   :  { %5785 = vtanh.f32 %v3800_v30 }
 0xdea   :  { %v5784_v13 = vpop.eup %5783 }
 0xdeb   :  { %v3804_v37 = vrot.slane %v5784_v13, 2  ;;  %v5786_v36 = vpop.eup %5785  ;;  %v3810_v50 = vrot.slane %v5784_v13, 4 }
 0xdec   :  { %v3807_v15 = vmul.f32 %v5786_v36, %v5784_v13 }
 0xded   :  { %v3806_v55 = vmul.f32 %v3804_v37, %v3622_v41 }
 0xdef   :  { %v3808_v54 = vadd.f32 %v3807_v15, %v3806_v55 }
 0xdf1   :  { %5787 = vtanh.f32 %v3808_v54 }
 0xdfb   :  { %v5788_v22 = vpop.eup %5787 }
 0xdfc   :  { %v3812_v56 = vmul.f32 %v5788_v22, %v3810_v50  ;;  %v4377_v50 = vld [vmem:[%s7124_s7 + $0x30] sm:$0xff]  ;;  %v4378_v22 = vld [vmem:[%s7124_s7 + $0x38] sm:$0xff] }
 0xdfe   :  { %3879 = vmatmul.mubr.f32.vlgmr.msra.gmra.mrb[30].mxu0 %v3812_v56  ;;  %3950 = vmatmul.mubr.f32.vlgmr.msra.gmra.mrb[38].mxu1 %v3812_v56  ;;  %v5661_v56 = vpack.c.bf16 %v4378_v22, %v4377_v50 }
 0xdff   :  { %5526 = vmatpush1.bf16.msra.mxu0 %v6600_v25  ;;  %5558 = vmatpush1.bf16.msra.mxu1 %v6603_v63 }
 0xe00   :  { %5528 = vmatprep.subr.bf16.mxu0 %v6608_v16  ;;  %5560 = vmatprep.subr.bf16.mxu1 %v6610_v28 }
 0xe01   :  { %4064 = vmatprep.mubr.f32.mxu0 %v5912_v1  ;;  %4135 = vmatprep.mubr.f32.mxu1 %v5912_v1 }
 0xe03   :  { %5530 = vmatpush1.bf16.msra.mxu0 %v6612_v42  ;;  %5562 = vmatpush1.bf16.msra.mxu1 %v6615_v12 }
 0xe04   :  { %5532 = vmatprep.subr.bf16.mxu0 %v6620_v44  ;;  %5564 = vmatprep.subr.bf16.mxu1 %v6622_v62 }
 0xe07   :  { %5534 = vmatpush1.bf16.msra.mxu0 %v6624_v8  ;;  %5566 = vmatpush1.bf16.msra.mxu1 %v6627_v21 }
 0xe08   :  { %5536 = vmatprep.subr.bf16.mxu0 %v6632_v48  ;;  %5568 = vmatprep.subr.bf16.mxu1 %v6634_v3 }
 0xe0b   :  { %5538 = vmatpush1.bf16.msra.mxu0 %v6636_v53  ;;  %5570 = vmatpush1.bf16.msra.mxu1 %v6639_v20 }
 0xe0c   :  { %5540 = vmatprep.subr.bf16.mxu0 %v6643_v11  ;;  %5572 = vmatprep.subr.bf16.mxu1 %v6646_v47 }
 0xe0f   :  { %5542 = vmatpush1.bf16.msra.mxu0 %v6648_v0  ;;  %5574 = vmatpush1.bf16.msra.mxu1 %v6651_v40 }
 0xe10   :  { %5544 = vmatprep.subr.bf16.mxu0 %v6654_v35  ;;  %5576 = vmatprep.subr.bf16.mxu1 %v6656_v60 }
 0xe13   :  { %5546 = vmatpush1.bf16.msra.mxu0 %v6659_v23  ;;  %5578 = vmatpush1.bf16.msra.mxu1 %v6663_v5 }
 0xe14   :  { %5548 = vmatprep.subr.bf16.mxu0 %v6665_v29  ;;  %5580 = vmatprep.subr.bf16.mxu1 %v6668_v58 }
 0xe17   :  { %5550 = vmatpush1.bf16.msra.mxu0 %v6671_v26  ;;  %5582 = vmatpush1.bf16.msra.mxu1 %v6675_v31 }
 0xe18   :  { %5552 = vmatprep.subr.bf16.mxu0 %v6680_v18  ;;  %5584 = vmatprep.subr.bf16.mxu1 %v6682_v45 }
 0xe1b   :  { %5554 = vmatpush1.bf16.msra.mxu0 %v6684_v59  ;;  %5586 = vmatpush1.bf16.msra.mxu1 %v6687_v34 }
 0xe1c   :  { %5588 = vmatprep.subr.bf16.mxu0 %v6596_v61  ;;  %5620 = vmatprep.subr.bf16.mxu1 %v6598_v43 }
 0xed1   :  { %v3880_v24 = vpop.f32.mrb[30].mxu0  ;;  %v3951_v41 = vpop.f32.mrb[38].mxu1 }
 0xed2   :  { %v3882_v17 = vpop.f32.mrb[31].mxu0  ;;  %v3953_v6 = vpop.f32.mrb[39].mxu1 }
 0xed3   :  { %v3960_v7 = vcombine.low %v3880_v24, %v3882_v17  ;;  %v3961_v38 = vcombine.low %v3951_v41, %v3953_v6  ;;  %v4379_v24 = vld [vmem:[%s7124_s7 + $0x40] sm:$0xff]  ;;  %v4380_v41 = vld [vmem:[%s7124_s7 + $0x48] sm:$0xff]  ;;  %v4381_v6 = vld [vmem:[%s7124_s7 + $0x50] sm:$0xff] }
 0xed4   :  { %v5664_v17 = vpack.c.bf16 %v4380_v41, %v4379_v24 }
 0xed5   :  { %v3968_v19 = vrot.slane %v3960_v7, %v6033_v9  ;;  %v3975_v27 = vrot.slane %v3961_v38, %v6033_v9  ;;  %v4382_v7 = vld [vmem:[%s7124_s7 + $0x58] sm:$0xff] }
 0xed6   :  { %v5667_v38 = vpack.c.bf16 %v4382_v7, %v4381_v6 }
 0xed7   :  { %v3976_v2 = vcombine.low %v3968_v19, %v3975_v27  ;;  %v4383_v19 = vld [vmem:[%s7124_s7 + $0x60] sm:$0xff] }
 0xed9   :  { %v3978_v32 = vadd.f32 %v3976_v2, %v2800_v4  ;;  %v4376_v4 = vld [vmem:[%s7124_s7 + $0x28] sm:$0xff]  ;;  %v4385_v2 = vld [vmem:[%s7124_s7 + $0x70] sm:$0xff] }
 0xedb   :  { %v4499_v33 = vmul.f32 -1.442695, %v3978_v32  ;;  %v3986_v43 = vrot.slane %v3978_v32, 6  ;;  %v4386_v32 = vld [vmem:[%s7124_s7 + $0x78] sm:$0xff] }
 0xedd   :  { %5789 = vpow2.f32 %v4499_v33  ;;  %v5673_v33 = vpack.c.bf16 %v4386_v32, %v4385_v2 }
 0xee7   :  { %v5790_v61 = vpop.eup %5789 }
 0xee8   :  { %v3982_v10 = vadd.f32 1.0, %v5790_v61 }
 0xeea   :  { %5791 = vrcp.f32 %v3982_v10 }
 0xeeb   :  { %5793 = vtanh.f32 %v3986_v43 }
 0xef4   :  { %v5792_v49 = vpop.eup %5791 }
 0xef5   :  { %v3990_v57 = vrot.slane %v5792_v49, 2  ;;  %v5794_v39 = vpop.eup %5793  ;;  %v3996_v36 = vrot.slane %v5792_v49, 4 }
 0xef6   :  { %v3993_v30 = vmul.f32 %v5794_v39, %v5792_v49 }
 0xef7   :  { %v3992_v13 = vmul.f32 %v3990_v57, %v3808_v54  ;;  %v5658_v54 = vpack.c.bf16 %v4376_v4, %v4375_v51 }
 0xef9   :  { %v3994_v37 = vadd.f32 %v3993_v30, %v3992_v13 }
 0xefb   :  { %5795 = vtanh.f32 %v3994_v37 }
 0xf05   :  { %v5796_v15 = vpop.eup %5795 }
 0xf06   :  { %v3998_v55 = vmul.f32 %v5796_v15, %v3996_v36  ;;  %v7139_v36 = vcombine.high %v6791_v14, %v6797_v52 }
 0xf08   :  { %4065 = vmatmul.mubr.f32.vlgmr.msra.gmra.mrb[32].mxu0 %v3998_v55  ;;  %4136 = vmatmul.mubr.f32.vlgmr.msra.gmra.mrb[40].mxu1 %v3998_v55 }
 0xf09   :  { %5590 = vmatpush1.bf16.msra.mxu0 %v6600_v25  ;;  %5622 = vmatpush1.bf16.msra.mxu1 %v6603_v63 }
 0xf0a   :  { %5592 = vmatprep.subr.bf16.mxu0 %v6608_v16  ;;  %5624 = vmatprep.subr.bf16.mxu1 %v6610_v28 }
 0xf0b   :  { %4250 = vmatprep.mubr.f32.mxu0 %v5912_v1  ;;  %4321 = vmatprep.mubr.f32.mxu1 %v5912_v1 }
 0xf0d   :  { %5594 = vmatpush1.bf16.msra.mxu0 %v6612_v42  ;;  %5626 = vmatpush1.bf16.msra.mxu1 %v6615_v12 }
 0xf0e   :  { %5596 = vmatprep.subr.bf16.mxu0 %v6620_v44  ;;  %5628 = vmatprep.subr.bf16.mxu1 %v6622_v62 }
 0xf11   :  { %5598 = vmatpush1.bf16.msra.mxu0 %v6624_v8  ;;  %5630 = vmatpush1.bf16.msra.mxu1 %v6627_v21  ;;  %v7138_v21 = vcombine.low %v6791_v14, %v6797_v52  ;;  %v4502_v14 = vld [vmem:[%s7125_s8] ss:$0 sm:$0xff] }
 0xf12   :  { %5600 = vmatprep.subr.bf16.mxu0 %v6632_v48  ;;  %5632 = vmatprep.subr.bf16.mxu1 %v6634_v3 }
 0xf15   :  { %5602 = vmatpush1.bf16.msra.mxu0 %v6636_v53  ;;  %5634 = vmatpush1.bf16.msra.mxu1 %v6639_v20 }
 0xf16   :  { %5604 = vmatprep.subr.bf16.mxu0 %v6643_v11  ;;  %5636 = vmatprep.subr.bf16.mxu1 %v6646_v47 }
 0xf19   :  { %5606 = vmatpush1.bf16.msra.mxu0 %v6648_v0  ;;  %5638 = vmatpush1.bf16.msra.mxu1 %v6651_v40 }
 0xf1a   :  { %5608 = vmatprep.subr.bf16.mxu0 %v6654_v35  ;;  %5640 = vmatprep.subr.bf16.mxu1 %v6656_v60 }
 0xf1d   :  { %5610 = vmatpush1.bf16.msra.mxu0 %v6659_v23  ;;  %5642 = vmatpush1.bf16.msra.mxu1 %v6663_v5 }
 0xf1e   :  { %5612 = vmatprep.subr.bf16.mxu0 %v6665_v29  ;;  %5644 = vmatprep.subr.bf16.mxu1 %v6668_v58 }
 0xf21   :  { %5614 = vmatpush1.bf16.msra.mxu0 %v6671_v26  ;;  %5646 = vmatpush1.bf16.msra.mxu1 %v6675_v31  ;;  %v4371_v26 = vld [vmem:[%s7124_s7] sm:$0xff]  ;;  %v4372_v31 = vld [vmem:[%s7124_s7 + $0x8] sm:$0xff] }
 0xf22   :  { %5616 = vmatprep.subr.bf16.mxu0 %v6680_v18  ;;  %5648 = vmatprep.subr.bf16.mxu1 %v6682_v45  ;;  %v5652_v18 = vpack.c.bf16 %v4372_v31, %v4371_v26  ;;  %v5914_v45 = vmov 0.0|0.0  }
 0xf25   :  { %5618 = vmatpush1.bf16.msra.mxu0 %v6684_v59  ;;  %5650 = vmatpush1.bf16.msra.mxu1 %v6687_v34  ;;  %v4373_v59 = vld [vmem:[%s7124_s7 + $0x10] sm:$0xff]  ;;  %v4374_v34 = vld [vmem:[%s7124_s7 + $0x18] sm:$0xff] }
 0xf26   :  { %5651 = vmatprep.subr.bf16.mxu0 %v5914_v45  ;;  %v5655_v46 = vpack.c.bf16 %v4374_v34, %v4373_v59 }
 0xfdb   :  { %v4066_v25 = vpop.f32.mrb[32].mxu0  ;;  %v4137_v63 = vpop.f32.mrb[40].mxu1 }
 0xfdc   :  { %v4068_v16 = vpop.f32.mrb[33].mxu0  ;;  %v4139_v28 = vpop.f32.mrb[41].mxu1 }
 0xfdd   :  { %v4146_v42 = vcombine.low %v4066_v25, %v4068_v16  ;;  %v4147_v12 = vcombine.low %v4137_v63, %v4139_v28 }
 0xfdf   :  { %v4154_v44 = vrot.slane %v4146_v42, %v6033_v9  ;;  %v4161_v62 = vrot.slane %v4147_v12, %v6033_v9 }
 0xfe1   :  { %v4162_v8 = vcombine.low %v4154_v44, %v4161_v62 }
 0xfe3   :  { %v4164_v48 = vadd.f32 %v4162_v8, %v7138_v21 }
 0xfe5   :  { %v4500_v3 = vmul.f32 -1.442695, %v4164_v48  ;;  %v4172_v11 = vrot.slane %v4164_v48, 6 }
 0xfe7   :  { %5797 = vpow2.f32 %v4500_v3 }
 0xff1   :  { %v5798_v53 = vpop.eup %5797 }
 0xff2   :  { %v4168_v20 = vadd.f32 1.0, %v5798_v53 }
 0xff4   :  { %5799 = vrcp.f32 %v4168_v20 }
 0xff5   :  { %5801 = vtanh.f32 %v4172_v11 }
 0xffe   :  { %v5800_v47 = vpop.eup %5799 }
 0xfff   :  { %v4176_v0 = vrot.slane %v5800_v47, 2  ;;  %v5802_v40 = vpop.eup %5801  ;;  %v4182_v5 = vrot.slane %v5800_v47, 4 }
0x1000   :  { %v4179_v35 = vmul.f32 %v5802_v40, %v5800_v47 }
0x1001   :  { %v4178_v60 = vmul.f32 %v4176_v0, %v3994_v37 }
0x1003   :  { %v7044_v23 = vadd.f32 %v4179_v35, %v4178_v60 }
0x1005   :  { %5803 = vtanh.f32 %v7044_v23 }
0x100f   :  { %v5804_v29 = vpop.eup %5803 }
0x1010   :  { %v4184_v58 = vmul.f32 %v5804_v29, %v4182_v5 }
0x1012   :  { %4251 = vmatmul.mubr.f32.vlgmr.msra.gmra.mrb[34].mxu0 %v4184_v58  ;;  %4322 = vmatmul.mubr.f32.vlgmr.msra.gmra.mrb[42].mxu1 %v4184_v58 }
0x1013   :  { %5653 = vmatpush3.bf16.msra.mxu0 %v5652_v18  ;;  %4552 = vmatprep.mubr.msk.f32.mxu0 %vm5915_vm1, %v5912_v1  ;;  %v4384_v1 = vld [vmem:[%s7124_s7 + $0x68] sm:$0xff] }
0x1014   :  { %5654 = vmatprep.subr.bf16.mxu0 %v5914_v45  ;;  %v5670_v27 = vpack.c.bf16 %v4384_v1, %v4383_v19 }
0x1017   :  { %5656 = vmatpush3.bf16.msra.mxu0 %v5655_v46 }
0x1018   :  { %5657 = vmatprep.subr.bf16.mxu0 %v5914_v45 }
0x101b   :  { %5659 = vmatpush3.bf16.msra.mxu0 %v5658_v54 }
0x101c   :  { %5660 = vmatprep.subr.bf16.mxu0 %v5914_v45 }
0x101f   :  { %5662 = vmatpush3.bf16.msra.mxu0 %v5661_v56 }
0x1020   :  { %5663 = vmatprep.subr.bf16.mxu0 %v5914_v45 }
0x1023   :  { %5665 = vmatpush3.bf16.msra.mxu0 %v5664_v17 }
0x1024   :  { %5666 = vmatprep.subr.bf16.mxu0 %v5914_v45 }
0x1027   :  { %5668 = vmatpush3.bf16.msra.mxu0 %v5667_v38 }
0x1028   :  { %5669 = vmatprep.subr.bf16.mxu0 %v5914_v45 }
0x102b   :  { %5671 = vmatpush3.bf16.msra.mxu0 %v5670_v27 }
0x102c   :  { %5672 = vmatprep.subr.bf16.mxu0 %v5914_v45 }
0x102f   :  { %5674 = vmatpush3.bf16.msra.mxu0 %v5673_v33 }
0x10e5   :  { %v4252_v61 = vpop.f32.mrb[34].mxu0  ;;  %v4323_v10 = vpop.f32.mrb[42].mxu1 }
0x10e6   :  { %v4254_v43 = vpop.f32.mrb[35].mxu0  ;;  %v4325_v49 = vpop.f32.mrb[43].mxu1 }
0x10e7   :  { %v4332_v57 = vcombine.low %v4252_v61, %v4254_v43  ;;  %v4333_v39 = vcombine.low %v4323_v10, %v4325_v49 }
0x10e9   :  { %v4340_v30 = vrot.slane %v4332_v57, %v6033_v9  ;;  %v4347_v13 = vrot.slane %v4333_v39, %v6033_v9 }
0x10eb   :  { %v4348_v37 = vcombine.low %v4340_v30, %v4347_v13 }
0x10ed   :  { %v4350_v15 = vadd.f32 %v4348_v37, %v7139_v36 }
0x10ef   :  { %v4501_v55 = vmul.f32 -1.442695, %v4350_v15  ;;  %v4358_v16 = vrot.slane %v4350_v15, 6 }
0x10f1   :  { %5805 = vpow2.f32 %v4501_v55 }
0x10fb   :  { %v5806_v25 = vpop.eup %5805 }
0x10fc   :  { %v4354_v63 = vadd.f32 1.0, %v5806_v25 }
0x10fe   :  { %5807 = vrcp.f32 %v4354_v63 }
0x10ff   :  { %5809 = vtanh.f32 %v4358_v16 }
0x1108   :  { %v5808_v28 = vpop.eup %5807 }
0x1109   :  { %v4362_v42 = vrot.slane %v5808_v28, 2  ;;  %v5810_v12 = vpop.eup %5809  ;;  %v4368_v9 = vrot.slane %v5808_v28, 4 }
0x110a   :  { %v4365_v44 = vmul.f32 %v5810_v12, %v5808_v28 }
0x110b   :  { %v4364_v62 = vmul.f32 %v4362_v42, %v7044_v23 }
0x110d   :  { %v4366_v8 = vadd.f32 %v4365_v44, %v4364_v62 }
0x110f   :  { %5811 = vtanh.f32 %v4366_v8 }
0x1119   :  { %v5812_v21 = vpop.eup %5811 }
0x111a   :  { %v4370_v48 = vmul.f32 %v5812_v21, %v4368_v9 }
0x111c   :  { %4553 = vmatmul.mubr.f32.vlgmr.msra.gmra.mrb[36].mxu0 %v4370_v48 }
0x11ef   :  { %v4460_v52 = vpop.f32.mrb[36].mxu0 }
0x11f0   :  { %v4461_v3 = vadd.f32 %v4502_v14, %v4460_v52  ;;  %v4554_v53 = vpop.f32.mrb[37].mxu0 }
0x11f2   :  { %4465 = vst.msk [vmem:[#allocation10] sm:$0x3] %vm4464_vm2, %v4461_v3 }
0x11f3   :  { %5890 = shalt.err (!%p5887_p0)
}
0x11f4   :  { %s5891_s20 = scalar_lea.hbm %s7126_s9, 32 }
0x11f5   :  { %p5892_p1 = scmp.ne.s32.totalorder %s7126_s9, %s5891_s20  ;;  %p5895_p2 = scmp.lt.u32.totalorder %s5891_s20, %s7126_s9 }
0x11f7   :  { %p5897_p3 = pnand %p5895_p2, %p5892_p1 }
0x11f9   :  { %5900 = shalt.err (!%p5897_p3)
}
0x11fa   :  { %4475 = dma.vmem_to_hbm [thread:$0]  %s4473_s16, 32, %s7126_s9, [#allocation6]  }
0x11fb   :  { %5905 = dma.done.wait [#allocation6], 32  }
0x11fc   :  { %5906 = vsyncadd [#allocation6], 4294967264 }
0x11fd   :  { %4479 = vsyncpa [#allocation5], 1 }
0x11fe   :  { %4480 = vsyncpa [#allocation8], 1 }
0x11ff   :  { %4481 = vsyncpa [#allocation6], 1 }

</bundles_post_ra>
